<compile_context>
chip_gen: v6e
topology: v6e:2x2x1
jax: 0.10.0
libtpu: 0.0.40
codegen_flags: <defaults>
</compile_context>

<pallas_src>
import functools

import jax
import jax.numpy as jnp
from jax.experimental import pallas as pl
from jax.experimental.pallas import tpu as pltpu


def _round_up(x, m):
    return (x + m - 1) // m * m


def _conv_stats_kernel(p_ref, w_ref, y_ref, s_ref, *, tm, m_total, masked):
    """One M-tile of conv-as-matmul + per-channel sum / sumsq accumulation."""
    i = pl.program_id(0)
    # Single folded matmul over K = KD*KH*KW*Cin (bf16 operands, f32 accum).
    y = jnp.dot(p_ref[...], w_ref[...], preferred_element_type=jnp.float32)
    y_ref[...] = y

    ym = y
    if masked:  # mask rows beyond the true M so BN stats stay exact
        row = jax.lax.broadcasted_iota(jnp.int32, y.shape, 0) + i * tm
        ym = jnp.where(row < m_total, y, 0.0)

    upd = jnp.concatenate(
        [jnp.sum(ym, axis=0, keepdims=True),
         jnp.sum(ym * ym, axis=0, keepdims=True),
         jnp.zeros((6, y.shape[1]), jnp.float32)],
        axis=0)

    @pl.when(i == 0)
    def _init():
        s_ref[...] = jnp.zeros_like(s_ref)

    s_ref[...] += upd


def _affine_relu_kernel(y_ref, scale_ref, shift_ref, o_ref):
    o_ref[...] = jnp.maximum(y_ref[...] * scale_ref[...] + shift_ref[...], 0.0)


def conv3d_bn_relu(x, weight, bias, gamma, beta, *, stride, padding,
                   batch_norm=True, eps=1e-5, tm=512):
    """voxelnet Conv3d block forward: conv3d (+bias) -> BN3d(train) -> ReLU.

    x: (N, Cin, D, H, W) f32.  weight: (Cout, Cin, KD, KH, KW).
    Returns (N, Cout, OD, OH, OW) f32.
    """
    n, cin, d, h, w = x.shape
    cout, cin_w, kd, kh, kw = weight.shape
    assert cin == cin_w
    sd, sh, sw = stride
    pd, ph, pw = padding
    od = (d + 2 * pd - kd) // sd + 1
    oh = (h + 2 * ph - kh) // sh + 1
    ow = (w + 2 * pw - kw) // sw + 1

    m = n * od * oh * ow
    k = kd * kh * kw * cin
    cpad = _round_up(cout, 128)               # lane-dense output channels
    tm = min(tm, _round_up(m, 8))             # rows per tile (sublane-aligned)
    mpad = _round_up(m, tm)
    grid_m = mpad // tm

    # ---- glue: NCDHW -> NDHWC, pad, im2col with taps folded into K ----
    # TODO(synk): stream taps straight from the padded NDHWC tensor (index_map
    # element offsets / manual DMA) instead of materializing the KD*KH*KW-fold
    # im2col copy in HBM.
    xt = jnp.transpose(x, (0, 2, 3, 4, 1)).astype(jnp.float32)
    xp = jnp.pad(xt, ((0, 0), (pd, pd), (ph, ph), (pw, pw), (0, 0)))
    cols = []
    for a in range(kd):
        for b in range(kh):
            for c in range(kw):
                sl = xp[:, a:a + (od - 1) * sd + 1:sd,
                        b:b + (oh - 1) * sh + 1:sh,
                        c:c + (ow - 1) * sw + 1:sw, :]
                cols.append(sl.reshape(m, cin))
    patches = jnp.concatenate(cols, axis=1).astype(jnp.bfloat16)     # (M, K)
    patches = jnp.pad(patches, ((0, mpad - m), (0, 0)))

    w_mat = jnp.transpose(weight, (2, 3, 4, 1, 0)).reshape(k, cout)
    w_mat = jnp.pad(w_mat, ((0, 0), (0, cpad - cout))).astype(jnp.bfloat16)

    # ---- phase 1: conv matmul + per-channel sum / sumsq accumulation ----
    kernel1 = functools.partial(_conv_stats_kernel, tm=tm, m_total=m,
                                masked=(mpad != m))
    y_conv, stats = pl.pallas_call(
        kernel1,
        grid=(grid_m,),
        in_specs=[pl.BlockSpec((tm, k), lambda i: (i, 0)),
                  pl.BlockSpec((k, cpad), lambda i: (0, 0))],
        out_specs=(pl.BlockSpec((tm, cpad), lambda i: (i, 0)),
                   pl.BlockSpec((8, cpad), lambda i: (0, 0))),
        out_shape=(jax.ShapeDtypeStruct((mpad, cpad), jnp.float32),
                   jax.ShapeDtypeStruct((8, cpad), jnp.float32)),
        compiler_params=pltpu.CompilerParams(
            dimension_semantics=("arbitrary",),      # stats output accumulates
            vmem_limit_bytes=64 * 1024 * 1024),
    )(patches, w_mat)

    # ---- tiny glue: fold BN (biased var, training mode) into scale/shift ----
    if batch_norm:
        csum = stats[0, :cout]
        csumsq = stats[1, :cout]
        mean = csum / m
        var = csumsq / m - mean * mean        # biased variance, as in PyTorch
        inv = jax.lax.rsqrt(var + eps)
        scale = gamma.astype(jnp.float32) * inv
        # conv bias is cancelled exactly by the mean subtraction -> skipped.
        shift = beta.astype(jnp.float32) - mean * scale
    else:
        scale = jnp.ones((cout,), jnp.float32)
        shift = bias.astype(jnp.float32)
    scale = jnp.pad(scale, (0, cpad - cout)).reshape(1, cpad)
    shift = jnp.pad(shift, (0, cpad - cout)).reshape(1, cpad)

    # ---- phase 2: normalize + ReLU (parallel over M tiles) ----
    out_flat = pl.pallas_call(
        _affine_relu_kernel,
        grid=(grid_m,),
        in_specs=[pl.BlockSpec((tm, cpad), lambda i: (i, 0)),
                  pl.BlockSpec((1, cpad), lambda i: (0, 0)),
                  pl.BlockSpec((1, cpad), lambda i: (0, 0))],
        out_specs=pl.BlockSpec((tm, cpad), lambda i: (i, 0)),
        out_shape=jax.ShapeDtypeStruct((mpad, cpad), jnp.float32),
        compiler_params=pltpu.CompilerParams(
            dimension_semantics=("parallel",),
            vmem_limit_bytes=64 * 1024 * 1024),
    )(y_conv, scale, shift)

    out = out_flat[:m, :cout].reshape(n, od, oh, ow, cout)
    return jnp.transpose(out, (0, 4, 1, 2, 3))


_CML_CFGS = [((2, 1, 1), (1, 1, 1)),   # conv3d_1: Conv3d(128, 64, 3, s, p)
             ((1, 1, 1), (0, 1, 1)),   # conv3d_2: Conv3d( 64, 64, 3, s, p)
             ((2, 1, 1), (1, 1, 1))]   # conv3d_3: Conv3d( 64, 64, 3, s, p)


def cml_forward(x, params, *, tm=512):
    """CML forward: three stacked Conv3d+BN3d+ReLU blocks."""
    for (wgt, b, g, bt), (s, p) in zip(params, _CML_CFGS):
        x = conv3d_bn_relu(x, wgt, b, g, bt, stride=s, padding=p, tm=tm)
    return x


# ---------------------------- pure-JAX reference ----------------------------
def _conv3d_bn_relu_ref(x, weight, bias, gamma, beta, *, stride, padding,
                        eps=1e-5):
    y = jax.lax.conv_general_dilated(
        x.astype(jnp.float32), weight.astype(jnp.float32),
        window_strides=stride,
        padding=[(p, p) for p in padding],
        dimension_numbers=("NCDHW", "OIDHW", "NCDHW"))
    y = y + bias.reshape(1, -1, 1, 1, 1)
    mean = jnp.mean(y, axis=(0, 2, 3, 4), keepdims=True)
    var = jnp.mean(jnp.square(y - mean), axis=(0, 2, 3, 4), keepdims=True)
    y = (y - mean) * jax.lax.rsqrt(var + eps)
    y = y * gamma.reshape(1, -1, 1, 1, 1) + beta.reshape(1, -1, 1, 1, 1)
    return jnp.maximum(y, 0.0)


def _cml_ref(x, params):
    for (wgt, b, g, bt), (s, p) in zip(params, _CML_CFGS):
        x = _conv3d_bn_relu_ref(x, wgt, b, g, bt, stride=s, padding=p)
    return x


if __name__ == "__main__":
    # Small but structurally faithful CML input: channel counts are fixed by
    # the module (128 -> 64 -> 64 -> 64); D=10 survives the three D-reductions
    # (10 -> 5 -> 3 -> 2); H = W = 8 kept small.
    N, CIN, D, H, W = 1, 128, 10, 8, 8
    K3 = 3

    key = jax.random.PRNGKey(0)
    kx, k1, k2, k3 = jax.random.split(key, 4)
    x = jax.random.normal(kx, (N, CIN, D, H, W), dtype=jnp.float32)

    layer_channels = [(CIN, 64), (64, 64), (64, 64)]
    params = []
    for kk, (ci, co) in zip((k1, k2, k3), layer_channels):
        kw_, kb_ = jax.random.split(kk)
        fan_in = ci * K3 * K3 * K3
        wgt = jax.random.normal(kw_, (co, ci, K3, K3, K3),
                                jnp.float32) * (fan_in ** -0.5)
        b = 0.1 * jax.random.normal(kb_, (co,), jnp.float32)
        gamma = jnp.ones((co,), jnp.float32)    # BatchNorm3d default init
        beta = jnp.zeros((co,), jnp.float32)
        params.append((wgt, b, gamma, beta))

    # tm=128 keeps several M tiles even at this toy size so the gridded,
    # masked and accumulating code paths are exercised; default tm=512 is the
    # intended tile for realistic voxelnet shapes.
    y = cml_forward(x, params, tm=128)
    y = jax.block_until_ready(y)

    y_ref = _cml_ref(x, params)
    assert y.shape == (N, 64, 2, H, W), y.shape
    err = float(jnp.max(jnp.abs(y - y_ref)))
    # bf16 matmul operands (f32 accumulation) vs a full-f32 reference across
    # three stacked BN-normalized layers -> allow a few 1e-2 absolute slack.
    assert err < 1.5e-1, err
    print("KERNEL_OK")
</pallas_src>

<mosaic_0001>
module attributes {stable_mosaic.version = 11 : i64} {
  func.func @_conv_stats_kernel(%arg0: i32, %arg1: memref<128x3456xbf16, #tpu.memory_space<vmem>>, %arg2: memref<3456x128xbf16, #tpu.memory_space<vmem>>, %arg3: memref<128x128xf32, #tpu.memory_space<vmem>>, %arg4: memref<8x128xf32, #tpu.memory_space<vmem>>) attributes {dimension_semantics = [#tpu.dimension_semantics<arbitrary>], iteration_bounds = array<i64: 3>, scalar_prefetch = 0 : i64, scratch_operands = 0 : i64, tpu.core_type = #tpu.core_type<tc>, window_params = [{transform_indices = @transform_0, window_bounds = array<i64: 128, 3456>}, {pipeline_mode = #tpu.pipeline_mode<synchronous>, transform_indices = @transform_1, window_bounds = array<i64: 3456, 128>}, {transform_indices = @transform_2, window_bounds = array<i64: 128, 128>}, {pipeline_mode = #tpu.pipeline_mode<synchronous>, transform_indices = @transform_3, window_bounds = array<i64: 8, 128>}]} {
    %c0 = arith.constant 0 : index
    %c0_0 = arith.constant 0 : index
    %0 = vector.load %arg1[%c0, %c0_0] : memref<128x3456xbf16, #tpu.memory_space<vmem>>, vector<128x3456xbf16>
    %c0_1 = arith.constant 0 : index
    %c0_2 = arith.constant 0 : index
    %1 = vector.load %arg2[%c0_1, %c0_2] : memref<3456x128xbf16, #tpu.memory_space<vmem>>, vector<3456x128xbf16>
    %cst = arith.constant dense<0.000000e+00> : vector<128x128xf32>
    %2 = tpu.matmul %0, %1, %cst {dimension_numbers = #tpu.dot_dimension_numbers<[1], [0], [0], [1], [0, 0, 1, 1], [], []>} : vector<128x3456xbf16>, vector<3456x128xbf16>, vector<128x128xf32> -> vector<128x128xf32>
    %c0_3 = arith.constant 0 : index
    %c0_4 = arith.constant 0 : index
    %3 = vector.load %arg3[%c0_3, %c0_4] : memref<128x128xf32, #tpu.memory_space<vmem>>, vector<128x128xf32>
    tpu.vector_store %arg3[%c0_3, %c0_4], %2 {strides = array<i32>} : memref<128x128xf32, #tpu.memory_space<vmem>>, vector<128x128xf32>,
    %4 = tpu.iota {dimensions = array<i32: 0>} : vector<128x128xi32>
    %c128_i32 = arith.constant 128 : i32
    %5 = arith.muli %arg0, %c128_i32 : i32
    %6 = vector.broadcast %5 : i32 to vector<128x128xi32>
    %7 = arith.addi %4, %6 : vector<128x128xi32>
    %c320_i32 = arith.constant 320 : i32
    %8 = vector.broadcast %c320_i32 : i32 to vector<128x128xi32>
    %9 = arith.cmpi slt, %7, %8 : vector<128x128xi32>
    %cst_5 = arith.constant 0.000000e+00 : f32
    %10 = vector.broadcast %cst_5 : f32 to vector<128x128xf32>
    %11 = arith.select %9, %2, %10 : vector<128x128xi1>, vector<128x128xf32>
    %cst_6 = arith.constant dense<0.000000e+00> : vector<128xf32>
    %12 = vector.multi_reduction <add>, %11, %cst_6 [0] : vector<128x128xf32> to vector<128xf32>
    %13 = vector.shape_cast %12 : vector<128xf32> to vector<1x128xf32>
    %14 = arith.mulf %11, %11 : vector<128x128xf32>
    %cst_7 = arith.constant dense<0.000000e+00> : vector<128xf32>
    %15 = vector.multi_reduction <add>, %14, %cst_7 [0] : vector<128x128xf32> to vector<128xf32>
    %16 = vector.shape_cast %15 : vector<128xf32> to vector<1x128xf32>
    %cst_8 = arith.constant 0.000000e+00 : f32
    %17 = vector.broadcast %cst_8 : f32 to vector<6x128xf32>
    %18 = tpu.concatenate %13, %16, %17 in 0 : vector<1x128xf32>, vector<1x128xf32>, vector<6x128xf32> -> vector<8x128xf32>
    %c0_i32 = arith.constant 0 : i32
    %19 = arith.cmpi eq, %arg0, %c0_i32 : i32
    %20 = arith.extui %19 : i1 to i32
    %c0_i32_9 = arith.constant 0 : i32
    %21 = arith.cmpi ne, %20, %c0_i32_9 : i32
    scf.if %21 {
      %cst_14 = arith.constant 0.000000e+00 : f32
      %25 = vector.broadcast %cst_14 : f32 to vector<8x128xf32>
      %c0_15 = arith.constant 0 : index
      %c0_16 = arith.constant 0 : index
      %26 = vector.load %arg4[%c0_15, %c0_16] : memref<8x128xf32, #tpu.memory_space<vmem>>, vector<8x128xf32>
      tpu.vector_store %arg4[%c0_15, %c0_16], %25 {strides = array<i32>} : memref<8x128xf32, #tpu.memory_space<vmem>>, vector<8x128xf32>,
    } else {
    }
    %c0_10 = arith.constant 0 : index
    %c0_11 = arith.constant 0 : index
    %22 = vector.load %arg4[%c0_10, %c0_11] : memref<8x128xf32, #tpu.memory_space<vmem>>, vector<8x128xf32>
    %23 = arith.addf %22, %18 : vector<8x128xf32>
    %c0_12 = arith.constant 0 : index
    %c0_13 = arith.constant 0 : index
    %24 = vector.load %arg4[%c0_12, %c0_13] : memref<8x128xf32, #tpu.memory_space<vmem>>, vector<8x128xf32>
    tpu.vector_store %arg4[%c0_12, %c0_13], %23 {strides = array<i32>} : memref<8x128xf32, #tpu.memory_space<vmem>>, vector<8x128xf32>,
    return
  }
  func.func @transform_0(%arg0: i32) -> (i32, i32) {
    %c0_i32 = arith.constant 0 : i32
    %c0_i32_0 = arith.constant 0 : i32
    return %arg0, %c0_i32 : i32, i32
  }
  func.func @transform_1(%arg0: i32) -> (i32, i32) {
    %c0_i32 = arith.constant 0 : i32
    %c0_i32_0 = arith.constant 0 : i32
    %c0_i32_1 = arith.constant 0 : i32
    return %c0_i32, %c0_i32_0 : i32, i32
  }
  func.func @transform_2(%arg0: i32) -> (i32, i32) {
    %c0_i32 = arith.constant 0 : i32
    %c0_i32_0 = arith.constant 0 : i32
    return %arg0, %c0_i32 : i32, i32
  }
  func.func @transform_3(%arg0: i32) -> (i32, i32) {
    %c0_i32 = arith.constant 0 : i32
    %c0_i32_0 = arith.constant 0 : i32
    %c0_i32_1 = arith.constant 0 : i32
    return %c0_i32, %c0_i32_0 : i32, i32
  }
}

</mosaic_0001>

<bundles_post_ra>
// kernel: tpu_custom_call.1
= control target key start
LH: loop header
LB: loop body
LE: loop exit
PB: predicated region body
PF: predicated region fallthrough
CT: control target
= control target key end

     0   :  { %9 = vsyncpa [#allocation3], 0  ;;  %s7919_s0 = inlined_call_operand.hbm [shape: bf16[384,3456], index: 0, kind: input, shape index: {}]   ;;  %s7920_s1 = inlined_call_operand.hbm [shape: bf16[3456,128], index: 1, kind: input, shape index: {}]   ;;  %s7921_s2 = inlined_call_operand.hbm [shape: f32[384,128], index: 2, kind: output, shape index: {0}]   ;;  %s7922_s3 = inlined_call_operand.hbm [shape: f32[8,128], index: 3, kind: output, shape index: {1}]  }
   0x1   :  { %11 = vsyncpa [#allocation3 + $0x1], 0 }
   0x2   :  { %12 = vsyncpa [#allocation6], 0 }
   0x3   :  { %13 = vsyncpa [#allocation4], 0 }
   0x4   :  { %15 = vsyncpa [#allocation4 + $0x1], 0 }
   0x5   :  { %16 = vsyncpa [#allocation9], 0  ;;  %s7002_s12 = smov 0   ;;  %s7004_s13 = smov 0  }
   0x6   :  { %s7006_s14 = smov 0   ;;  %s7008_s15 = smov 0  }
   0x7 LB: > { %s7023_s16 = sadd.s32 4294967295, %s6969_s15   ;;  %s4877_s17 = sadd.s32 4294967294, %s6969_s15   ;;  %s6969_s15 = sphi %s7008_s15, %s8006_s15   ;;  %s6965_s14 = sphi %s7006_s14, %s8005_s14   ;;  %s6961_s13 = sphi %s7004_s13, %s8004_s13   ;;  %s6957_s12 = sphi %s7002_s12, %s8003_s12  }
   0x8   : > { %p42_p0 = scmp.ne.s32.totalorder %s6961_s13, %s6957_s12  ;;  %p7923_p1 = scmp.eq.s32.totalorder %s7023_s16, 0 }
   0x9   : > { %p93_p3 = scmp.eq.s32.totalorder %s4877_s17, 2  ;;  %p4878_p5 = scmp.ge.s32.totalorder %s6969_s15, 1 }
   0xa   : > { %p7032_p4 = por %p7923_p1, %p42_p0  ;;  %p121_p7 = scmp.lt.s32.totalorder %s6969_s15, 4 }
   0xb   : > { %p7037_p6 = por %p93_p3, %p42_p0  ;;  %s6971_s21 = smov [#allocation5]  }
   0xc   : > { %s7927_s18 = scalar_select %p7032_p4, 1, 0 }
   0xd   : > { %s7928_s19 = scalar_select %p7037_p6, 1, 0 }
   0xe   : > { %p7043_p9 = pnand %p4878_p5, %p121_p7  ;;  %s133_s22 = sshll.u32 %s6971_s21, 4  ;;  %s134_s22 = int_to_ptr.vmem [resolvable:$true] %s133_s22 }
   0xf   : > { %s7056_s24 = sadd.s32 1, %s6969_s15   ;;  %s29_s25 = sadd.s32 1, %s6965_s14 }
  0x10   : > { %s7929_s20 = scalar_select %p7043_p9, 1, 0 }
  0x11   : > { %p6224_p10 = pneg %p7043_p9  ;;  %s26_s26 = ssub.s32 %s6969_s15, %s7056_s24 }
  0x12   : > { %s6830_s27 = scalar_lea.vmem %s134_s22, 27648  ;;  %p6838_p5 = scmp.lt.s32.totalorder %s134_s22, %s134_s22 }
  0x13   : > { %p7051_p11 = pnand %p6224_p10, %p7923_p1  ;;  %p6831_p13 = scmp.ne.s32.totalorder %s134_s22, %s6830_s27 }
  0x14   : > { %p6839_p7 = scmp.lt.s32.totalorder %s6830_s27, %s6830_s27 }
  0x15   : > { %p6821_p12 = pneg %p7051_p11 }
  0x16   : > { %p6840_p8 = por %p6839_p7, %p6838_p5 }
  0x17   : > { %p6833_p0 = pnand %p6831_p13, %p6821_p12 }
  0x19   : > { %p6834_p3 = pneg %p6833_p0 }
  0x1b   : > { %p6841_p2 = pnand %p6840_p8, %p6834_p3 }
  0x1d   : > { %6844 = shalt.err (!%p6841_p2)
}
  0x1e   : > { %s6972_s28 = smov 64   ;;  %s6973_s29 = smov 4  }
  0x1f   : > { %6227 = dma.hbm_to_vmem [thread:$0]  (!%p7051_p11), %s7920_s1, 27648, %s134_s22, [#allocation6], %s6972_s28, %s6972_s28, %s6973_s29  }
  0x20   : > { %p27_p10 = scmp.eq.s32.totalorder %s26_s26, 0  ;;  %p36_p12 = scmp.ne.s32.totalorder %s6965_s14, %s6961_s13 }
  0x21   : > { %p37_p8 = scmp.eq.s32.totalorder %s6969_s15, 0  ;;  %p6237_p2 = scmp.lt.s32.totalorder %s6969_s15, 3 }
  0x22   : > { %s7073_s5 = scalar_select %p27_p10, %s6965_s14, %s29_s25  }
  0x23   : > { %p38_p13 = por %p37_p8, %p36_p12  ;;  %p7931_p0 = scmp.eq.s32.totalorder %s7023_s16, 2 }
  0x24   : > { %s147_s7 = sand.u32 1, %s6965_s14   ;;  %s6210_s8 = smul.u32 27648, %s6969_s15 }
  0x25   : > { %p7077_p3 = por %p7931_p0, %p36_p12  ;;  %s6209_s9 = smul.u32 1728, %s147_s7 }
  0x26   : > { %s7086_s17 = scalar_lea.hbm %s7919_s0, %s6210_s8  ;;  %p7088_p11 = pnand %p6237_p2, %p38_p13 }
  0x27   : > { %s7932_s6 = scalar_select %p7077_p3, 1, 0 }
  0x28   : > { %s151_s22 = scalar_lea.vmem [#allocation2], %s6209_s9  ;;  %s7094_s25 = scalar_lea.sflag [#allocation3], %s147_s7 }
  0x29   : > { %s159_s23 = sshll.u32 %s151_s22, 4  ;;  %s6845_s26 = scalar_lea.hbm %s7086_s17, 27648  ;;  %s7092_s23 = int_to_ptr.vmem [resolvable:$true] %s159_s23 }
  0x2a   : > { %p6846_p5 = scmp.ne.s32.totalorder %s7086_s17, %s6845_s26  ;;  %p6847_p7 = pneg %p7088_p11 }
  0x2b   : > { %s6850_s29 = scalar_lea.hbm %s7919_s0, 82944  ;;  %p6851_p8 = scmp.lt.s32.totalorder %s7086_s17, %s7919_s0 }
  0x2c   : > { %p6848_p10 = pnand %p6847_p7, %p6846_p5  ;;  %p6852_p2 = scmp.lt.s32.totalorder %s6850_s29, %s6845_s26 }
  0x2e   : > { %p6849_p12 = pneg %p6848_p10  ;;  %p6853_p13 = por %p6852_p2, %p6851_p8 }
  0x30   : > { %p6854_p0 = pnand %p6853_p13, %p6849_p12 }
  0x32   : > { %6857 = shalt.err (!%p6854_p0)
}
  0x33   : > { %s6858_s7 = scalar_lea.vmem %s7092_s23, 27648  ;;  %s6974_s8 = smov [#allocation2]  }
  0x34   : > { %p6859_p1 = scmp.ne.s32.totalorder %s7092_s23, %s6858_s7  ;;  %s6863_s9 = sshll.u32 %s6974_s8, 4  ;;  %s6864_s9 = int_to_ptr.vmem [resolvable:$false] %s6863_s9 }
  0x35   : > { %s6865_s10 = scalar_lea.vmem %s6864_s9, 55296  ;;  %p6866_p10 = scmp.lt.s32.totalorder %s7092_s23, %s6864_s9 }
  0x36   : > { %p6861_p6 = pnand %p6859_p1, %p6847_p7  ;;  %p6867_p3 = scmp.lt.s32.totalorder %s6865_s10, %s6858_s7 }
  0x38   : > { %p6862_p5 = pneg %p6861_p6  ;;  %p6868_p4 = por %p6867_p3, %p6866_p10 }
  0x3a   : > { %p6869_p9 = pnand %p6868_p4, %p6862_p5 }
  0x3c   : > { %6872 = shalt.err (!%p6869_p9)
}
  0x3d   : > { %s6975_s11 = smov 1728   ;;  %s6976_s22 = smov 108  }
  0x3e   : > { %6231 = dma.hbm_to_vmem [thread:$0]  (!%p7088_p11), %s7086_s17, 27648, %s7092_s23, %s7094_s25, %s6975_s11, %s6975_s11, %s6976_s22  }
  0x3f   : > { %p7934_p1 = scmp.ne.s32.totalorder %s7929_s20, 0 }
  0x41   : > { %171 = sbr.rel (%p7934_p1) target bundleno = 822 (0x336), region = 28 }
  0x46   : > { %s7118_s26 = sand.u32 1, %s6961_s13   ;;  %p7935_p4 = scmp.ne.s32.totalorder %s7927_s18, 0 }
  0x47   : > { %s6211_s27 = smul.u32 1728, %s7118_s26  ;;  %s174_s28 = scalar_lea.sflag [#allocation3], %s7118_s26 }
  0x49   : > { %s7122_s29 = scalar_lea.vmem [#allocation2], %s6211_s27 }
  0x4a   : > { %6940 = dma.done.wait (%p7935_p4), %s174_s28, 27648  }
  0x4b   : > { %6942 = vsyncadd (%p7935_p4), %s174_s28, 4294939648  ;;  %p7936_p6 = scmp.eq.s32.totalorder %s7023_s16, 0 }
  0x4d   : > { %6944 = dma.done.wait (%p7936_p6), [#allocation6], 27648   ;;  %p7937_p9 = pmov %p7936_p6 }
  0x4e   : > { %v6283_v0 = vld [vmem:[#allocation5 + $0x78] sm:$0xff]   ;;  %v6287_v4 = vld [vmem:[#allocation5 + $0x70] sm:$0xff]   ;;  %v6291_v8 = vld [vmem:[#allocation5 + $0x68] sm:$0xff]   ;;  %s5319_s18 = sshll.u32 %s7023_s16, 7  ;;  %s4886_s20 = sshll.u32 %s7118_s26, 7 }
  0x4f   : > { %6946 = vsyncadd (%p7937_p9), [#allocation6], 4294939648  ;;  %v6284_v1 = vld [vmem:[#allocation5 + $0xf8] sm:$0xff]   ;;  %5329 = vmatprep.subr.bf16.mxu0 %v6283_v0  ;;  %v6288_v5 = vld [vmem:[#allocation5 + $0xf0] sm:$0xff]   ;;  %s7725_s17 = scalar_lea.vmem [#allocation7], %s4886_s20  ;;  %p7996_p3 = scmp.ne.s32.totalorder %s7023_s16, 0 }
  0x50   : > { %v6285_v2 = vld [vmem:[#allocation5 + $0x38] sm:$0xff]   ;;  %5393 = vmatprep.subr.bf16.mxu1 %v6284_v1  ;;  %v6289_v6 = vld [vmem:[#allocation5 + $0x30] sm:$0xff]   ;;  %v6292_v9 = vld [vmem:[#allocation5 + $0xe8] sm:$0xff]  }
  0x51   : > { %v6286_v3 = vld [vmem:[#allocation5 + $0xb8] sm:$0xff]   ;;  %5330 = vmatpush3.bf16.msra.mxu0 %v6285_v2  ;;  %v6290_v7 = vld [vmem:[#allocation5 + $0xb0] sm:$0xff]   ;;  %v6293_v10 = vld [vmem:[#allocation5 + $0x28] sm:$0xff]  }
  0x52   : > { %5394 = vmatpush3.bf16.msra.mxu1 %v6286_v3  ;;  %5331 = vmatprep.subr.bf16.mxu0 %v6287_v4  ;;  %v6294_v11 = vld [vmem:[#allocation5 + $0xa8] sm:$0xff]   ;;  %v6295_v12 = vld [vmem:[#allocation5 + $0x60] sm:$0xff]   ;;  %v6299_v16 = vld [vmem:[#allocation5 + $0x58] sm:$0xff]  }
  0x53   : > { %5395 = vmatprep.subr.bf16.mxu1 %v6288_v5  ;;  %v6296_v13 = vld [vmem:[#allocation5 + $0xe0] sm:$0xff]   ;;  %v6300_v17 = vld [vmem:[#allocation5 + $0xd8] sm:$0xff]   ;;  %v6303_v20 = vld [vmem:[#allocation5 + $0x50] sm:$0xff]  }
  0x54   : > { %v6297_v14 = vld [vmem:[#allocation5 + $0x20] sm:$0xff]   ;;  %v6301_v18 = vld [vmem:[#allocation5 + $0x18] sm:$0xff]   ;;  %v6304_v21 = vld [vmem:[#allocation5 + $0xd0] sm:$0xff]  }
  0x55   : > { %5332 = vmatpush3.bf16.msra.mxu0 %v6289_v6  ;;  %v6298_v15 = vld [vmem:[#allocation5 + $0xa0] sm:$0xff]   ;;  %v6302_v19 = vld [vmem:[#allocation5 + $0x98] sm:$0xff]   ;;  %v6305_v22 = vld [vmem:[#allocation5 + $0x10] sm:$0xff]  }
  0x56   : > { %5396 = vmatpush3.bf16.msra.mxu1 %v6290_v7  ;;  %5333 = vmatprep.subr.bf16.mxu0 %v6291_v8  ;;  %v6306_v23 = vld [vmem:[#allocation5 + $0x90] sm:$0xff]   ;;  %v6307_v24 = vld [vmem:[#allocation5 + $0x48] sm:$0xff]   ;;  %v6311_v28 = vld [vmem:[#allocation5 + $0x40] sm:$0xff]  }
  0x57   : > { %5397 = vmatprep.subr.bf16.mxu1 %v6292_v9  ;;  %v6308_v25 = vld [vmem:[#allocation5 + $0xc8] sm:$0xff]   ;;  %v6312_v29 = vld [vmem:[#allocation5 + $0xc0] sm:$0xff]   ;;  %v6321_v36 = vld [vmem:[#allocation5 + $0x178] sm:$0xff]  }
  0x58   : > { %v6309_v26 = vld [vmem:[#allocation5 + $0x8] sm:$0xff]   ;;  %v6313_v30 = vld [vmem:[#allocation5] sm:$0xff]   ;;  %v6322_v37 = vld [vmem:[#allocation5 + $0x138] sm:$0xff]  }
  0x59   : > { %5334 = vmatpush3.bf16.msra.mxu0 %v6293_v10  ;;  %v6310_v27 = vld [vmem:[#allocation5 + $0x88] sm:$0xff]   ;;  %v6314_v31 = vld [vmem:[#allocation5 + $0x80] sm:$0xff]   ;;  %v6329_v42 = vld [vmem:[#allocation5 + $0x170] sm:$0xff]  }
  0x5a   : > { %5398 = vmatpush3.bf16.msra.mxu1 %v6294_v11  ;;  %5335 = vmatprep.subr.bf16.mxu0 %v6295_v12  ;;  %v6315_v32 = vld [vmem:[%s7122_s29] ss:$108 sps:$4 sm:$0xff]   ;;  %v6317_v33 = vld [vmem:[%s7122_s29 + $0x4] ss:$108 sps:$4 sm:$0xff]   ;;  %v6318_v34 = vld [vmem:[%s7122_s29 + $0x8] ss:$108 sps:$4 sm:$0xff]  }
  0x5b   : > { %5399 = vmatprep.subr.bf16.mxu1 %v6296_v13  ;;  %v6320_v35 = vld [vmem:[%s7122_s29 + $0xc] ss:$108 sps:$4 sm:$0xff]   ;;  %3279 = vmatprep.mubr.bf16.mxu0 %v6317_v33  ;;  %v6323_v38 = vld [vmem:[%s7122_s29 + $0xdc] ss:$108 sps:$4 sm:$0xff]   ;;  %v6325_v39 = vld [vmem:[%s7122_s29 + $0xe4] ss:$108 sps:$4 sm:$0xff]  }
  0x5c   : > { %3376 = vmatprep.mubr.bf16.mxu1 %v6320_v35  ;;  %v6327_v40 = vld [vmem:[%s7122_s29 + $0xd8] ss:$108 sps:$4 sm:$0xff]   ;;  %v6328_v41 = vld [vmem:[%s7122_s29 + $0xe0] ss:$108 sps:$4 sm:$0xff]   ;;  %v6330_v43 = vld [vmem:[#allocation5 + $0x130] sm:$0xff]  }
  0x5d   : > { %5336 = vmatpush3.bf16.msra.mxu0 %v6297_v14  ;;  %v6331_v44 = vld [vmem:[%s7122_s29 + $0x1b4] ss:$108 sps:$4 sm:$0xff]   ;;  %v6333_v45 = vld [vmem:[%s7122_s29 + $0x1bc] ss:$108 sps:$4 sm:$0xff]   ;;  %v6336_v49 = vld [vmem:[%s7122_s29 + $0x1b8] ss:$108 sps:$4 sm:$0xff]  }
  0x5e   : > { %5400 = vmatpush3.bf16.msra.mxu1 %v6298_v15  ;;  %5337 = vmatprep.subr.bf16.mxu0 %v6299_v16  ;;  %v6337_v46 = vld [vmem:[#allocation5 + $0x168] sm:$0xff]   ;;  %v6335_v48 = vld [vmem:[%s7122_s29 + $0x1b0] ss:$108 sps:$4 sm:$0xff]   ;;  %v6341_v51 = vld [vmem:[%s7122_s29 + $0x294] ss:$108 sps:$4 sm:$0xff]  }
  0x5f   : > { %5401 = vmatprep.subr.bf16.mxu1 %v6300_v17  ;;  %v6338_v47 = vld [vmem:[#allocation5 + $0x128] sm:$0xff]   ;;  %v6345_v52 = vld [vmem:[#allocation5 + $0x160] sm:$0xff]   ;;  %v6353_v55 = vld [vmem:[#allocation5 + $0x158] sm:$0xff]  }
  0x60   : > { %v6339_v50 = vld [vmem:[%s7122_s29 + $0x28c] ss:$108 sps:$4 sm:$0xff]   ;;  %v6346_v53 = vld [vmem:[#allocation5 + $0x120] sm:$0xff]   ;;  %v6343_v54 = vld [vmem:[%s7122_s29 + $0x288] ss:$108 sps:$4 sm:$0xff]  }
  0x61   : > { %5338 = vmatpush3.bf16.msra.mxu0 %v6301_v18  ;;  %v6344_v56 = vld [vmem:[%s7122_s29 + $0x290] ss:$108 sps:$4 sm:$0xff]   ;;  %v6349_v59 = vld [vmem:[%s7122_s29 + $0x36c] ss:$108 sps:$4 sm:$0xff]   ;;  %v6352_v2 = vld [vmem:[%s7122_s29 + $0x368] ss:$108 sps:$4 sm:$0xff]  }
  0x62   : > { %5402 = vmatpush3.bf16.msra.mxu1 %v6302_v19  ;;  %5339 = vmatprep.subr.bf16.mxu0 %v6303_v20  ;;  %v6347_v57 = vld [vmem:[%s7122_s29 + $0x364] ss:$108 sps:$4 sm:$0xff]   ;;  %v6354_v58 = vld [vmem:[#allocation5 + $0x1f8] sm:$0xff]   ;;  %v6351_v0 = vld [vmem:[%s7122_s29 + $0x360] ss:$108 sps:$4 sm:$0xff]  }
  0x63   : > { %5403 = vmatprep.subr.bf16.mxu1 %v6304_v21  ;;  %v6355_v60 = vld [vmem:[#allocation5 + $0x118] sm:$0xff]   ;;  %v6357_v62 = vld [vmem:[#allocation5 + $0x1f0] sm:$0xff]   ;;  %v6367_v6 = vld [vmem:[#allocation5 + $0x1e8] sm:$0xff]  }
  0x64   : > { %v6356_v61 = vld [vmem:[#allocation5 + $0x1b8] sm:$0xff]   ;;  %v6362_v63 = vld [vmem:[#allocation5 + $0x1b0] sm:$0xff]   ;;  %v6368_v7 = vld [vmem:[#allocation5 + $0x1a8] sm:$0xff]  }
  0x65   : > { %5340 = vmatpush3.bf16.msra.mxu0 %v6305_v22  ;;  %v6365_v1 = vld [vmem:[#allocation5 + $0x150] sm:$0xff]   ;;  %v6358_v3 = vld [vmem:[%s7122_s29 + $0x43c] ss:$108 sps:$4 sm:$0xff]   ;;  %v6369_v8 = vld [vmem:[#allocation5 + $0x1e0] sm:$0xff]  }
  0x66   : > { %5404 = vmatpush3.bf16.msra.mxu1 %v6306_v23  ;;  %5341 = vmatprep.subr.bf16.mxu0 %v6307_v24  ;;  %v6366_v4 = vld [vmem:[#allocation5 + $0x110] sm:$0xff]   ;;  %v6374_v9 = vld [vmem:[#allocation5 + $0x1a0] sm:$0xff]   ;;  %v6377_v13 = vld [vmem:[#allocation5 + $0x148] sm:$0xff]  }
  0x67   : > { %5405 = vmatprep.subr.bf16.mxu1 %v6308_v25  ;;  %v6360_v5 = vld [vmem:[%s7122_s29 + $0x444] ss:$108 sps:$4 sm:$0xff]   ;;  %v6364_v11 = vld [vmem:[%s7122_s29 + $0x440] ss:$108 sps:$4 sm:$0xff]   ;;  %v6372_v14 = vld [vmem:[%s7122_s29 + $0x51c] ss:$108 sps:$4 sm:$0xff]  }
  0x68   : > { %v6363_v10 = vld [vmem:[%s7122_s29 + $0x438] ss:$108 sps:$4 sm:$0xff]   ;;  %v6370_v12 = vld [vmem:[%s7122_s29 + $0x514] ss:$108 sps:$4 sm:$0xff]   ;;  %v6378_v15 = vld [vmem:[#allocation5 + $0x108] sm:$0xff]  }
  0x69   : > { %5342 = vmatpush3.bf16.msra.mxu0 %v6309_v26  ;;  %v6379_v16 = vld [vmem:[#allocation5 + $0x1d8] sm:$0xff]   ;;  %v6381_v18 = vld [vmem:[#allocation5 + $0x1d0] sm:$0xff]   ;;  %v6389_v24 = vld [vmem:[#allocation5 + $0x140] sm:$0xff]  }
  0x6a   : > { %5406 = vmatpush3.bf16.msra.mxu1 %v6310_v27  ;;  %5343 = vmatprep.subr.bf16.mxu0 %v6311_v28  ;;  %v6380_v17 = vld [vmem:[#allocation5 + $0x198] sm:$0xff]   ;;  %v6386_v20 = vld [vmem:[#allocation5 + $0x190] sm:$0xff]   ;;  %v6390_v25 = vld [vmem:[#allocation5 + $0x100] sm:$0xff]  }
  0x6b   : > { %5407 = vmatprep.subr.bf16.mxu1 %v6312_v29  ;;  %v6375_v19 = vld [vmem:[%s7122_s29 + $0x510] ss:$108 sps:$4 sm:$0xff]   ;;  %v6376_v21 = vld [vmem:[%s7122_s29 + $0x518] ss:$108 sps:$4 sm:$0xff]   ;;  %v6384_v23 = vld [vmem:[%s7122_s29 + $0x5f4] ss:$108 sps:$4 sm:$0xff]  }
  0x6c   : > { %v6382_v22 = vld [vmem:[%s7122_s29 + $0x5ec] ss:$108 sps:$4 sm:$0xff]   ;;  %v6393_v28 = vld [vmem:[#allocation5 + $0x1c0] sm:$0xff]   ;;  %v6394_v35 = vld [vmem:[%s7122_s29 + $0x10] ss:$108 sps:$4 sm:$0xff]  }
  0x6d   : > { %5344 = vmatpush3.bf16.msra.mxu0 %v6313_v30  ;;  %v6391_v26 = vld [vmem:[#allocation5 + $0x1c8] sm:$0xff]   ;;  %v6397_v29 = vld [vmem:[#allocation5 + $0x180] sm:$0xff]   ;;  %v6398_v30 = vld [vmem:[#allocation5 + $0x278] sm:$0xff]  }
  0x6e   : > { %5408 = vmatpush3.bf16.msra.mxu1 %v6314_v31  ;;  %5457 = vmatprep.subr.bf16.mxu0 %v6321_v36  ;;  %v6392_v27 = vld [vmem:[#allocation5 + $0x188] sm:$0xff]   ;;  %v6396_v33 = vld [vmem:[%s7122_s29 + $0x14] ss:$108 sps:$4 sm:$0xff]   ;;  %v6399_v36 = vld [vmem:[%s7122_s29 + $0x18] ss:$108 sps:$4 sm:$0xff]  }
  0x6f   : > { %5521 = vmatprep.subr.bf16.mxu1 %v6354_v58  ;;  %v6387_v31 = vld [vmem:[%s7122_s29 + $0x5e8] ss:$108 sps:$4 sm:$0xff]  }
  0x70   : > { %3280 = vmatmul.mubr.bf16.vlgmr.msra.gmra.mxu0 %v6315_v32  ;;  %v6388_v32 = vld [vmem:[%s7122_s29 + $0x5f0] ss:$108 sps:$4 sm:$0xff]  }
  0x71   : > { %3377 = vmatmul.mubr.bf16.vlgmr.msra.gmra.mxu1 %v6318_v34  ;;  %5458 = vmatpush3.bf16.msra.mxu0 %v6322_v37  ;;  %v6401_v34 = vld [vmem:[%s7122_s29 + $0x1c] ss:$108 sps:$4 sm:$0xff]   ;;  %v6440_v58 = vld [vmem:[#allocation5 + $0x2b0] sm:$0xff]  }
  0x72   : > { %3287 = vmatprep.mubr.bf16.mxu0 %v6323_v38  ;;  %3384 = vmatprep.mubr.bf16.mxu1 %v6325_v39  ;;  %v6402_v37 = vld [vmem:[#allocation5 + $0x238] sm:$0xff]   ;;  %v6406_v39 = vld [vmem:[#allocation5 + $0x270] sm:$0xff]  }
  0x73   : > { %5459 = vmatprep.subr.bf16.mxu0 %v6329_v42  ;;  %5522 = vmatpush3.bf16.msra.mxu1 %v6356_v61  ;;  %v6403_v38 = vld [vmem:[%s7122_s29 + $0xec] ss:$108 sps:$4 sm:$0xff]   ;;  %v6405_v42 = vld [vmem:[%s7122_s29 + $0xe8] ss:$108 sps:$4 sm:$0xff]  }
  0x74   : > { %5523 = vmatprep.subr.bf16.mxu1 %v6357_v62  ;;  %v6445_v61 = vld [vmem:[#allocation5 + $0x210] sm:$0xff]   ;;  %v6421_v62 = vld [vmem:[%s7122_s29 + $0x298] ss:$108 sps:$4 sm:$0xff]  }
  0x75   : > { %5460 = vmatpush3.bf16.msra.mxu0 %v6330_v43  ;;  %v6414_v43 = vld [vmem:[#allocation5 + $0x268] sm:$0xff]  }
  0x76   : > { %5461 = vmatprep.subr.bf16.mxu0 %v6337_v46  ;;  %v6415_v46 = vld [vmem:[%s7122_s29 + $0x1cc] ss:$108 sps:$4 sm:$0xff]  }
  0x77   : > { %5524 = vmatpush3.bf16.msra.mxu1 %v6362_v63  ;;  %v6447_v63 = vld [vmem:[#allocation5 + $0x2e8] sm:$0xff]  }
  0x78   : > { %3288 = vmatmul.mubr.bf16.gmra.mxu0 %v6327_v40  ;;  %5525 = vmatprep.subr.bf16.mxu1 %v6367_v6  ;;  %v6407_v40 = vld [vmem:[%s7122_s29 + $0xf4] ss:$108 sps:$4 sm:$0xff]   ;;  %v6454_v6 = vld [vmem:[#allocation5 + $0x248] sm:$0xff]  }
  0x79   : > { %3385 = vmatmul.mubr.bf16.gmra.mxu1 %v6328_v41  ;;  %3295 = vmatprep.mubr.bf16.mxu0 %v6331_v44  ;;  %v6409_v41 = vld [vmem:[#allocation5 + $0x230] sm:$0xff]  }
  0x7a   : > { %3392 = vmatprep.mubr.bf16.mxu1 %v6333_v45  ;;  %5462 = vmatpush3.bf16.msra.mxu0 %v6338_v47  ;;  %v6410_v44 = vld [vmem:[%s7122_s29 + $0xf0] ss:$108 sps:$4 sm:$0xff]   ;;  %v6417_v47 = vld [vmem:[#allocation5 + $0x228] sm:$0xff]  }
  0x7b   : > { %5463 = vmatprep.subr.bf16.mxu0 %v6345_v52  ;;  %5526 = vmatpush3.bf16.msra.mxu1 %v6368_v7  ;;  %v6411_v45 = vld [vmem:[%s7122_s29 + $0x1c4] ss:$108 sps:$4 sm:$0xff]   ;;  %v6430_v52 = vld [vmem:[#allocation5 + $0x258] sm:$0xff]   ;;  %v6457_v7 = vld [vmem:[#allocation5 + $0x208] sm:$0xff]  }
  0x7c   : > { %5527 = vmatprep.subr.bf16.mxu1 %v6369_v8  ;;  %v6429_v8 = vld [vmem:[%s7122_s29 + $0x370] ss:$108 sps:$4 sm:$0xff]  }
  0x7e   : > { %5464 = vmatpush3.bf16.msra.mxu0 %v6346_v53  ;;  %v6435_v53 = vld [vmem:[#allocation5 + $0x2b8] sm:$0xff]  }
  0x7f   : > { %5465 = vmatprep.subr.bf16.mxu0 %v6353_v55  ;;  %5528 = vmatpush3.bf16.msra.mxu1 %v6374_v9  ;;  %v6437_v55 = vld [vmem:[#allocation5 + $0x2f0] sm:$0xff]   ;;  %v6459_v9 = vld [vmem:[#allocation5 + $0x2d8] sm:$0xff]  }
  0x80   : > { %3296 = vmatmul.mubr.bf16.gmra.mxu0 %v6335_v48  ;;  %5529 = vmatprep.subr.bf16.mxu1 %v6379_v16  ;;  %v6422_v48 = vld [vmem:[#allocation5 + $0x260] sm:$0xff]  }
  0x81   : > { %3393 = vmatmul.mubr.bf16.gmra.mxu1 %v6336_v49  ;;  %3303 = vmatprep.mubr.bf16.mxu0 %v6339_v50  ;;  %v6431_v49 = vld [vmem:[#allocation5 + $0x2f8] sm:$0xff]   ;;  %v6425_v50 = vld [vmem:[#allocation5 + $0x220] sm:$0xff]  }
  0x82   : > { %3400 = vmatprep.mubr.bf16.mxu1 %v6341_v51  ;;  %5466 = vmatpush3.bf16.msra.mxu0 %v6355_v60  ;;  %v6413_v51 = vld [vmem:[%s7122_s29 + $0x1c0] ss:$108 sps:$4 sm:$0xff]   ;;  %v6442_v60 = vld [vmem:[#allocation5 + $0x250] sm:$0xff]  }
  0x83   : > { %5467 = vmatprep.subr.bf16.mxu0 %v6365_v1  ;;  %5530 = vmatpush3.bf16.msra.mxu1 %v6380_v17  ;;  %v6448_v1 = vld [vmem:[#allocation5 + $0x2a8] sm:$0xff]   ;;  %v6466_v16 = vld [vmem:[#allocation5 + $0x240] sm:$0xff]  }
  0x84   : > { %5531 = vmatprep.subr.bf16.mxu1 %v6381_v18  ;;  %v6441_v17 = vld [vmem:[%s7122_s29 + $0x448] ss:$108 sps:$4 sm:$0xff]   ;;  %v6469_v18 = vld [vmem:[#allocation5 + $0x200] sm:$0xff]  }
  0x86   : > { %5468 = vmatpush3.bf16.msra.mxu0 %v6366_v4  ;;  %v6432_v4 = vld [vmem:[%s7122_s29 + $0x37c] ss:$108 sps:$4 sm:$0xff]  }
  0x87   : > { %5469 = vmatprep.subr.bf16.mxu0 %v6377_v13  ;;  %5532 = vmatpush3.bf16.msra.mxu1 %v6386_v20  ;;  %v6461_v13 = vld [vmem:[#allocation5 + $0x2d0] sm:$0xff]  }
  0x88   : > { %3304 = vmatmul.mubr.bf16.gmra.mxu0 %v6343_v54  ;;  %5533 = vmatprep.subr.bf16.mxu1 %v6391_v26  ;;  %v6418_v54 = vld [vmem:[%s7122_s29 + $0x1c8] ss:$108 sps:$4 sm:$0xff]   ;;  %v6450_v20 = vld [vmem:[%s7122_s29 + $0x524] ss:$108 sps:$4 sm:$0xff]   ;;  %v6478_v26 = vld [vmem:[#allocation5 + $0x378] sm:$0xff]  }
  0x89   : > { %3401 = vmatmul.mubr.bf16.gmra.mxu1 %v6344_v56  ;;  %3311 = vmatprep.mubr.bf16.mxu0 %v6347_v57  ;;  %v6419_v56 = vld [vmem:[%s7122_s29 + $0x29c] ss:$108 sps:$4 sm:$0xff]   ;;  %v6423_v57 = vld [vmem:[%s7122_s29 + $0x2a4] ss:$108 sps:$4 sm:$0xff]  }
  0x8a   : > { %3408 = vmatprep.mubr.bf16.mxu1 %v6349_v59  ;;  %5470 = vmatpush3.bf16.msra.mxu0 %v6378_v15  ;;  %v6434_v59 = vld [vmem:[#allocation5 + $0x218] sm:$0xff]   ;;  %v6464_v15 = vld [vmem:[#allocation5 + $0x290] sm:$0xff]  }
  0x8b   : > { %5471 = vmatprep.subr.bf16.mxu0 %v6389_v24  ;;  %5534 = vmatpush3.bf16.msra.mxu1 %v6392_v27  ;;  %v6455_v24 = vld [vmem:[%s7122_s29 + $0x52c] ss:$108 sps:$4 sm:$0xff]  }
  0x8c   : > { %5535 = vmatprep.subr.bf16.mxu1 %v6393_v28  ;;  %v6453_v27 = vld [vmem:[%s7122_s29 + $0x520] ss:$108 sps:$4 sm:$0xff]   ;;  %v6458_v28 = vld [vmem:[%s7122_s29 + $0x528] ss:$108 sps:$4 sm:$0xff]  }
  0x8e   : > { %5472 = vmatpush3.bf16.msra.mxu0 %v6390_v25  ;;  %v6477_v25 = vld [vmem:[#allocation5 + $0x280] sm:$0xff]  }
  0x8f   : > { %5585 = vmatprep.subr.bf16.mxu0 %v6398_v30  ;;  %5536 = vmatpush3.bf16.msra.mxu1 %v6397_v29  ;;  %v6462_v29 = vld [vmem:[%s7122_s29 + $0x5fc] ss:$108 sps:$4 sm:$0xff]   ;;  %v6467_v30 = vld [vmem:[%s7122_s29 + $0x604] ss:$108 sps:$4 sm:$0xff]  }
  0x90   : > { %3312 = vmatmul.mubr.bf16.gmra.mxu0 %v6351_v0  ;;  %5649 = vmatprep.subr.bf16.mxu1 %v6431_v49  ;;  %v6426_v0 = vld [vmem:[%s7122_s29 + $0x2a0] ss:$108 sps:$4 sm:$0xff]  }
  0x91   : > { %3409 = vmatmul.mubr.bf16.gmra.mxu1 %v6352_v2  ;;  %3319 = vmatprep.mubr.bf16.mxu0 %v6358_v3  ;;  %v6449_v2 = vld [vmem:[#allocation5 + $0x2e0] sm:$0xff]  }
  0x92   : > { %3416 = vmatprep.mubr.bf16.mxu1 %v6360_v5  ;;  %v6427_v3 = vld [vmem:[%s7122_s29 + $0x374] ss:$108 sps:$4 sm:$0xff]  }
  0x93   : > { %v6452_v5 = vld [vmem:[#allocation5 + $0x2a0] sm:$0xff]  }
  0x94   : > { %v6491_v49 = vld [vmem:[%s7122_s29 + $0x1d4] ss:$108 sps:$4 sm:$0xff]  }
  0x98   : > { %3320 = vmatmul.mubr.bf16.gmra.mxu0 %v6363_v10  ;;  %v6436_v10 = vld [vmem:[%s7122_s29 + $0x378] ss:$108 sps:$4 sm:$0xff]  }
  0x99   : > { %3417 = vmatmul.mubr.bf16.gmra.mxu1 %v6364_v11  ;;  %3327 = vmatprep.mubr.bf16.mxu0 %v6370_v12  ;;  %v6438_v11 = vld [vmem:[%s7122_s29 + $0x44c] ss:$108 sps:$4 sm:$0xff]  }
  0x9a   : > { %3424 = vmatprep.mubr.bf16.mxu1 %v6372_v14  ;;  %v6460_v12 = vld [vmem:[#allocation5 + $0x298] sm:$0xff]   ;;  %v6443_v14 = vld [vmem:[%s7122_s29 + $0x454] ss:$108 sps:$4 sm:$0xff]  }
  0xa0   : > { %3328 = vmatmul.mubr.bf16.gmra.mxu0 %v6375_v19  ;;  %v6446_v19 = vld [vmem:[%s7122_s29 + $0x450] ss:$108 sps:$4 sm:$0xff]  }
  0xa1   : > { %3425 = vmatmul.mubr.bf16.gmra.mxu1 %v6376_v21  ;;  %3335 = vmatprep.mubr.bf16.mxu0 %v6382_v22  ;;  %v6471_v21 = vld [vmem:[#allocation5 + $0x2c8] sm:$0xff]  }
  0xa2   : > { %3432 = vmatprep.mubr.bf16.mxu1 %v6384_v23  ;;  %v6472_v22 = vld [vmem:[#allocation5 + $0x288] sm:$0xff]   ;;  %v6473_v23 = vld [vmem:[#allocation5 + $0x2c0] sm:$0xff]  }
  0xa8   : > { %3336 = vmatmul.mubr.bf16.gmra.mxu0 %v6387_v31  ;;  %v6465_v31 = vld [vmem:[%s7122_s29 + $0x5f8] ss:$108 sps:$4 sm:$0xff]  }
  0xa9   : > { %3433 = vmatmul.mubr.bf16.gmra.mxu1 %v6388_v32  ;;  %3473 = vmatprep.mubr.bf16.mxu0 %v6396_v33  ;;  %v6470_v32 = vld [vmem:[%s7122_s29 + $0x600] ss:$108 sps:$4 sm:$0xff]   ;;  %v6476_v33 = vld [vmem:[%s7122_s29 + $0x24] ss:$108 sps:$4 sm:$0xff]  }
  0xaa   : > { %3570 = vmatprep.mubr.bf16.mxu1 %v6401_v34  ;;  %v6481_v34 = vld [vmem:[%s7122_s29 + $0x2c] ss:$108 sps:$4 sm:$0xff]  }
  0xb0   : > { %3474 = vmatmul.mubr.bf16.vlgmr.msra.gmra.mxu0 %v6394_v35  ;;  %v6474_v35 = vld [vmem:[%s7122_s29 + $0x20] ss:$108 sps:$4 sm:$0xff]  }
  0xb1   : > { %5586 = vmatpush3.bf16.msra.mxu0 %v6402_v37  ;;  %3571 = vmatmul.mubr.bf16.vlgmr.msra.gmra.mxu1 %v6399_v36  ;;  %v6479_v36 = vld [vmem:[%s7122_s29 + $0x28] ss:$108 sps:$4 sm:$0xff]   ;;  %v6482_v37 = vld [vmem:[#allocation5 + $0x338] sm:$0xff]  }
  0xb2   : > { %3481 = vmatprep.mubr.bf16.mxu0 %v6403_v38  ;;  %5587 = vmatprep.subr.bf16.mxu0 %v6406_v39  ;;  %v6511_v38 = vld [vmem:[#allocation5 + $0x3f8] sm:$0xff]  }
  0xb3   : > { %3578 = vmatprep.mubr.bf16.mxu1 %v6407_v40  ;;  %5650 = vmatpush3.bf16.msra.mxu1 %v6435_v53  ;;  %v6483_v39 = vld [vmem:[%s7122_s29 + $0xfc] ss:$108 sps:$4 sm:$0xff]   ;;  %v6486_v40 = vld [vmem:[#allocation5 + $0x370] sm:$0xff]  }
  0xb4   : > { %5651 = vmatprep.subr.bf16.mxu1 %v6437_v55  ;;  %v6527_v53 = vld [vmem:[#allocation5 + $0x3e8] sm:$0xff]   ;;  %v6529_v55 = vld [vmem:[#allocation5 + $0x3e0] sm:$0xff]  }
  0xb5   : > { %5588 = vmatpush3.bf16.msra.mxu0 %v6409_v41  ;;  %v6487_v41 = vld [vmem:[%s7122_s29 + $0x104] ss:$108 sps:$4 sm:$0xff]  }
  0xb6   : > { %5589 = vmatprep.subr.bf16.mxu0 %v6414_v43  ;;  %v6517_v43 = vld [vmem:[#allocation5 + $0x3f0] sm:$0xff]  }
  0xb7   : > { %5652 = vmatpush3.bf16.msra.mxu1 %v6440_v58  ;;  %v6498_v58 = vld [vmem:[%s7122_s29 + $0x1d8] ss:$108 sps:$4 sm:$0xff]  }
  0xb8   : > { %3482 = vmatmul.mubr.bf16.gmra.mxu0 %v6405_v42  ;;  %5653 = vmatprep.subr.bf16.mxu1 %v6447_v63  ;;  %v6515_v42 = vld [vmem:[#allocation5 + $0x3b8] sm:$0xff]  }
  0xb9   : > { %3579 = vmatmul.mubr.bf16.gmra.mxu1 %v6410_v44  ;;  %3489 = vmatprep.mubr.bf16.mxu0 %v6411_v45  ;;  %v6489_v44 = vld [vmem:[#allocation5 + $0x330] sm:$0xff]   ;;  %v6485_v45 = vld [vmem:[%s7122_s29 + $0xf8] ss:$108 sps:$4 sm:$0xff]  }
  0xba   : > { %3586 = vmatprep.mubr.bf16.mxu1 %v6415_v46  ;;  %5590 = vmatpush3.bf16.msra.mxu0 %v6417_v47  ;;  %v6494_v46 = vld [vmem:[#allocation5 + $0x368] sm:$0xff]   ;;  %v6514_v63 = vld [vmem:[#allocation5 + $0x318] sm:$0xff]  }
  0xbb   : > { %5591 = vmatprep.subr.bf16.mxu0 %v6422_v48  ;;  %5654 = vmatpush3.bf16.msra.mxu1 %v6448_v1  ;;  %v6490_v47 = vld [vmem:[%s7122_s29 + $0x100] ss:$108 sps:$4 sm:$0xff]   ;;  %v6520_v48 = vld [vmem:[#allocation5 + $0x3b0] sm:$0xff]  }
  0xbc   : > { %5655 = vmatprep.subr.bf16.mxu1 %v6449_v2  ;;  %v6525_v1 = vld [vmem:[#allocation5 + $0x310] sm:$0xff]   ;;  %v6539_v2 = vld [vmem:[#allocation5 + $0x3d8] sm:$0xff]  }
  0xbe   : > { %5592 = vmatpush3.bf16.msra.mxu0 %v6425_v50  ;;  %v6495_v50 = vld [vmem:[%s7122_s29 + $0x1dc] ss:$108 sps:$4 sm:$0xff]  }
  0xbf   : > { %5593 = vmatprep.subr.bf16.mxu0 %v6430_v52  ;;  %5656 = vmatpush3.bf16.msra.mxu1 %v6452_v5  ;;  %v6502_v52 = vld [vmem:[#allocation5 + $0x360] sm:$0xff]   ;;  %v6541_v5 = vld [vmem:[#allocation5 + $0x3d0] sm:$0xff]  }
  0xc0   : > { %3490 = vmatmul.mubr.bf16.gmra.mxu0 %v6413_v51  ;;  %5657 = vmatprep.subr.bf16.mxu1 %v6459_v9  ;;  %v6497_v51 = vld [vmem:[#allocation5 + $0x328] sm:$0xff]   ;;  %v6544_v9 = vld [vmem:[#allocation5 + $0x390] sm:$0xff]  }
  0xc1   : > { %3587 = vmatmul.mubr.bf16.gmra.mxu1 %v6418_v54  ;;  %3497 = vmatprep.mubr.bf16.mxu0 %v6419_v56  ;;  %v6528_v54 = vld [vmem:[#allocation5 + $0x3a8] sm:$0xff]   ;;  %v6493_v56 = vld [vmem:[%s7122_s29 + $0x1d0] ss:$108 sps:$4 sm:$0xff]  }
  0xc2   : > { %3594 = vmatprep.mubr.bf16.mxu1 %v6423_v57  ;;  %5594 = vmatpush3.bf16.msra.mxu0 %v6434_v59  ;;  %v6505_v57 = vld [vmem:[#allocation5 + $0x320] sm:$0xff]   ;;  %v6499_v59 = vld [vmem:[%s7122_s29 + $0x2ac] ss:$108 sps:$4 sm:$0xff]  }
  0xc3   : > { %5595 = vmatprep.subr.bf16.mxu0 %v6442_v60  ;;  %5658 = vmatpush3.bf16.msra.mxu1 %v6460_v12  ;;  %v6510_v60 = vld [vmem:[#allocation5 + $0x358] sm:$0xff]   ;;  %v6546_v12 = vld [vmem:[#allocation5 + $0x340] sm:$0xff]  }
  0xc4   : > { %5659 = vmatprep.subr.bf16.mxu1 %v6461_v13  ;;  %v6549_v13 = vld [vmem:[#allocation5 + $0x300] sm:$0xff]  }
  0xc6   : > { %5596 = vmatpush3.bf16.msra.mxu0 %v6445_v61  ;;  %v6532_v61 = vld [vmem:[#allocation5 + $0x3a0] sm:$0xff]  }
  0xc7   : > { %5597 = vmatprep.subr.bf16.mxu0 %v6454_v6  ;;  %5660 = vmatpush3.bf16.msra.mxu1 %v6464_v15  ;;  %v6506_v6 = vld [vmem:[%s7122_s29 + $0x2b0] ss:$108 sps:$4 sm:$0xff]   ;;  %v6552_v15 = vld [vmem:[#allocation5 + $0x388] sm:$0xff]  }
  0xc8   : > { %3498 = vmatmul.mubr.bf16.gmra.mxu0 %v6421_v62  ;;  %5661 = vmatprep.subr.bf16.mxu1 %v6471_v21  ;;  %v6503_v62 = vld [vmem:[%s7122_s29 + $0x2b4] ss:$108 sps:$4 sm:$0xff]  }
  0xc9   : > { %3595 = vmatmul.mubr.bf16.gmra.mxu1 %v6426_v0  ;;  %3505 = vmatprep.mubr.bf16.mxu0 %v6427_v3  ;;  %v6522_v0 = vld [vmem:[#allocation5 + $0x350] sm:$0xff]   ;;  %v6540_v3 = vld [vmem:[#allocation5 + $0x398] sm:$0xff]   ;;  %v6557_v21 = vld [vmem:[#allocation5 + $0x380] sm:$0xff]  }
  0xca   : > { %3602 = vmatprep.mubr.bf16.mxu1 %v6432_v4  ;;  %5598 = vmatpush3.bf16.msra.mxu0 %v6457_v7  ;;  %v6501_v4 = vld [vmem:[%s7122_s29 + $0x2a8] ss:$108 sps:$4 sm:$0xff]  }
  0xcb   : > { %5599 = vmatprep.subr.bf16.mxu0 %v6466_v16  ;;  %5662 = vmatpush3.bf16.msra.mxu1 %v6472_v22  ;;  %v6534_v7 = vld [vmem:[#allocation5 + $0x348] sm:$0xff]   ;;  %v6558_v22 = vld [vmem:[#allocation5 + $0x478] sm:$0xff]  }
  0xcc   : > { %5663 = vmatprep.subr.bf16.mxu1 %v6473_v23  ;;  %v6509_v16 = vld [vmem:[%s7122_s29 + $0x380] ss:$108 sps:$4 sm:$0xff]   ;;  %v6521_v23 = vld [vmem:[%s7122_s29 + $0x458] ss:$108 sps:$4 sm:$0xff]  }
  0xce   : > { %5600 = vmatpush3.bf16.msra.mxu0 %v6469_v18  ;;  %v6516_v18 = vld [vmem:[%s7122_s29 + $0x388] ss:$108 sps:$4 sm:$0xff]  }
  0xcf   : > { %5664 = vmatpush3.bf16.msra.mxu1 %v6477_v25  ;;  %5713 = vmatprep.subr.bf16.mxu0 %v6478_v26  ;;  %v6530_v25 = vld [vmem:[%s7122_s29 + $0x534] ss:$108 sps:$4 sm:$0xff]   ;;  %v6535_v26 = vld [vmem:[%s7122_s29 + $0x53c] ss:$108 sps:$4 sm:$0xff]  }
  0xd0   : > { %3506 = vmatmul.mubr.bf16.gmra.mxu0 %v6429_v8  ;;  %5777 = vmatprep.subr.bf16.mxu1 %v6511_v38  ;;  %v6507_v8 = vld [vmem:[%s7122_s29 + $0x384] ss:$108 sps:$4 sm:$0xff]   ;;  %v6562_v38 = vld [vmem:[#allocation5 + $0x438] sm:$0xff]  }
  0xd1   : > { %3603 = vmatmul.mubr.bf16.gmra.mxu1 %v6436_v10  ;;  %3513 = vmatprep.mubr.bf16.mxu0 %v6438_v11  ;;  %v6512_v10 = vld [vmem:[%s7122_s29 + $0x38c] ss:$108 sps:$4 sm:$0xff]  }
  0xd2   : > { %3610 = vmatprep.mubr.bf16.mxu1 %v6443_v14  ;;  %v6537_v11 = vld [vmem:[#allocation5 + $0x308] sm:$0xff]  }
  0xd3   : > { %v6551_v14 = vld [vmem:[#allocation5 + $0x3c8] sm:$0xff]  }
  0xd8   : > { %3514 = vmatmul.mubr.bf16.gmra.mxu0 %v6441_v17  ;;  %v6553_v17 = vld [vmem:[#allocation5 + $0x3c0] sm:$0xff]  }
  0xd9   : > { %3611 = vmatmul.mubr.bf16.gmra.mxu1 %v6446_v19  ;;  %3521 = vmatprep.mubr.bf16.mxu0 %v6450_v20  ;;  %v6518_v19 = vld [vmem:[%s7122_s29 + $0x45c] ss:$108 sps:$4 sm:$0xff]   ;;  %v6523_v20 = vld [vmem:[%s7122_s29 + $0x464] ss:$108 sps:$4 sm:$0xff]  }
  0xda   : > { %3618 = vmatprep.mubr.bf16.mxu1 %v6455_v24  ;;  %v6526_v24 = vld [vmem:[%s7122_s29 + $0x460] ss:$108 sps:$4 sm:$0xff]  }
  0xe0   : > { %3522 = vmatmul.mubr.bf16.gmra.mxu0 %v6453_v27  ;;  %v6533_v27 = vld [vmem:[%s7122_s29 + $0x530] ss:$108 sps:$4 sm:$0xff]  }
  0xe1   : > { %3619 = vmatmul.mubr.bf16.gmra.mxu1 %v6458_v28  ;;  %3529 = vmatprep.mubr.bf16.mxu0 %v6462_v29  ;;  %v6538_v28 = vld [vmem:[%s7122_s29 + $0x538] ss:$108 sps:$4 sm:$0xff]  }
  0xe2   : > { %3626 = vmatprep.mubr.bf16.mxu1 %v6467_v30  ;;  %v6542_v29 = vld [vmem:[%s7122_s29 + $0x60c] ss:$108 sps:$4 sm:$0xff]   ;;  %v6547_v30 = vld [vmem:[%s7122_s29 + $0x614] ss:$108 sps:$4 sm:$0xff]  }
  0xe8   : > { %3530 = vmatmul.mubr.bf16.gmra.mxu0 %v6465_v31  ;;  %v6591_v31 = vld [vmem:[#allocation5 + $0x4f8] sm:$0xff]  }
  0xe9   : > { %3627 = vmatmul.mubr.bf16.gmra.mxu1 %v6470_v32  ;;  %3667 = vmatprep.mubr.bf16.mxu0 %v6476_v33  ;;  %v6545_v32 = vld [vmem:[%s7122_s29 + $0x608] ss:$108 sps:$4 sm:$0xff]   ;;  %v6550_v33 = vld [vmem:[%s7122_s29 + $0x610] ss:$108 sps:$4 sm:$0xff]  }
  0xea   : > { %3764 = vmatprep.mubr.bf16.mxu1 %v6481_v34  ;;  %v6556_v34 = vld [vmem:[%s7122_s29 + $0x34] ss:$108 sps:$4 sm:$0xff]  }
  0xf0   : > { %3668 = vmatmul.mubr.bf16.vlgmr.msra.gmra.mxu0 %v6474_v35  ;;  %v6561_v35 = vld [vmem:[%s7122_s29 + $0x3c] ss:$108 sps:$4 sm:$0xff]  }
  0xf1   : > { %5714 = vmatpush3.bf16.msra.mxu0 %v6482_v37  ;;  %3765 = vmatmul.mubr.bf16.vlgmr.msra.gmra.mxu1 %v6479_v36  ;;  %v6554_v36 = vld [vmem:[%s7122_s29 + $0x30] ss:$108 sps:$4 sm:$0xff]   ;;  %v6559_v37 = vld [vmem:[%s7122_s29 + $0x38] ss:$108 sps:$4 sm:$0xff]  }
  0xf2   : > { %3675 = vmatprep.mubr.bf16.mxu0 %v6483_v39  ;;  %5715 = vmatprep.subr.bf16.mxu0 %v6486_v40  ;;  %v6563_v39 = vld [vmem:[%s7122_s29 + $0x10c] ss:$108 sps:$4 sm:$0xff]   ;;  %v6566_v40 = vld [vmem:[#allocation5 + $0x470] sm:$0xff]  }
  0xf3   : > { %3772 = vmatprep.mubr.bf16.mxu1 %v6487_v41  ;;  %5778 = vmatpush3.bf16.msra.mxu1 %v6515_v42  ;;  %v6567_v41 = vld [vmem:[%s7122_s29 + $0x114] ss:$108 sps:$4 sm:$0xff]   ;;  %v6596_v42 = vld [vmem:[#allocation5 + $0x4b8] sm:$0xff]  }
  0xf4   : > { %5779 = vmatprep.subr.bf16.mxu1 %v6517_v43 }
  0xf5   : > { %5716 = vmatpush3.bf16.msra.mxu0 %v6489_v44  ;;  %v6597_v44 = vld [vmem:[#allocation5 + $0x4f0] sm:$0xff]  }
  0xf6   : > { %5717 = vmatprep.subr.bf16.mxu0 %v6494_v46  ;;  %v6569_v46 = vld [vmem:[#allocation5 + $0x430] sm:$0xff]  }
  0xf7   : > { %5780 = vmatpush3.bf16.msra.mxu1 %v6520_v48  ;;  %v6565_v48 = vld [vmem:[%s7122_s29 + $0x108] ss:$108 sps:$4 sm:$0xff]  }
  0xf8   : > { %3676 = vmatmul.mubr.bf16.gmra.mxu0 %v6485_v45  ;;  %5781 = vmatprep.subr.bf16.mxu1 %v6527_v53  ;;  %v6571_v53 = vld [vmem:[%s7122_s29 + $0x1e4] ss:$108 sps:$4 sm:$0xff]  }
  0xf9   : > { %3773 = vmatmul.mubr.bf16.gmra.mxu1 %v6490_v47  ;;  %3683 = vmatprep.mubr.bf16.mxu0 %v6491_v49  ;;  %v6574_v49 = vld [vmem:[#allocation5 + $0x468] sm:$0xff]  }
  0xfa   : > { %3780 = vmatprep.mubr.bf16.mxu1 %v6495_v50  ;;  %5718 = vmatpush3.bf16.msra.mxu0 %v6497_v51 }
  0xfb   : > { %5719 = vmatprep.subr.bf16.mxu0 %v6502_v52  ;;  %5782 = vmatpush3.bf16.msra.mxu1 %v6528_v54  ;;  %v6570_v52 = vld [vmem:[%s7122_s29 + $0x110] ss:$108 sps:$4 sm:$0xff]  }
  0xfc   : > { %5783 = vmatprep.subr.bf16.mxu1 %v6529_v55  ;;  %v6601_v54 = vld [vmem:[#allocation5 + $0x4b0] sm:$0xff]  }
  0xfe   : > { %5720 = vmatpush3.bf16.msra.mxu0 %v6505_v57  ;;  %v6575_v57 = vld [vmem:[%s7122_s29 + $0x1ec] ss:$108 sps:$4 sm:$0xff]  }
  0xff   : > { %5721 = vmatprep.subr.bf16.mxu0 %v6510_v60  ;;  %5784 = vmatpush3.bf16.msra.mxu1 %v6532_v61  ;;  %v6577_v60 = vld [vmem:[#allocation5 + $0x428] sm:$0xff]  }
 0x100   : > { %3684 = vmatmul.mubr.bf16.gmra.mxu0 %v6493_v56  ;;  %5785 = vmatprep.subr.bf16.mxu1 %v6539_v2  ;;  %v6608_v2 = vld [vmem:[#allocation5 + $0x4a8] sm:$0xff]  }
 0x101   : > { %3781 = vmatmul.mubr.bf16.gmra.mxu1 %v6498_v58  ;;  %3691 = vmatprep.mubr.bf16.mxu0 %v6499_v59  ;;  %v6607_v58 = vld [vmem:[#allocation5 + $0x4e8] sm:$0xff]  }
 0x102   : > { %3788 = vmatprep.mubr.bf16.mxu1 %v6503_v62  ;;  %5722 = vmatpush3.bf16.msra.mxu0 %v6514_v63  ;;  %v6582_v63 = vld [vmem:[#allocation5 + $0x460] sm:$0xff]  }
 0x103   : > { %5723 = vmatprep.subr.bf16.mxu0 %v6522_v0  ;;  %5786 = vmatpush3.bf16.msra.mxu1 %v6540_v3 }
 0x104   : > { %5787 = vmatprep.subr.bf16.mxu1 %v6541_v5  ;;  %v6609_v5 = vld [vmem:[#allocation5 + $0x4e0] sm:$0xff]  }
 0x106   : > { %5724 = vmatpush3.bf16.msra.mxu0 %v6525_v1 }
 0x107   : > { %5725 = vmatprep.subr.bf16.mxu0 %v6534_v7  ;;  %5788 = vmatpush3.bf16.msra.mxu1 %v6544_v9  ;;  %v6585_v7 = vld [vmem:[#allocation5 + $0x420] sm:$0xff]  }
 0x108   : > { %3692 = vmatmul.mubr.bf16.gmra.mxu0 %v6501_v4  ;;  %5789 = vmatprep.subr.bf16.mxu1 %v6551_v14  ;;  %v6578_v14 = vld [vmem:[%s7122_s29 + $0x1e8] ss:$108 sps:$4 sm:$0xff]  }
 0x109   : > { %3789 = vmatmul.mubr.bf16.gmra.mxu1 %v6506_v6  ;;  %3699 = vmatprep.mubr.bf16.mxu0 %v6507_v8 }
 0x10a   : > { %3796 = vmatprep.mubr.bf16.mxu1 %v6512_v10  ;;  %5726 = vmatpush3.bf16.msra.mxu0 %v6537_v11  ;;  %v6573_v10 = vld [vmem:[%s7122_s29 + $0x1e0] ss:$108 sps:$4 sm:$0xff]   ;;  %v6590_v11 = vld [vmem:[#allocation5 + $0x458] sm:$0xff]  }
 0x10b   : > { %5727 = vmatprep.subr.bf16.mxu0 %v6546_v12  ;;  %5790 = vmatpush3.bf16.msra.mxu1 %v6552_v15  ;;  %v6579_v15 = vld [vmem:[%s7122_s29 + $0x2bc] ss:$108 sps:$4 sm:$0xff]  }
 0x10c   : > { %5791 = vmatprep.subr.bf16.mxu1 %v6553_v17 }
 0x10e   : > { %5728 = vmatpush3.bf16.msra.mxu0 %v6549_v13 }
 0x10f   : > { %5792 = vmatpush3.bf16.msra.mxu1 %v6557_v21  ;;  %5841 = vmatprep.subr.bf16.mxu0 %v6558_v22  ;;  %v6595_v22 = vld [vmem:[#allocation5 + $0x418] sm:$0xff]  }
 0x110   : > { %3700 = vmatmul.mubr.bf16.gmra.mxu0 %v6509_v16  ;;  %5905 = vmatprep.subr.bf16.mxu1 %v6591_v31  ;;  %v6613_v16 = vld [vmem:[#allocation5 + $0x4a0] sm:$0xff]   ;;  %v6621_v31 = vld [vmem:[#allocation5 + $0x4d0] sm:$0xff]  }
 0x111   : > { %3797 = vmatmul.mubr.bf16.gmra.mxu1 %v6516_v18  ;;  %3707 = vmatprep.mubr.bf16.mxu0 %v6518_v19  ;;  %v6583_v19 = vld [vmem:[%s7122_s29 + $0x2c4] ss:$108 sps:$4 sm:$0xff]  }
 0x112   : > { %3804 = vmatprep.mubr.bf16.mxu1 %v6523_v20  ;;  %v6619_v20 = vld [vmem:[#allocation5 + $0x4d8] sm:$0xff]  }
 0x118   : > { %3708 = vmatmul.mubr.bf16.gmra.mxu0 %v6521_v23 }
 0x119   : > { %3805 = vmatmul.mubr.bf16.gmra.mxu1 %v6526_v24  ;;  %3715 = vmatprep.mubr.bf16.mxu0 %v6530_v25  ;;  %v6602_v25 = vld [vmem:[#allocation5 + $0x450] sm:$0xff]  }
 0x11a   : > { %3812 = vmatprep.mubr.bf16.mxu1 %v6535_v26 }
 0x120   : > { %3716 = vmatmul.mubr.bf16.gmra.mxu0 %v6533_v27 }
 0x121   : > { %3813 = vmatmul.mubr.bf16.gmra.mxu1 %v6538_v28  ;;  %3723 = vmatprep.mubr.bf16.mxu0 %v6542_v29  ;;  %v6620_v28 = vld [vmem:[#allocation5 + $0x498] sm:$0xff]  }
 0x122   : > { %3820 = vmatprep.mubr.bf16.mxu1 %v6547_v30 }
 0x128   : > { %3724 = vmatmul.mubr.bf16.gmra.mxu0 %v6545_v32 }
 0x129   : > { %3821 = vmatmul.mubr.bf16.gmra.mxu1 %v6550_v33  ;;  %3861 = vmatprep.mubr.bf16.mxu0 %v6556_v34  ;;  %v6606_v33 = vld [vmem:[#allocation5 + $0x410] sm:$0xff]  }
 0x12a   : > { %3958 = vmatprep.mubr.bf16.mxu1 %v6561_v35 }
 0x130   : > { %v5345_v43 = vpop.f32.mrf.mxu0  ;;  %3862 = vmatmul.mubr.bf16.vlgmr.msra.gmra.mxu0 %v6554_v36  ;;  %v6581_v36 = vld [vmem:[%s7122_s29 + $0x2b8] ss:$108 sps:$4 sm:$0xff]  }
 0x131   : > { %v5409_v45 = vpop.f32.mrf.mxu1  ;;  %5842 = vmatpush3.bf16.msra.mxu0 %v6562_v38  ;;  %3959 = vmatmul.mubr.bf16.vlgmr.msra.gmra.mxu1 %v6559_v37  ;;  %v6614_v37 = vld [vmem:[#allocation5 + $0x448] sm:$0xff]  }
 0x132   : > { %v5346_v47 = vpop.f32.mrf.mxu0  ;;  %3869 = vmatprep.mubr.bf16.mxu0 %v6563_v39  ;;  %5843 = vmatprep.subr.bf16.mxu0 %v6566_v40  ;;  %v6586_v40 = vld [vmem:[%s7122_s29 + $0x2c0] ss:$108 sps:$4 sm:$0xff]  }
 0x133   : > { %v5347_v50 = vadd.f32 %v5346_v47, %v5345_v43  ;;  %v5410_v51 = vpop.f32.mrf.mxu1  ;;  %3966 = vmatprep.mubr.bf16.mxu1 %v6567_v41  ;;  %5906 = vmatpush3.bf16.msra.mxu1 %v6596_v42  ;;  %v6589_v41 = vld [vmem:[%s7122_s29 + $0x394] ss:$108 sps:$4 sm:$0xff]  }
 0x134   : > { %v5411_v55 = vadd.f32 %v5410_v51, %v5409_v45  ;;  %v5348_v56 = vpop.f32.mrf.mxu0  ;;  %5907 = vmatprep.subr.bf16.mxu1 %v6597_v44  ;;  %v6625_v42 = vld [vmem:[#allocation5 + $0x490] sm:$0xff]   ;;  %v6594_v45 = vld [vmem:[%s7122_s29 + $0x39c] ss:$108 sps:$4 sm:$0xff]   ;;  %v6626_v51 = vld [vmem:[#allocation5 + $0x440] sm:$0xff]  }
 0x135   : > { %v5412_v59 = vpop.f32.mrf.mxu1  ;;  %5844 = vmatpush3.bf16.msra.mxu0 %v6569_v46  ;;  %v6631_v46 = vld [vmem:[#allocation5 + $0x4c8] sm:$0xff]  }
 0x136   : > { %v7238_v61 = vadd.f32 %v5411_v55, %v5347_v50  ;;  %v5349_v62 = vpop.f32.mrf.mxu0  ;;  %5845 = vmatprep.subr.bf16.mxu0 %v6574_v49 }
 0x137   : > { %v5350_v0 = vadd.f32 %v5349_v62, %v5348_v56  ;;  %v5413_v1 = vpop.f32.mrf.mxu1  ;;  %5908 = vmatpush3.bf16.msra.mxu1 %v6601_v54  ;;  %v6632_v54 = vld [vmem:[#allocation5 + $0x488] sm:$0xff]   ;;  %v6587_v62 = vld [vmem:[%s7122_s29 + $0x390] ss:$108 sps:$4 sm:$0xff]  }
 0x138   : > { %v5414_v3 = vadd.f32 %v5413_v1, %v5412_v59  ;;  %v5351_v4 = vpop.f32.mrf.mxu0  ;;  %3870 = vmatmul.mubr.bf16.gmra.mxu0 %v6565_v48  ;;  %5909 = vmatprep.subr.bf16.mxu1 %v6607_v58  ;;  %v6618_v48 = vld [vmem:[#allocation5 + $0x408] sm:$0xff]  }
 0x139   : > { %v5415_v6 = vpop.f32.mrf.mxu1  ;;  %3967 = vmatmul.mubr.bf16.gmra.mxu1 %v6570_v52  ;;  %3877 = vmatprep.mubr.bf16.mxu0 %v6571_v53 }
 0x13a   : > { %v7240_v8 = vadd.f32 %v5414_v3, %v5350_v0  ;;  %v5352_v9 = vpop.f32.mrf.mxu0  ;;  %3974 = vmatprep.mubr.bf16.mxu1 %v6575_v57  ;;  %5846 = vmatpush3.bf16.msra.mxu0 %v6577_v60  ;;  %v6633_v57 = vld [vmem:[#allocation5 + $0x4c0] sm:$0xff]   ;;  %v6638_v3 = vld [vmem:[#allocation5 + $0x578] sm:$0xff]  }
 0x13b   : > { %v5353_v12 = vadd.f32 %v5352_v9, %v5351_v4  ;;  %v5416_v13 = vpop.f32.mrf.mxu1  ;;  %5847 = vmatprep.subr.bf16.mxu0 %v6582_v63  ;;  %5910 = vmatpush3.bf16.msra.mxu1 %v6608_v2  ;;  %v6630_v63 = vld [vmem:[#allocation5 + $0x400] sm:$0xff]   ;;  %v6600_v9 = vld [vmem:[%s7122_s29 + $0x46c] ss:$108 sps:$4 sm:$0xff]  }
 0x13c   : > { %v5417_v17 = vadd.f32 %v5416_v13, %v5415_v6  ;;  %v5354_v18 = vpop.f32.mrf.mxu0  ;;  %5911 = vmatprep.subr.bf16.mxu1 %v6609_v5  ;;  %v6637_v2 = vld [vmem:[#allocation5 + $0x480] sm:$0xff]  }
 0x13d   : > { %v5418_v21 = vpop.f32.mrf.mxu1  ;;  %v6592_v6 = vld [vmem:[%s7122_s29 + $0x398] ss:$108 sps:$4 sm:$0xff]  }
 0x13e   : > { %v7246_v23 = vadd.f32 %v5417_v17, %v5353_v12  ;;  %v5355_v24 = vpop.f32.mrf.mxu0  ;;  %5848 = vmatpush3.bf16.msra.mxu0 %v6585_v7  ;;  %v6605_v12 = vld [vmem:[%s7122_s29 + $0x474] ss:$108 sps:$4 sm:$0xff]  }
 0x13f   : > { %v5356_v26 = vadd.f32 %v5355_v24, %v5354_v18  ;;  %v5419_v27 = vpop.f32.mrf.mxu1  ;;  %5849 = vmatprep.subr.bf16.mxu0 %v6590_v11  ;;  %5912 = vmatpush3.bf16.msra.mxu1 %v6613_v16 }
 0x140   : > { %v5420_v29 = vadd.f32 %v5419_v27, %v5418_v21  ;;  %v5357_v30 = vpop.f32.mrf.mxu0  ;;  %3878 = vmatmul.mubr.bf16.gmra.mxu0 %v6573_v10  ;;  %5913 = vmatprep.subr.bf16.mxu1 %v6619_v20 }
 0x141   : > { %v5421_v32 = vpop.f32.mrf.mxu1  ;;  %3975 = vmatmul.mubr.bf16.gmra.mxu1 %v6578_v14  ;;  %3885 = vmatprep.mubr.bf16.mxu0 %v6579_v15 }
 0x142   : > { %v7248_v34 = vadd.f32 %v5420_v29, %v5356_v26  ;;  %v5358_v35 = vpop.f32.mrf.mxu0  ;;  %3982 = vmatprep.mubr.bf16.mxu1 %v6583_v19  ;;  %5850 = vmatpush3.bf16.msra.mxu0 %v6595_v22  ;;  %v6598_v22 = vld [vmem:[%s7122_s29 + $0x468] ss:$108 sps:$4 sm:$0xff]   ;;  %v6603_v26 = vld [vmem:[%s7122_s29 + $0x470] ss:$108 sps:$4 sm:$0xff]  }
 0x143   : > { %v5359_v38 = vadd.f32 %v5358_v35, %v5357_v30  ;;  %v5422_v39 = vpop.f32.mrf.mxu1  ;;  %5851 = vmatprep.subr.bf16.mxu0 %v6602_v25  ;;  %5914 = vmatpush3.bf16.msra.mxu1 %v6620_v28  ;;  %v6612_v28 = vld [vmem:[%s7122_s29 + $0x544] ss:$108 sps:$4 sm:$0xff]   ;;  %v6671_v35 = vld [vmem:[#allocation5 + $0x5f8] sm:$0xff]  }
 0x144   : > { %v5423_v43 = vadd.f32 %v5422_v39, %v5421_v32  ;;  %v5360_v44 = vpop.f32.mrf.mxu0  ;;  %5915 = vmatprep.subr.bf16.mxu1 %v6621_v31  ;;  %v6617_v31 = vld [vmem:[%s7122_s29 + $0x54c] ss:$108 sps:$4 sm:$0xff]  }
 0x145   : > { %v5424_v47 = vpop.f32.mrf.mxu1 }
 0x146   : > { %v7254_v49 = vadd.f32 %v5423_v43, %v5359_v38  ;;  %v5361_v50 = vpop.f32.mrf.mxu0  ;;  %5852 = vmatpush3.bf16.msra.mxu0 %v6606_v33 }
 0x147   : > { %v5362_v52 = vadd.f32 %v5361_v50, %v5360_v44  ;;  %v5425_v53 = vpop.f32.mrf.mxu1  ;;  %5853 = vmatprep.subr.bf16.mxu0 %v6614_v37  ;;  %5916 = vmatpush3.bf16.msra.mxu1 %v6625_v42 }
 0x148   : > { %v5426_v55 = vadd.f32 %v5425_v53, %v5424_v47  ;;  %v5363_v56 = vpop.f32.mrf.mxu0  ;;  %3886 = vmatmul.mubr.bf16.gmra.mxu0 %v6581_v36  ;;  %5917 = vmatprep.subr.bf16.mxu1 %v6631_v46  ;;  %v6615_v46 = vld [vmem:[%s7122_s29 + $0x548] ss:$108 sps:$4 sm:$0xff]  }
 0x149   : > { %v5427_v58 = vpop.f32.mrf.mxu1  ;;  %3983 = vmatmul.mubr.bf16.gmra.mxu1 %v6586_v40  ;;  %3893 = vmatprep.mubr.bf16.mxu0 %v6589_v41 }
 0x14a   : > { %v7256_v59 = vadd.f32 %v5426_v55, %v5362_v52  ;;  %v5364_v60 = vpop.f32.mrf.mxu0  ;;  %3990 = vmatprep.mubr.bf16.mxu1 %v6594_v45  ;;  %5854 = vmatpush3.bf16.msra.mxu0 %v6618_v48  ;;  %v6610_v45 = vld [vmem:[%s7122_s29 + $0x540] ss:$108 sps:$4 sm:$0xff]   ;;  %v6624_v48 = vld [vmem:[%s7122_s29 + $0x61c] ss:$108 sps:$4 sm:$0xff]   ;;  %v6629_v52 = vld [vmem:[%s7122_s29 + $0x624] ss:$108 sps:$4 sm:$0xff]  }
 0x14b   : > { %v5365_v0 = vadd.f32 %v5364_v60, %v5363_v56  ;;  %v5428_v1 = vpop.f32.mrf.mxu1  ;;  %5855 = vmatprep.subr.bf16.mxu0 %v6626_v51  ;;  %5918 = vmatpush3.bf16.msra.mxu1 %v6632_v54 }
 0x14c   : > { %v5429_v4 = vadd.f32 %v5428_v1, %v5427_v58  ;;  %v5366_v5 = vpop.f32.mrf.mxu0  ;;  %5919 = vmatprep.subr.bf16.mxu1 %v6633_v57 }
 0x14d   : > { %v5430_v7 = vpop.f32.mrf.mxu1 }
 0x14e   : > { %v7261_v10 = vadd.f32 %v5429_v4, %v5365_v0  ;;  %v5367_v11 = vpop.f32.mrf.mxu0  ;;  %5856 = vmatpush3.bf16.msra.mxu0 %v6630_v63  ;;  %v6627_v4 = vld [vmem:[%s7122_s29 + $0x620] ss:$108 sps:$4 sm:$0xff]  }
 0x14f   : > { %v5368_v13 = vadd.f32 %v5367_v11, %v5366_v5  ;;  %v5431_v14 = vpop.f32.mrf.mxu1  ;;  %5920 = vmatpush3.bf16.msra.mxu1 %v6637_v2  ;;  %5969 = vmatprep.subr.bf16.mxu0 %v6638_v3  ;;  %v6622_v2 = vld [vmem:[%s7122_s29 + $0x618] ss:$108 sps:$4 sm:$0xff]  }
 0x150   : > { %v5432_v15 = vadd.f32 %v5431_v14, %v5430_v7  ;;  %v5369_v16 = vpop.f32.mrf.mxu0  ;;  %3894 = vmatmul.mubr.bf16.gmra.mxu0 %v6587_v62  ;;  %6033 = vmatprep.subr.bf16.mxu1 %v6671_v35  ;;  %v6636_v5 = vld [vmem:[%s7122_s29 + $0x44] ss:$108 sps:$4 sm:$0xff]  }
 0x151   : > { %v5433_v17 = vpop.f32.mrf.mxu1  ;;  %3991 = vmatmul.mubr.bf16.gmra.mxu1 %v6592_v6  ;;  %3901 = vmatprep.mubr.bf16.mxu0 %v6600_v9  ;;  %v6641_v9 = vld [vmem:[%s7122_s29 + $0x4c] ss:$108 sps:$4 sm:$0xff]  }
 0x152   : > { %v7264_v18 = vadd.f32 %v5432_v15, %v5368_v13  ;;  %v5370_v19 = vpop.f32.mrf.mxu0  ;;  %3998 = vmatprep.mubr.bf16.mxu1 %v6605_v12 }
 0x153   : > { %v5371_v20 = vadd.f32 %v5370_v19, %v5369_v16  ;;  %v5434_v21 = vpop.f32.mrf.mxu1  ;;  %v6634_v19 = vld [vmem:[%s7122_s29 + $0x40] ss:$108 sps:$4 sm:$0xff]  }
 0x154   : > { %v5435_v24 = vadd.f32 %v5434_v21, %v5433_v17  ;;  %v5372_v25 = vpop.f32.mrf.mxu0 }
 0x155   : > { %v5436_v27 = vpop.f32.mrf.mxu1 }
 0x156   : > { %v7269_v29 = vadd.f32 %v5435_v24, %v5371_v20  ;;  %v5373_v30 = vpop.f32.mrf.mxu0  ;;  %v6642_v24 = vld [vmem:[#allocation5 + $0x538] sm:$0xff]  }
 0x157   : > { %v5374_v32 = vadd.f32 %v5373_v30, %v5372_v25  ;;  %v5437_v33 = vpop.f32.mrf.mxu1  ;;  %v6646_v30 = vld [vmem:[#allocation5 + $0x570] sm:$0xff]  }
 0x158   : > { %v5438_v36 = vadd.f32 %v5437_v33, %v5436_v27  ;;  %v5375_v37 = vpop.f32.mrf.mxu0  ;;  %3902 = vmatmul.mubr.bf16.gmra.mxu0 %v6598_v22  ;;  %v6639_v22 = vld [vmem:[%s7122_s29 + $0x48] ss:$108 sps:$4 sm:$0xff]   ;;  %v6649_v33 = vld [vmem:[%s7122_s29 + $0x124] ss:$108 sps:$4 sm:$0xff]  }
 0x159   : > { %v5439_v38 = vpop.f32.mrf.mxu1  ;;  %3999 = vmatmul.mubr.bf16.gmra.mxu1 %v6603_v26  ;;  %3909 = vmatprep.mubr.bf16.mxu0 %v6612_v28  ;;  %v6645_v27 = vld [vmem:[%s7122_s29 + $0x11c] ss:$108 sps:$4 sm:$0xff]  }
 0x15a   : > { %v7272_v39 = vadd.f32 %v5438_v36, %v5374_v32  ;;  %v5376_v40 = vpop.f32.mrf.mxu0  ;;  %4006 = vmatprep.mubr.bf16.mxu1 %v6617_v31 }
 0x15b   : > { %v5377_v41 = vadd.f32 %v5376_v40, %v5375_v37  ;;  %v5440_v42 = vpop.f32.mrf.mxu1  ;;  %v6676_v37 = vld [vmem:[#allocation5 + $0x5b8] sm:$0xff]  }
 0x15c   : > { %v5441_v43 = vadd.f32 %v5440_v42, %v5439_v38  ;;  %v5378_v44 = vpop.f32.mrf.mxu0 }
 0x15d   : > { %v5442_v47 = vpop.f32.mrf.mxu1 }
 0x15e   : > { %v7277_v50 = vadd.f32 %v5441_v43, %v5377_v41  ;;  %v5379_v51 = vpop.f32.mrf.mxu0  ;;  %v6677_v41 = vld [vmem:[#allocation5 + $0x5f0] sm:$0xff]  }
 0x15f   : > { %v5380_v53 = vadd.f32 %v5379_v51, %v5378_v44  ;;  %v5443_v54 = vpop.f32.mrf.mxu1  ;;  %v6650_v43 = vld [vmem:[#allocation5 + $0x530] sm:$0xff]  }
 0x160   : > { %v5444_v55 = vadd.f32 %v5443_v54, %v5442_v47  ;;  %v5381_v56 = vpop.f32.mrf.mxu0  ;;  %3910 = vmatmul.mubr.bf16.gmra.mxu0 %v6610_v45  ;;  %v6654_v47 = vld [vmem:[#allocation5 + $0x568] sm:$0xff]   ;;  %v6681_v54 = vld [vmem:[#allocation5 + $0x5b0] sm:$0xff]  }
 0x161   : > { %v5445_v57 = vpop.f32.mrf.mxu1  ;;  %4007 = vmatmul.mubr.bf16.gmra.mxu1 %v6615_v46  ;;  %3917 = vmatprep.mubr.bf16.mxu0 %v6624_v48  ;;  %v6643_v46 = vld [vmem:[%s7122_s29 + $0x118] ss:$108 sps:$4 sm:$0xff]  }
 0x162   : > { %v7280_v58 = vadd.f32 %v5444_v55, %v5380_v53  ;;  %v5382_v60 = vpop.f32.mrf.mxu0  ;;  %4014 = vmatprep.mubr.bf16.mxu1 %v6629_v52  ;;  %v6647_v52 = vld [vmem:[%s7122_s29 + $0x120] ss:$108 sps:$4 sm:$0xff]  }
 0x163   : > { %v5383_v62 = vadd.f32 %v5382_v60, %v5381_v56  ;;  %v5446_v63 = vpop.f32.mrf.mxu1  ;;  %v6653_v53 = vld [vmem:[%s7122_s29 + $0x1f4] ss:$108 sps:$4 sm:$0xff]  }
 0x164   : > { %v5447_v0 = vadd.f32 %v5446_v63, %v5445_v57  ;;  %v5384_v1 = vpop.f32.mrf.mxu0  ;;  %v6687_v57 = vld [vmem:[#allocation5 + $0x5e8] sm:$0xff]  }
 0x165   : > { %v5448_v3 = vpop.f32.mrf.mxu1  ;;  %v6657_v63 = vld [vmem:[%s7122_s29 + $0x1fc] ss:$108 sps:$4 sm:$0xff]  }
 0x166   : > { %v7285_v6 = vadd.f32 %v5447_v0, %v5383_v62  ;;  %v5385_v7 = vpop.f32.mrf.mxu0 }
 0x167   : > { %v5386_v11 = vadd.f32 %v5385_v7, %v5384_v1  ;;  %v5449_v12 = vpop.f32.mrf.mxu1  ;;  %v6658_v1 = vld [vmem:[#allocation5 + $0x528] sm:$0xff]  }
 0x168   : > { %v5450_v13 = vadd.f32 %v5449_v12, %v5448_v3  ;;  %v5387_v14 = vpop.f32.mrf.mxu0  ;;  %3918 = vmatmul.mubr.bf16.gmra.mxu0 %v6622_v2  ;;  %v6662_v2 = vld [vmem:[#allocation5 + $0x560] sm:$0xff]   ;;  %v6688_v7 = vld [vmem:[#allocation5 + $0x5a8] sm:$0xff]  }
 0x169   : > { %v5451_v15 = vpop.f32.mrf.mxu1  ;;  %4015 = vmatmul.mubr.bf16.gmra.mxu1 %v6627_v4  ;;  %4055 = vmatprep.mubr.bf16.mxu0 %v6636_v5 }
 0x16a   : > { %v7288_v16 = vadd.f32 %v5450_v13, %v5386_v11  ;;  %v5388_v17 = vpop.f32.mrf.mxu0  ;;  %4152 = vmatprep.mubr.bf16.mxu1 %v6641_v9 }
 0x16b   : > { %v5389_v20 = vadd.f32 %v5388_v17, %v5387_v14  ;;  %v5452_v21 = vpop.f32.mrf.mxu1  ;;  %v6666_v14 = vld [vmem:[#allocation5 + $0x520] sm:$0xff]   ;;  %v6651_v17 = vld [vmem:[%s7122_s29 + $0x1f0] ss:$108 sps:$4 sm:$0xff]  }
 0x16c   : > { %v5453_v25 = vadd.f32 %v5452_v21, %v5451_v15  ;;  %v5390_v26 = vpop.f32.mrf.mxu0 }
 0x16d   : > { %v5454_v28 = vpop.f32.mrf.mxu1 }
 0x16e   : > { %v7293_v31 = vadd.f32 %v5453_v25, %v5389_v20  ;;  %v5391_v32 = vpop.f32.mrf.mxu0  ;;  %v6693_v25 = vld [vmem:[#allocation5 + $0x5a0] sm:$0xff]  }
 0x16f   : > { %v5392_v35 = vadd.f32 %v5391_v32, %v5390_v26  ;;  %v5455_v36 = vpop.f32.mrf.mxu1 }
 0x170   : > { %v5456_v38 = vadd.f32 %v5455_v36, %v5454_v28  ;;  %v5473_v40 = vpop.f32.mrf.mxu0  ;;  %4056 = vmatmul.mubr.bf16.vlgmr.msra.gmra.mxu0 %v6634_v19  ;;  %v6670_v19 = vld [vmem:[#allocation5 + $0x558] sm:$0xff]  }
 0x171   : > { %5970 = vmatpush3.bf16.msra.mxu0 %v6642_v24  ;;  %v5537_v42 = vpop.f32.mrf.mxu1  ;;  %4153 = vmatmul.mubr.bf16.vlgmr.msra.gmra.mxu1 %v6639_v22  ;;  %v6655_v24 = vld [vmem:[%s7122_s29 + $0x1f8] ss:$108 sps:$4 sm:$0xff]  }
 0x172   : > { %v7296_v44 = vadd.f32 %v5456_v38, %v5392_v35  ;;  %v5474_v45 = vpop.f32.mrf.mxu0  ;;  %4063 = vmatprep.mubr.bf16.mxu0 %v6645_v27  ;;  %5971 = vmatprep.subr.bf16.mxu0 %v6646_v30  ;;  %v6661_v27 = vld [vmem:[%s7122_s29 + $0x2cc] ss:$108 sps:$4 sm:$0xff]  }
 0x173   : > { %v5475_v48 = vadd.f32 %v5474_v45, %v5473_v40  ;;  %v5538_v51 = vpop.f32.mrf.mxu1  ;;  %4160 = vmatprep.mubr.bf16.mxu1 %v6649_v33  ;;  %6034 = vmatpush3.bf16.msra.mxu1 %v6676_v37  ;;  %v6699_v28 = vld [vmem:[#allocation5 + $0x5d8] sm:$0xff]   ;;  %v6665_v33 = vld [vmem:[%s7122_s29 + $0x2d4] ss:$108 sps:$4 sm:$0xff]  }
 0x174   : > { %v5476_v55 = vpop.f32.mrf.mxu0  ;;  %v5539_v56 = vadd.f32 %v5538_v51, %v5537_v42  ;;  %6035 = vmatprep.subr.bf16.mxu1 %v6677_v41  ;;  %v6675_v36 = vld [vmem:[#allocation5 + $0x518] sm:$0xff]   ;;  %v6682_v37 = vld [vmem:[#allocation5 + $0x550] sm:$0xff]  }
 0x175   : > { %v3476_v60 = vadd.f32 %v5475_v48, %v7238_v61  ;;  %v5540_v62 = vpop.f32.mrf.mxu1  ;;  %5972 = vmatpush3.bf16.msra.mxu0 %v6650_v43  ;;  %v6689_v61 = vld [vmem:[#allocation5 + $0x5e0] sm:$0xff]   ;;  %v6700_v42 = vld [vmem:[#allocation5 + $0x598] sm:$0xff]   ;;  %v6659_v51 = vld [vmem:[%s7122_s29 + $0x2c8] ss:$108 sps:$4 sm:$0xff]  }
 0x176   : > { %v5477_v0 = vpop.f32.mrf.mxu0  ;;  %5973 = vmatprep.subr.bf16.mxu0 %v6654_v47 }
 0x177   : > { %v7303_v3 = vadd.f32 %v5539_v56, %v3476_v60  ;;  %v5478_v4 = vadd.f32 %v5477_v0, %v5476_v55  ;;  %v5541_v5 = vpop.f32.mrf.mxu1  ;;  %6036 = vmatpush3.bf16.msra.mxu1 %v6681_v54  ;;  %v6663_v56 = vld [vmem:[%s7122_s29 + $0x2d0] ss:$108 sps:$4 sm:$0xff]   ;;  %v6694_v60 = vld [vmem:[#allocation5 + $0x548] sm:$0xff]  }
 0x178   : > { %v5479_v9 = vpop.f32.mrf.mxu0  ;;  %v5542_v11 = vadd.f32 %v5541_v5, %v5540_v62  ;;  %4064 = vmatmul.mubr.bf16.gmra.mxu0 %v6643_v46  ;;  %6037 = vmatprep.subr.bf16.mxu1 %v6687_v57  ;;  %v6669_v57 = vld [vmem:[%s7122_s29 + $0x3a4] ss:$108 sps:$4 sm:$0xff]   ;;  %v6711_v0 = vld [vmem:[#allocation5 + $0x5c8] sm:$0xff]  }
 0x179   : > { %v3479_v12 = vadd.f32 %v5478_v4, %v7240_v8  ;;  %v5543_v13 = vpop.f32.mrf.mxu1  ;;  %4161 = vmatmul.mubr.bf16.gmra.mxu1 %v6647_v52  ;;  %4071 = vmatprep.mubr.bf16.mxu0 %v6653_v53  ;;  %v6686_v52 = vld [vmem:[#allocation5 + $0x510] sm:$0xff]   ;;  %v6674_v4 = vld [vmem:[%s7122_s29 + $0x3ac] ss:$108 sps:$4 sm:$0xff]  }
 0x17a   : > { %v5480_v15 = vpop.f32.mrf.mxu0  ;;  %4168 = vmatprep.mubr.bf16.mxu1 %v6657_v63  ;;  %5974 = vmatpush3.bf16.msra.mxu0 %v6658_v1  ;;  %v6705_v62 = vld [vmem:[#allocation5 + $0x590] sm:$0xff]   ;;  %v6698_v5 = vld [vmem:[#allocation5 + $0x508] sm:$0xff]  }
 0x17b   : > { %v7307_v20 = vadd.f32 %v5542_v11, %v3479_v12  ;;  %v5481_v21 = vadd.f32 %v5480_v15, %v5479_v9  ;;  %v5544_v22 = vpop.f32.mrf.mxu1  ;;  %5975 = vmatprep.subr.bf16.mxu0 %v6662_v2  ;;  %6038 = vmatpush3.bf16.msra.mxu1 %v6688_v7  ;;  %v6706_v9 = vld [vmem:[#allocation5 + $0x540] sm:$0xff]  }
 0x17c   : > { %v5482_v8 = vpop.f32.mrf.mxu0  ;;  %v5545_v26 = vadd.f32 %v5544_v22, %v5543_v13  ;;  %6039 = vmatprep.subr.bf16.mxu1 %v6689_v61  ;;  %v6712_v13 = vld [vmem:[#allocation5 + $0x588] sm:$0xff]  }
 0x17d   : > { %v3484_v30 = vadd.f32 %v5481_v21, %v7246_v23  ;;  %v5546_v32 = vpop.f32.mrf.mxu1  ;;  %v6701_v23 = vld [vmem:[#allocation5 + $0x5d0] sm:$0xff]   ;;  %v6667_v22 = vld [vmem:[%s7122_s29 + $0x3a0] ss:$108 sps:$4 sm:$0xff]  }
 0x17e   : > { %v5483_v35 = vpop.f32.mrf.mxu0  ;;  %5976 = vmatpush3.bf16.msra.mxu0 %v6666_v14 }
 0x17f   : > { %v7313_v38 = vadd.f32 %v5545_v26, %v3484_v30  ;;  %v5484_v40 = vadd.f32 %v5483_v35, %v5482_v8  ;;  %v5547_v41 = vpop.f32.mrf.mxu1  ;;  %5977 = vmatprep.subr.bf16.mxu0 %v6670_v19  ;;  %6040 = vmatpush3.bf16.msra.mxu1 %v6693_v25  ;;  %v6717_v25 = vld [vmem:[#allocation5 + $0x580] sm:$0xff]  }
 0x180   : > { %v5485_v43 = vpop.f32.mrf.mxu0  ;;  %v5548_v45 = vadd.f32 %v5547_v41, %v5546_v32  ;;  %4072 = vmatmul.mubr.bf16.gmra.mxu0 %v6651_v17  ;;  %6041 = vmatprep.subr.bf16.mxu1 %v6699_v28  ;;  %v6713_v17 = vld [vmem:[#allocation5 + $0x5c0] sm:$0xff]   ;;  %v6718_v28 = vld [vmem:[#allocation5 + $0x678] sm:$0xff]  }
 0x181   : > { %v3487_v46 = vadd.f32 %v5484_v40, %v7248_v34  ;;  %v5549_v47 = vpop.f32.mrf.mxu1  ;;  %4169 = vmatmul.mubr.bf16.gmra.mxu1 %v6655_v24  ;;  %4079 = vmatprep.mubr.bf16.mxu0 %v6661_v27  ;;  %v6710_v24 = vld [vmem:[#allocation5 + $0x500] sm:$0xff]   ;;  %v7329_v32 = vld [vmem:[#allocation5 + $0x6b8] sm:$0xff]  }
 0x182   : > { %v5486_v48 = vpop.f32.mrf.mxu0  ;;  %4176 = vmatprep.mubr.bf16.mxu1 %v6665_v33  ;;  %5978 = vmatpush3.bf16.msra.mxu0 %v6675_v36  ;;  %v6672_v36 = vld [vmem:[%s7122_s29 + $0x3a8] ss:$108 sps:$4 sm:$0xff]   ;;  %v6685_v41 = vld [vmem:[%s7122_s29 + $0x484] ss:$108 sps:$4 sm:$0xff]  }
 0x183   : > { %v7317_v53 = vadd.f32 %v5548_v45, %v3487_v46  ;;  %v5487_v54 = vadd.f32 %v5486_v48, %v5485_v43  ;;  %v5550_v55 = vpop.f32.mrf.mxu1  ;;  %5979 = vmatprep.subr.bf16.mxu0 %v6682_v37  ;;  %6042 = vmatpush3.bf16.msra.mxu1 %v6700_v42  ;;  %v6680_v37 = vld [vmem:[%s7122_s29 + $0x47c] ss:$108 sps:$4 sm:$0xff]  }
 0x184   : > { %v5488_v34 = vpop.f32.mrf.mxu0  ;;  %v5551_v63 = vadd.f32 %v5550_v55, %v5549_v47  ;;  %6043 = vmatprep.subr.bf16.mxu1 %v6701_v23  ;;  %v6678_v55 = vld [vmem:[%s7122_s29 + $0x478] ss:$108 sps:$4 sm:$0xff]  }
 0x185   : > { %v3492_v1 = vadd.f32 %v5487_v54, %v7254_v49  ;;  %v5552_v2 = vpop.f32.mrf.mxu1 }
 0x186   : > { %v5489_v7 = vpop.f32.mrf.mxu0  ;;  %5980 = vmatpush3.bf16.msra.mxu0 %v6686_v52 }
 0x187   : > { %v7323_v11 = vadd.f32 %v5551_v63, %v3492_v1  ;;  %v5490_v61 = vadd.f32 %v5489_v7, %v5488_v34  ;;  %v5553_v12 = vpop.f32.mrf.mxu1  ;;  %5981 = vmatprep.subr.bf16.mxu0 %v6694_v60  ;;  %6044 = vmatpush3.bf16.msra.mxu1 %v6705_v62  ;;  %v6683_v60 = vld [vmem:[%s7122_s29 + $0x480] ss:$108 sps:$4 sm:$0xff]  }
 0x188   : > { %v5491_v14 = vpop.f32.mrf.mxu0  ;;  %v5554_v15 = vadd.f32 %v5553_v12, %v5552_v2  ;;  %4080 = vmatmul.mubr.bf16.gmra.mxu0 %v6659_v51  ;;  %6045 = vmatprep.subr.bf16.mxu1 %v6711_v0  ;;  %v6692_v63 = vld [vmem:[%s7122_s29 + $0x554] ss:$108 sps:$4 sm:$0xff]  }
 0x189   : > { %v3495_v49 = vadd.f32 %v5490_v61, %v7256_v59  ;;  %v5555_v19 = vpop.f32.mrf.mxu1  ;;  %4177 = vmatmul.mubr.bf16.gmra.mxu1 %v6663_v56  ;;  %4087 = vmatprep.mubr.bf16.mxu0 %v6669_v57 }
 0x18a   : > { %v5492_v21 = vpop.f32.mrf.mxu0  ;;  %4184 = vmatprep.mubr.bf16.mxu1 %v6674_v4  ;;  %5982 = vmatpush3.bf16.msra.mxu0 %v6698_v5 }
 0x18b   : > { %v7327_v8 = vadd.f32 %v5554_v15, %v3495_v49  ;;  %v5493_v26 = vadd.f32 %v5492_v21, %v5491_v14  ;;  %v5556_v27 = vpop.f32.mrf.mxu1  ;;  %5983 = vmatprep.subr.bf16.mxu0 %v6706_v9  ;;  %6046 = vmatpush3.bf16.msra.mxu1 %v6712_v13  ;;  %v6690_v49 = vld [vmem:[%s7122_s29 + $0x550] ss:$108 sps:$4 sm:$0xff]  }
 0x18c   : > { %v5494_v59 = vpop.f32.mrf.mxu0  ;;  %v5557_v30 = vadd.f32 %v5556_v27, %v5555_v19  ;;  %6047 = vmatprep.subr.bf16.mxu1 %v6713_v17 }
 0x18d   : > { %v3500_v33 = vadd.f32 %v5493_v26, %v7261_v10  ;;  %v5558_v35 = vpop.f32.mrf.mxu1 }
 0x18e   : > { %v5495_v40 = vpop.f32.mrf.mxu0  ;;  %5984 = vmatpush3.bf16.msra.mxu0 %v6710_v24  ;;  %v6704_v24 = vld [vmem:[%s7122_s29 + $0x62c] ss:$108 sps:$4 sm:$0xff]  }
 0x18f   : > { %v7335_v42 = vadd.f32 %v5557_v30, %v3500_v33  ;;  %v5496_v43 = vadd.f32 %v5495_v40, %v5494_v59  ;;  %v5559_v45 = vpop.f32.mrf.mxu1  ;;  %6048 = vmatpush3.bf16.msra.mxu1 %v6717_v25  ;;  %6097 = vmatprep.subr.bf16.mxu0 %v6718_v28 }
 0x190   : > { %v5497_v23 = vpop.f32.mrf.mxu0  ;;  %v5560_v46 = vadd.f32 %v5559_v45, %v5558_v35  ;;  %4088 = vmatmul.mubr.bf16.gmra.mxu0 %v6667_v22  ;;  %6177 = vmatprep.subr.bf16.mxu1 %v7329_v32  ;;  %v6695_v22 = vld [vmem:[%s7122_s29 + $0x558] ss:$108 sps:$4 sm:$0xff]  }
 0x191   : > { %v3503_v10 = vadd.f32 %v5496_v43, %v7264_v18  ;;  %v5561_v47 = vpop.f32.mrf.mxu1  ;;  %4185 = vmatmul.mubr.bf16.gmra.mxu1 %v6672_v36  ;;  %4095 = vmatprep.mubr.bf16.mxu0 %v6680_v37  ;;  %v6697_v18 = vld [vmem:[%s7122_s29 + $0x55c] ss:$108 sps:$4 sm:$0xff]  }
 0x192   : > { %v5498_v48 = vpop.f32.mrf.mxu0  ;;  %4192 = vmatprep.mubr.bf16.mxu1 %v6685_v41  ;;  %v6702_v41 = vld [vmem:[%s7122_s29 + $0x628] ss:$108 sps:$4 sm:$0xff]  }
 0x193   : > { %v7339_v51 = vadd.f32 %v5560_v46, %v3503_v10  ;;  %v5499_v52 = vadd.f32 %v5498_v48, %v5497_v23  ;;  %v5562_v54 = vpop.f32.mrf.mxu1  ;;  %v6707_v23 = vld [vmem:[%s7122_s29 + $0x630] ss:$108 sps:$4 sm:$0xff]  }
 0x194   : > { %v5500_v56 = vpop.f32.mrf.mxu0  ;;  %v5563_v57 = vadd.f32 %v5562_v54, %v5561_v47  ;;  %v6716_v47 = vld [vmem:[%s7122_s29 + $0x54] ss:$108 sps:$4 sm:$0xff]  }
 0x195   : > { %v3508_v62 = vadd.f32 %v5499_v52, %v7269_v29  ;;  %v5564_v34 = vpop.f32.mrf.mxu1 }
 0x196   : > { %v5501_v0 = vpop.f32.mrf.mxu0 }
 0x197   : > { %v7346_v1 = vadd.f32 %v5563_v57, %v3508_v62  ;;  %v5502_v2 = vadd.f32 %v5501_v0, %v5500_v56  ;;  %v5565_v4 = vpop.f32.mrf.mxu1 }
 0x198   : > { %v5503_v5 = vpop.f32.mrf.mxu0  ;;  %v5566_v7 = vadd.f32 %v5565_v4, %v5564_v34  ;;  %4096 = vmatmul.mubr.bf16.gmra.mxu0 %v6678_v55 }
 0x199   : > { %v3511_v9 = vadd.f32 %v5502_v2, %v7272_v39  ;;  %v5567_v61 = vpop.f32.mrf.mxu1  ;;  %4193 = vmatmul.mubr.bf16.gmra.mxu1 %v6683_v60  ;;  %4103 = vmatprep.mubr.bf16.mxu0 %v6692_v63  ;;  %v6709_v39 = vld [vmem:[%s7122_s29 + $0x634] ss:$108 sps:$4 sm:$0xff]  }
 0x19a   : > { %v5504_v29 = vpop.f32.mrf.mxu0  ;;  %4200 = vmatprep.mubr.bf16.mxu1 %v6697_v18  ;;  %v6714_v18 = vld [vmem:[%s7122_s29 + $0x50] ss:$108 sps:$4 sm:$0xff]  }
 0x19b   : > { %v7349_v12 = vadd.f32 %v5566_v7, %v3511_v9  ;;  %v5505_v13 = vadd.f32 %v5504_v29, %v5503_v5  ;;  %v5568_v14 = vpop.f32.mrf.mxu1  ;;  %v6719_v5 = vld [vmem:[%s7122_s29 + $0x58] ss:$108 sps:$4 sm:$0xff]  }
 0x19c   : > { %v5506_v15 = vpop.f32.mrf.mxu0  ;;  %v5569_v17 = vadd.f32 %v5568_v14, %v5567_v61  ;;  %v6722_v61 = vld [vmem:[#allocation5 + $0x638] sm:$0xff]  }
 0x19d   : > { %v3516_v19 = vadd.f32 %v5505_v13, %v7277_v50  ;;  %v5570_v21 = vpop.f32.mrf.mxu1  ;;  %v6725_v29 = vld [vmem:[%s7122_s29 + $0x12c] ss:$108 sps:$4 sm:$0xff]   ;;  %v6726_v13 = vld [vmem:[#allocation5 + $0x670] sm:$0xff]  }
 0x19e   : > { %v5507_v25 = vpop.f32.mrf.mxu0 }
 0x19f   : > { %v7356_v26 = vadd.f32 %v5569_v17, %v3516_v19  ;;  %v5508_v27 = vadd.f32 %v5507_v25, %v5506_v15  ;;  %v5571_v28 = vpop.f32.mrf.mxu1  ;;  %v6730_v25 = vld [vmem:[#allocation5 + $0x630] sm:$0xff]  }
 0x1a0   : > { %v5509_v59 = vpop.f32.mrf.mxu0  ;;  %v5572_v30 = vadd.f32 %v5571_v28, %v5570_v21  ;;  %4104 = vmatmul.mubr.bf16.gmra.mxu0 %v6690_v49  ;;  %v6729_v49 = vld [vmem:[%s7122_s29 + $0x134] ss:$108 sps:$4 sm:$0xff]   ;;  %v6734_v28 = vld [vmem:[#allocation5 + $0x668] sm:$0xff]  }
 0x1a1   : > { %v3519_v33 = vadd.f32 %v5508_v27, %v7280_v58  ;;  %v5573_v35 = vpop.f32.mrf.mxu1  ;;  %4201 = vmatmul.mubr.bf16.gmra.mxu1 %v6695_v22  ;;  %4111 = vmatprep.mubr.bf16.mxu0 %v6704_v24  ;;  %v6721_v58 = vld [vmem:[%s7122_s29 + $0x5c] ss:$108 sps:$4 sm:$0xff]   ;;  %v6760_v22 = vld [vmem:[#allocation5 + $0x6b0] sm:$0xff]  }
 0x1a2   : > { %v5510_v50 = vpop.f32.mrf.mxu0  ;;  %4208 = vmatprep.mubr.bf16.mxu1 %v6709_v39  ;;  %v6723_v27 = vld [vmem:[%s7122_s29 + $0x128] ss:$108 sps:$4 sm:$0xff]  }
 0x1a3   : > { %v7359_v36 = vadd.f32 %v5572_v30, %v3519_v33  ;;  %v5511_v37 = vadd.f32 %v5510_v50, %v5509_v59  ;;  %v5574_v40 = vpop.f32.mrf.mxu1 }
 0x1a4   : > { %v5512_v43 = vpop.f32.mrf.mxu0  ;;  %v5575_v45 = vadd.f32 %v5574_v40, %v5573_v35  ;;  %v6727_v35 = vld [vmem:[%s7122_s29 + $0x130] ss:$108 sps:$4 sm:$0xff]  }
 0x1a5   : > { %v3524_v46 = vadd.f32 %v5511_v37, %v7285_v6  ;;  %v5576_v10 = vpop.f32.mrf.mxu1  ;;  %v6765_v37 = vld [vmem:[#allocation5 + $0x6a8] sm:$0xff]  }
 0x1a6   : > { %v5513_v48 = vpop.f32.mrf.mxu0 }
 0x1a7   : > { %v7366_v52 = vadd.f32 %v5575_v45, %v3524_v46  ;;  %v5514_v54 = vadd.f32 %v5513_v48, %v5512_v43  ;;  %v5577_v55 = vpop.f32.mrf.mxu1  ;;  %v6733_v43 = vld [vmem:[%s7122_s29 + $0x204] ss:$108 sps:$4 sm:$0xff]   ;;  %v6738_v46 = vld [vmem:[#allocation5 + $0x628] sm:$0xff]  }
 0x1a8   : > { %v5515_v56 = vpop.f32.mrf.mxu0  ;;  %v5578_v57 = vadd.f32 %v5577_v55, %v5576_v10  ;;  %4112 = vmatmul.mubr.bf16.gmra.mxu0 %v6702_v41  ;;  %v6770_v55 = vld [vmem:[#allocation5 + $0x6a0] sm:$0xff]  }
 0x1a9   : > { %v3527_v60 = vadd.f32 %v5514_v54, %v7288_v16  ;;  %v5579_v62 = vpop.f32.mrf.mxu1  ;;  %4209 = vmatmul.mubr.bf16.gmra.mxu1 %v6707_v23  ;;  %4249 = vmatprep.mubr.bf16.mxu0 %v6716_v47  ;;  %v6737_v23 = vld [vmem:[%s7122_s29 + $0x20c] ss:$108 sps:$4 sm:$0xff]  }
 0x1aa   : > { %v5516_v6 = vpop.f32.mrf.mxu0  ;;  %4346 = vmatprep.mubr.bf16.mxu1 %v6721_v58  ;;  %v6742_v58 = vld [vmem:[#allocation5 + $0x660] sm:$0xff]  }
 0x1ab   : > { %v7369_v34 = vadd.f32 %v5578_v57, %v3527_v60  ;;  %v5517_v63 = vadd.f32 %v5516_v6, %v5515_v56  ;;  %v5580_v0 = vpop.f32.mrf.mxu1  ;;  %v6746_v60 = vld [vmem:[#allocation5 + $0x620] sm:$0xff]  }
 0x1ac   : > { %v5518_v2 = vpop.f32.mrf.mxu0  ;;  %v5581_v4 = vadd.f32 %v5580_v0, %v5579_v62  ;;  %v6750_v0 = vld [vmem:[#allocation5 + $0x658] sm:$0xff]  }
 0x1ad   : > { %v3532_v7 = vadd.f32 %v5517_v63, %v7293_v31  ;;  %v5582_v9 = vpop.f32.mrf.mxu1 }
 0x1ae   : > { %v5519_v16 = vpop.f32.mrf.mxu0 }
 0x1af   : > { %v7375_v14 = vadd.f32 %v5581_v4, %v3532_v7  ;;  %v5520_v15 = vadd.f32 %v5519_v16, %v5518_v2  ;;  %v5583_v17 = vpop.f32.mrf.mxu1  ;;  %v6731_v2 = vld [vmem:[%s7122_s29 + $0x200] ss:$108 sps:$4 sm:$0xff]   ;;  %v6775_v4 = vld [vmem:[#allocation5 + $0x698] sm:$0xff]  }
 0x1b0   : > { %v5584_v19 = vadd.f32 %v5583_v17, %v5582_v9  ;;  %v5601_v21 = vpop.f32.mrf.mxu0  ;;  %4250 = vmatmul.mubr.bf16.vlgmr.msra.gmra.mxu0 %v6714_v18  ;;  %v6735_v9 = vld [vmem:[%s7122_s29 + $0x208] ss:$108 sps:$4 sm:$0xff]  }
 0x1b1   : > { %v3535_v24 = vadd.f32 %v5520_v15, %v7296_v44  ;;  %6098 = vmatpush3.bf16.msra.mxu0 %v6722_v61  ;;  %v5665_v31 = vpop.f32.mrf.mxu1  ;;  %4347 = vmatmul.mubr.bf16.vlgmr.msra.gmra.mxu1 %v6719_v5  ;;  %v6741_v61 = vld [vmem:[%s7122_s29 + $0x2dc] ss:$108 sps:$4 sm:$0xff]  }
 0x1b2   : > { %v5602_v39 = vpop.f32.mrf.mxu0  ;;  %4257 = vmatprep.mubr.bf16.mxu0 %v6725_v29  ;;  %6099 = vmatprep.subr.bf16.mxu0 %v6726_v13  ;;  %v6745_v29 = vld [vmem:[%s7122_s29 + $0x2e4] ss:$108 sps:$4 sm:$0xff]   ;;  %v6755_v13 = vld [vmem:[#allocation5 + $0x618] sm:$0xff]  }
 0x1b3   : > { %v7380_v59 = vadd.f32 %v5584_v19, %v3535_v24  ;;  %v5603_v30 = vadd.f32 %v5602_v39, %v5601_v21  ;;  %v5666_v33 = vpop.f32.mrf.mxu1  ;;  %4354 = vmatprep.mubr.bf16.mxu1 %v6729_v49  ;;  %6178 = vmatpush3.bf16.msra.mxu1 %v7329_v32  ;;  %v6759_v19 = vld [vmem:[#allocation5 + $0x650] sm:$0xff]  }
 0x1b4   : > { %v5604_v44 = vpop.f32.mrf.mxu0  ;;  %v5667_v50 = vadd.f32 %v5666_v33, %v5665_v31  ;;  %6179 = vmatprep.subr.bf16.mxu1 %v6760_v22  ;;  %v6780_v24 = vld [vmem:[#allocation5 + $0x690] sm:$0xff]   ;;  %v6769_v33 = vld [vmem:[#allocation5 + $0x648] sm:$0xff]  }
 0x1b5   : > { %v3670_v40 = vadd.f32 %v5603_v30, %v7303_v3  ;;  %v5668_v41 = vpop.f32.mrf.mxu1  ;;  %6100 = vmatpush3.bf16.msra.mxu0 %v6730_v25  ;;  %v6764_v39 = vld [vmem:[#allocation5 + $0x610] sm:$0xff]  }
 0x1b6   : > { %v5605_v45 = vpop.f32.mrf.mxu0  ;;  %6101 = vmatprep.subr.bf16.mxu0 %v6734_v28 }
 0x1b7   : > { %v7387_v10 = vadd.f32 %v5667_v50, %v3670_v40  ;;  %v5606_v47 = vadd.f32 %v5605_v45, %v5604_v44  ;;  %v5669_v48 = vpop.f32.mrf.mxu1  ;;  %6180 = vmatpush3.bf16.msra.mxu1 %v6760_v22  ;;  %v6739_v44 = vld [vmem:[%s7122_s29 + $0x2d8] ss:$108 sps:$4 sm:$0xff]   ;;  %v6785_v50 = vld [vmem:[#allocation5 + $0x688] sm:$0xff]  }
 0x1b8   : > { %v5607_v32 = vpop.f32.mrf.mxu0  ;;  %v5670_v54 = vadd.f32 %v5669_v48, %v5668_v41  ;;  %4258 = vmatmul.mubr.bf16.gmra.mxu0 %v6723_v27  ;;  %6181 = vmatprep.subr.bf16.mxu1 %v6765_v37  ;;  %v6743_v41 = vld [vmem:[%s7122_s29 + $0x2e0] ss:$108 sps:$4 sm:$0xff]  }
 0x1b9   : > { %v3673_v3 = vadd.f32 %v5606_v47, %v7307_v20  ;;  %v5671_v56 = vpop.f32.mrf.mxu1  ;;  %4355 = vmatmul.mubr.bf16.gmra.mxu1 %v6727_v35  ;;  %4265 = vmatprep.mubr.bf16.mxu0 %v6733_v43  ;;  %v6749_v43 = vld [vmem:[%s7122_s29 + $0x3b4] ss:$108 sps:$4 sm:$0xff]  }
 0x1ba   : > { %v5608_v57 = vpop.f32.mrf.mxu0  ;;  %4362 = vmatprep.mubr.bf16.mxu1 %v6737_v23  ;;  %6102 = vmatpush3.bf16.msra.mxu0 %v6738_v46  ;;  %v6754_v23 = vld [vmem:[%s7122_s29 + $0x3bc] ss:$108 sps:$4 sm:$0xff]  }
 0x1bb   : > { %v7390_v62 = vadd.f32 %v5670_v54, %v3673_v3  ;;  %v5609_v6 = vadd.f32 %v5608_v57, %v5607_v32  ;;  %v5672_v63 = vpop.f32.mrf.mxu1  ;;  %6103 = vmatprep.subr.bf16.mxu0 %v6742_v58  ;;  %6182 = vmatpush3.bf16.msra.mxu1 %v6765_v37  ;;  %v6774_v46 = vld [vmem:[#allocation5 + $0x608] sm:$0xff]   ;;  %v6779_v32 = vld [vmem:[#allocation5 + $0x640] sm:$0xff]  }
 0x1bc   : > { %v5610_v18 = vpop.f32.mrf.mxu0  ;;  %v5673_v20 = vadd.f32 %v5672_v63, %v5671_v56  ;;  %6183 = vmatprep.subr.bf16.mxu1 %v6770_v55  ;;  %v6789_v3 = vld [vmem:[#allocation5 + $0x680] sm:$0xff]  }
 0x1bd   : > { %v3678_v5 = vadd.f32 %v5609_v6, %v7313_v38  ;;  %v5674_v7 = vpop.f32.mrf.mxu1 }
 0x1be   : > { %v5611_v16 = vpop.f32.mrf.mxu0  ;;  %6104 = vmatpush3.bf16.msra.mxu0 %v6746_v60  ;;  %v6784_v60 = vld [vmem:[#allocation5 + $0x600] sm:$0xff]  }
 0x1bf   : > { %v7397_v15 = vadd.f32 %v5673_v20, %v3678_v5  ;;  %v5612_v17 = vadd.f32 %v5611_v16, %v5610_v18  ;;  %v5675_v49 = vpop.f32.mrf.mxu1  ;;  %6105 = vmatprep.subr.bf16.mxu0 %v6750_v0  ;;  %6184 = vmatpush3.bf16.msra.mxu1 %v6770_v55  ;;  %v6752_v5 = vld [vmem:[%s7122_s29 + $0x3b8] ss:$108 sps:$4 sm:$0xff]  }
 0x1c0   : > { %v5613_v21 = vpop.f32.mrf.mxu0  ;;  %v5676_v22 = vadd.f32 %v5675_v49, %v5674_v7  ;;  %4266 = vmatmul.mubr.bf16.gmra.mxu0 %v6731_v2  ;;  %6185 = vmatprep.subr.bf16.mxu1 %v6775_v4  ;;  %v6747_v2 = vld [vmem:[%s7122_s29 + $0x3b0] ss:$108 sps:$4 sm:$0xff]   ;;  %v6758_v7 = vld [vmem:[%s7122_s29 + $0x48c] ss:$108 sps:$4 sm:$0xff]  }
 0x1c1   : > { %v3681_v38 = vadd.f32 %v5612_v17, %v7317_v53  ;;  %v5677_v31 = vpop.f32.mrf.mxu1  ;;  %4363 = vmatmul.mubr.bf16.gmra.mxu1 %v6735_v9  ;;  %4273 = vmatprep.mubr.bf16.mxu0 %v6741_v61  ;;  %v6763_v61 = vld [vmem:[%s7122_s29 + $0x494] ss:$108 sps:$4 sm:$0xff]  }
 0x1c2   : > { %v5614_v25 = vpop.f32.mrf.mxu0  ;;  %4370 = vmatprep.mubr.bf16.mxu1 %v6745_v29  ;;  %6106 = vmatpush3.bf16.msra.mxu0 %v6755_v13 }
 0x1c3   : > { %v7400_v27 = vadd.f32 %v5676_v22, %v3681_v38  ;;  %v5615_v28 = vadd.f32 %v5614_v25, %v5613_v21  ;;  %v5678_v30 = vpop.f32.mrf.mxu1  ;;  %6107 = vmatprep.subr.bf16.mxu0 %v6759_v19  ;;  %6186 = vmatpush3.bf16.msra.mxu1 %v6775_v4 }
 0x1c4   : > { %v5616_v35 = vpop.f32.mrf.mxu0  ;;  %v5679_v53 = vadd.f32 %v5678_v30, %v5677_v31  ;;  %6187 = vmatprep.subr.bf16.mxu1 %v6780_v24 }
 0x1c5   : > { %v3686_v37 = vadd.f32 %v5615_v28, %v7323_v11  ;;  %v5680_v40 = vpop.f32.mrf.mxu1 }
 0x1c6   : > { %v5617_v45 = vpop.f32.mrf.mxu0  ;;  %6108 = vmatpush3.bf16.msra.mxu0 %v6764_v39  ;;  %v6756_v39 = vld [vmem:[%s7122_s29 + $0x488] ss:$108 sps:$4 sm:$0xff]  }
 0x1c7   : > { %v7407_v47 = vadd.f32 %v5679_v53, %v3686_v37  ;;  %v5618_v48 = vadd.f32 %v5617_v45, %v5616_v35  ;;  %v5681_v58 = vpop.f32.mrf.mxu1  ;;  %6109 = vmatprep.subr.bf16.mxu0 %v6769_v33  ;;  %6188 = vmatpush3.bf16.msra.mxu1 %v6780_v24  ;;  %v6761_v33 = vld [vmem:[%s7122_s29 + $0x490] ss:$108 sps:$4 sm:$0xff]  }
 0x1c8   : > { %v5619_v54 = vpop.f32.mrf.mxu0  ;;  %v5682_v55 = vadd.f32 %v5681_v58, %v5680_v40  ;;  %4274 = vmatmul.mubr.bf16.gmra.mxu0 %v6739_v44  ;;  %6189 = vmatprep.subr.bf16.mxu1 %v6785_v50  ;;  %v6768_v35 = vld [vmem:[%s7122_s29 + $0x564] ss:$108 sps:$4 sm:$0xff]  }
 0x1c9   : > { %v3689_v11 = vadd.f32 %v5618_v48, %v7327_v8  ;;  %v5683_v56 = vpop.f32.mrf.mxu1  ;;  %4371 = vmatmul.mubr.bf16.gmra.mxu1 %v6743_v41  ;;  %4281 = vmatprep.mubr.bf16.mxu0 %v6749_v43 }
 0x1ca   : > { %v5620_v57 = vpop.f32.mrf.mxu0  ;;  %4378 = vmatprep.mubr.bf16.mxu1 %v6754_v23  ;;  %6110 = vmatpush3.bf16.msra.mxu0 %v6774_v46 }
 0x1cb   : > { %v7410_v6 = vadd.f32 %v5682_v55, %v3689_v11  ;;  %v5621_v63 = vadd.f32 %v5620_v57, %v5619_v54  ;;  %v5684_v0 = vpop.f32.mrf.mxu1  ;;  %6111 = vmatprep.subr.bf16.mxu0 %v6779_v32  ;;  %6190 = vmatpush3.bf16.msra.mxu1 %v6785_v50  ;;  %v6766_v54 = vld [vmem:[%s7122_s29 + $0x560] ss:$108 sps:$4 sm:$0xff]   ;;  %v6771_v11 = vld [vmem:[%s7122_s29 + $0x568] ss:$108 sps:$4 sm:$0xff]  }
 0x1cc   : > { %v5622_v18 = vpop.f32.mrf.mxu0  ;;  %v5685_v20 = vadd.f32 %v5684_v0, %v5683_v56  ;;  %6191 = vmatprep.subr.bf16.mxu1 %v6789_v3  ;;  %v6778_v56 = vld [vmem:[%s7122_s29 + $0x63c] ss:$108 sps:$4 sm:$0xff]  }
 0x1cd   : > { %v3694_v8 = vadd.f32 %v5621_v63, %v7335_v42  ;;  %v5686_v4 = vpop.f32.mrf.mxu1 }
 0x1ce   : > { %v5623_v9 = vpop.f32.mrf.mxu0  ;;  %6112 = vmatpush3.bf16.msra.mxu0 %v6784_v60 }
 0x1cf   : > { %v7417_v16 = vadd.f32 %v5685_v20, %v3694_v8  ;;  %v5624_v29 = vadd.f32 %v5623_v9, %v5622_v18  ;;  %v5687_v13 = vpop.f32.mrf.mxu1  ;;  %6192 = vmatpush3.bf16.msra.mxu1 %v6789_v3 }
 0x1d0   : > { %v5625_v17 = vpop.f32.mrf.mxu0  ;;  %v5688_v49 = vadd.f32 %v5687_v13, %v5686_v4  ;;  %4282 = vmatmul.mubr.bf16.gmra.mxu0 %v6747_v2 }
 0x1d1   : > { %v3697_v19 = vadd.f32 %v5624_v29, %v7339_v51  ;;  %v5689_v42 = vpop.f32.mrf.mxu1  ;;  %4379 = vmatmul.mubr.bf16.gmra.mxu1 %v6752_v5  ;;  %4289 = vmatprep.mubr.bf16.mxu0 %v6758_v7  ;;  %v6773_v51 = vld [vmem:[%s7122_s29 + $0x56c] ss:$108 sps:$4 sm:$0xff]  }
 0x1d2   : > { %v5626_v21 = vpop.f32.mrf.mxu0  ;;  %4386 = vmatprep.mubr.bf16.mxu1 %v6763_v61  ;;  %v6776_v29 = vld [vmem:[%s7122_s29 + $0x638] ss:$108 sps:$4 sm:$0xff]  }
 0x1d3   : > { %v7420_v22 = vadd.f32 %v5688_v49, %v3697_v19  ;;  %v5627_v24 = vadd.f32 %v5626_v21, %v5625_v17  ;;  %v5690_v38 = vpop.f32.mrf.mxu1  ;;  %v6781_v49 = vld [vmem:[%s7122_s29 + $0x640] ss:$108 sps:$4 sm:$0xff]   ;;  %v6788_v19 = vld [vmem:[%s7122_s29 + $0x64] ss:$108 sps:$4 sm:$0xff]  }
 0x1d4   : > { %v5628_v31 = vpop.f32.mrf.mxu0  ;;  %v5691_v25 = vadd.f32 %v5690_v38, %v5689_v42 }
 0x1d5   : > { %v3702_v28 = vadd.f32 %v5627_v24, %v7346_v1  ;;  %v5692_v30 = vpop.f32.mrf.mxu1 }
 0x1d6   : > { %v5629_v53 = vpop.f32.mrf.mxu0 }
 0x1d7   : > { %v7427_v44 = vadd.f32 %v5691_v25, %v3702_v28  ;;  %v5630_v50 = vadd.f32 %v5629_v53, %v5628_v31  ;;  %v5693_v37 = vpop.f32.mrf.mxu1 }
 0x1d8   : > { %v5631_v40 = vpop.f32.mrf.mxu0  ;;  %v5694_v41 = vadd.f32 %v5693_v37, %v5692_v30  ;;  %4290 = vmatmul.mubr.bf16.gmra.mxu0 %v6756_v39 }
 0x1d9   : > { %v3705_v43 = vadd.f32 %v5630_v50, %v7349_v12  ;;  %v5695_v45 = vpop.f32.mrf.mxu1  ;;  %4387 = vmatmul.mubr.bf16.gmra.mxu1 %v6761_v33  ;;  %4297 = vmatprep.mubr.bf16.mxu0 %v6768_v35  ;;  %v6783_v12 = vld [vmem:[%s7122_s29 + $0x644] ss:$108 sps:$4 sm:$0xff]   ;;  %v6786_v50 = vld [vmem:[%s7122_s29 + $0x60] ss:$108 sps:$4 sm:$0xff]  }
 0x1da   : > { %v5632_v1 = vpop.f32.mrf.mxu0  ;;  %4394 = vmatprep.mubr.bf16.mxu1 %v6773_v51 }
 0x1db   : > { %v7430_v23 = vadd.f32 %v5694_v41, %v3705_v43  ;;  %v5633_v46 = vadd.f32 %v5632_v1, %v5631_v40  ;;  %v5696_v48 = vpop.f32.mrf.mxu1  ;;  %v6791_v41 = vld [vmem:[%s7122_s29 + $0x140] ss:$108 sps:$4 sm:$0xff]   ;;  %v6794_v43 = vld [vmem:[%s7122_s29 + $0x13c] ss:$108 sps:$4 sm:$0xff]  }
 0x1dc   : > { %v5634_v58 = vpop.f32.mrf.mxu0  ;;  %v5697_v32 = vadd.f32 %v5696_v48, %v5695_v45 }
 0x1dd   : > { %v3710_v55 = vadd.f32 %v5633_v46, %v7356_v26  ;;  %v5698_v3 = vpop.f32.mrf.mxu1 }
 0x1de   : > { %v5635_v57 = vpop.f32.mrf.mxu0 }
 0x1df   : > { %v7437_v60 = vadd.f32 %v5697_v32, %v3710_v55  ;;  %v5636_v63 = vadd.f32 %v5635_v57, %v5634_v58  ;;  %v5699_v0 = vpop.f32.mrf.mxu1 }
 0x1e0   : > { %v5637_v18 = vpop.f32.mrf.mxu0  ;;  %v5700_v20 = vadd.f32 %v5699_v0, %v5698_v3  ;;  %4298 = vmatmul.mubr.bf16.gmra.mxu0 %v6766_v54 }
 0x1e1   : > { %v3713_v2 = vadd.f32 %v5636_v63, %v7359_v36  ;;  %v5701_v8 = vpop.f32.mrf.mxu1  ;;  %4395 = vmatmul.mubr.bf16.gmra.mxu1 %v6771_v11  ;;  %4305 = vmatprep.mubr.bf16.mxu0 %v6778_v56  ;;  %v6790_v36 = vld [vmem:[%s7122_s29 + $0x68] ss:$108 sps:$4 sm:$0xff]   ;;  %v6792_v63 = vld [vmem:[%s7122_s29 + $0x138] ss:$108 sps:$4 sm:$0xff]  }
 0x1e2   : > { %v5638_v26 = vpop.f32.mrf.mxu0  ;;  %4402 = vmatprep.mubr.bf16.mxu1 %v6783_v12 }
 0x1e3   : > { %v7440_v4 = vadd.f32 %v5700_v20, %v3713_v2  ;;  %v5639_v5 = vadd.f32 %v5638_v26, %v5637_v18  ;;  %v5702_v7 = vpop.f32.mrf.mxu1  ;;  %v6797_v20 = vld [vmem:[%s7122_s29 + $0x214] ss:$108 sps:$4 sm:$0xff]   ;;  %v6799_v2 = vld [vmem:[%s7122_s29 + $0x2f0] ss:$108 sps:$4 sm:$0xff]  }
 0x1e4   : > { %v5640_v9 = vpop.f32.mrf.mxu0  ;;  %v5703_v61 = vadd.f32 %v5702_v7, %v5701_v8 }
 0x1e5   : > { %v3718_v13 = vadd.f32 %v5639_v5, %v7366_v52  ;;  %v5704_v17 = vpop.f32.mrf.mxu1 }
 0x1e6   : > { %v5641_v42 = vpop.f32.mrf.mxu0 }
 0x1e7   : > { %v7447_v21 = vadd.f32 %v5703_v61, %v3718_v13  ;;  %v5642_v24 = vadd.f32 %v5641_v42, %v5640_v9  ;;  %v5705_v38 = vpop.f32.mrf.mxu1 }
 0x1e8   : > { %v5643_v31 = vpop.f32.mrf.mxu0  ;;  %v5706_v25 = vadd.f32 %v5705_v38, %v5704_v17  ;;  %4306 = vmatmul.mubr.bf16.gmra.mxu0 %v6776_v29 }
 0x1e9   : > { %v3721_v39 = vadd.f32 %v5642_v24, %v7369_v34  ;;  %v5707_v28 = vpop.f32.mrf.mxu1  ;;  %4403 = vmatmul.mubr.bf16.gmra.mxu1 %v6781_v49  ;;  %4443 = vmatprep.mubr.bf16.mxu0 %v6788_v19  ;;  %v6798_v34 = vld [vmem:[%s7122_s29 + $0x218] ss:$108 sps:$4 sm:$0xff]   ;;  %v6795_v24 = vld [vmem:[%s7122_s29 + $0x210] ss:$108 sps:$4 sm:$0xff]  }
 0x1ea   : > { %v5644_v52 = vpop.f32.mrf.mxu0  ;;  %6193 = vmatprep.mubr.bf16.mxu1 %v6790_v36 }
 0x1eb   : > { %v7450_v30 = vadd.f32 %v5706_v25, %v3721_v39  ;;  %v5645_v33 = vadd.f32 %v5644_v52, %v5643_v31  ;;  %v5708_v35 = vpop.f32.mrf.mxu1  ;;  %v6802_v25 = vld [vmem:[%s7122_s29 + $0x2ec] ss:$108 sps:$4 sm:$0xff]  }
 0x1ec   : > { %v5646_v53 = vpop.f32.mrf.mxu0  ;;  %v5709_v51 = vadd.f32 %v5708_v35, %v5707_v28  ;;  %v6807_v39 = vld [vmem:[%s7122_s29 + $0x4a0] ss:$108 sps:$4 sm:$0xff]  }
 0x1ed   : > { %v3726_v37 = vadd.f32 %v5645_v33, %v7375_v14  ;;  %v5710_v40 = vpop.f32.mrf.mxu1 }
 0x1ee   : > { %v5647_v45 = vpop.f32.mrf.mxu0 }
 0x1ef   : > { %v7457_v1 = vadd.f32 %v5709_v51, %v3726_v37  ;;  %v5648_v46 = vadd.f32 %v5647_v45, %v5646_v53  ;;  %v5711_v48 = vpop.f32.mrf.mxu1 }
 0x1f0   : > { %v5712_v58 = vadd.f32 %v5711_v48, %v5710_v40  ;;  %v5729_v32 = vpop.f32.mrf.mxu0  ;;  %4444 = vmatmul.mubr.bf16.vlgmr.msra.gmra.mxu0 %v6786_v50 }
 0x1f1   : > { %v3729_v54 = vadd.f32 %v5648_v46, %v7380_v59  ;;  %v5793_v55 = vpop.f32.mrf.mxu1  ;;  %6194 = vmatmul.mubr.bf16.vlgmr.msra.gmra.mxu1 %v6791_v41  ;;  %4451 = vmatprep.mubr.bf16.mxu0 %v6794_v43  ;;  %v6806_v59 = vld [vmem:[%s7122_s29 + $0x3c8] ss:$108 sps:$4 sm:$0xff]  }
 0x1f2   : > { %v5730_v14 = vpop.f32.mrf.mxu0  ;;  %6197 = vmatprep.mubr.bf16.mxu1 %v6798_v34  ;;  %v6800_v46 = vld [vmem:[%s7122_s29 + $0x2e8] ss:$108 sps:$4 sm:$0xff]  }
 0x1f3   : > { %v7460_v3 = vadd.f32 %v5712_v58, %v3729_v54  ;;  %v5731_v11 = vadd.f32 %v5730_v14, %v5729_v32  ;;  %v5794_v56 = vpop.f32.mrf.mxu1  ;;  %v6805_v32 = vld [vmem:[%s7122_s29 + $0x3c4] ss:$108 sps:$4 sm:$0xff]  }
 0x1f4   : > { %v5732_v57 = vpop.f32.mrf.mxu0  ;;  %v5795_v12 = vadd.f32 %v5794_v56, %v5793_v55  ;;  %v6815_v54 = vld [vmem:[%s7122_s29 + $0x650] ss:$108 sps:$4 sm:$0xff]  }
 0x1f5   : > { %v3864_v0 = vadd.f32 %v5731_v11, %v7387_v10  ;;  %v5796_v18 = vpop.f32.mrf.mxu1 }
 0x1f6   : > { %v5733_v8 = vpop.f32.mrf.mxu0 }
 0x1f7   : > { %v7467_v26 = vadd.f32 %v5795_v12, %v3864_v0  ;;  %v5734_v5 = vadd.f32 %v5733_v8, %v5732_v57  ;;  %v5797_v7 = vpop.f32.mrf.mxu1 }
 0x1f8   : > { %v5735_v9 = vpop.f32.mrf.mxu0  ;;  %v5798_v61 = vadd.f32 %v5797_v7, %v5796_v18  ;;  %4452 = vmatmul.mubr.bf16.gmra.mxu0 %v6792_v63 }
 0x1f9   : > { %v3867_v29 = vadd.f32 %v5734_v5, %v7390_v62  ;;  %v5799_v13 = vpop.f32.mrf.mxu1  ;;  %4459 = vmatprep.mubr.bf16.mxu0 %v6797_v20  ;;  %6198 = vmatmul.mubr.bf16.gmra.mxu1 %v6799_v2  ;;  %v6814_v62 = vld [vmem:[%s7122_s29 + $0x578] ss:$108 sps:$4 sm:$0xff]  }
 0x1fa   : > { %v5736_v10 = vpop.f32.mrf.mxu0  ;;  %6201 = vmatprep.mubr.bf16.mxu1 %v6806_v59  ;;  %v6803_v59 = vld [vmem:[%s7122_s29 + $0x3c0] ss:$108 sps:$4 sm:$0xff]  }
 0x1fb   : > { %v7470_v17 = vadd.f32 %v5798_v61, %v3867_v29  ;;  %v5737_v49 = vadd.f32 %v5736_v10, %v5735_v9  ;;  %v5800_v19 = vpop.f32.mrf.mxu1  ;;  %v6810_v9 = vld [vmem:[%s7122_s29 + $0x49c] ss:$108 sps:$4 sm:$0xff]  }
 0x1fc   : > { %v5738_v42 = vpop.f32.mrf.mxu0  ;;  %v5801_v36 = vadd.f32 %v5800_v19, %v5799_v13 }
 0x1fd   : > { %v3872_v38 = vadd.f32 %v5737_v49, %v7397_v15  ;;  %v5802_v31 = vpop.f32.mrf.mxu1 }
 0x1fe   : > { %v5739_v28 = vpop.f32.mrf.mxu0 }
 0x1ff   : > { %v7477_v52 = vadd.f32 %v5801_v36, %v3872_v38  ;;  %v5740_v33 = vadd.f32 %v5739_v28, %v5738_v42  ;;  %v5803_v35 = vpop.f32.mrf.mxu1 }
 0x200   : > { %v5741_v53 = vpop.f32.mrf.mxu0  ;;  %v5804_v51 = vadd.f32 %v5803_v35, %v5802_v31  ;;  %4460 = vmatmul.mubr.bf16.gmra.mxu0 %v6795_v24 }
 0x201   : > { %v3875_v50 = vadd.f32 %v5740_v33, %v7400_v27  ;;  %v5805_v37 = vpop.f32.mrf.mxu1  ;;  %4467 = vmatprep.mubr.bf16.mxu0 %v6802_v25  ;;  %6202 = vmatmul.mubr.bf16.gmra.mxu1 %v6807_v39  ;;  %v6808_v39 = vld [vmem:[%s7122_s29 + $0x498] ss:$108 sps:$4 sm:$0xff]   ;;  %v6813_v33 = vld [vmem:[%s7122_s29 + $0x574] ss:$108 sps:$4 sm:$0xff]  }
 0x202   : > { %v5742_v15 = vpop.f32.mrf.mxu0  ;;  %6205 = vmatprep.mubr.bf16.mxu1 %v6814_v62 }
 0x203   : > { %v7480_v40 = vadd.f32 %v5804_v51, %v3875_v50  ;;  %v5743_v41 = vadd.f32 %v5742_v15, %v5741_v53  ;;  %v5806_v43 = vpop.f32.mrf.mxu1 }
 0x204   : > { %v5744_v45 = vpop.f32.mrf.mxu0  ;;  %v5807_v34 = vadd.f32 %v5806_v43, %v5805_v37 }
 0x205   : > { %v3880_v48 = vadd.f32 %v5743_v41, %v7407_v47  ;;  %v5808_v58 = vpop.f32.mrf.mxu1 }
 0x206   : > { %v5745_v55 = vpop.f32.mrf.mxu0 }
 0x207   : > { %v7486_v14 = vadd.f32 %v5807_v34, %v3880_v48  ;;  %v5746_v27 = vadd.f32 %v5745_v55, %v5744_v45  ;;  %v5809_v11 = vpop.f32.mrf.mxu1  ;;  %v6818_v55 = vld [vmem:[%s7122_s29 + $0x64c] ss:$108 sps:$4 sm:$0xff]  }
 0x208   : > { %v5747_v56 = vpop.f32.mrf.mxu0  ;;  %v5810_v57 = vadd.f32 %v5809_v11, %v5808_v58  ;;  %4468 = vmatmul.mubr.bf16.gmra.mxu0 %v6800_v46  ;;  %v6811_v58 = vld [vmem:[%s7122_s29 + $0x570] ss:$108 sps:$4 sm:$0xff]  }
 0x209   : > { %v3883_v12 = vadd.f32 %v5746_v27, %v7410_v6  ;;  %v5811_v63 = vpop.f32.mrf.mxu1  ;;  %4475 = vmatprep.mubr.bf16.mxu0 %v6805_v32  ;;  %6206 = vmatmul.mubr.bf16.gmra.mxu1 %v6815_v54 }
 0x20a   : > { %v5748_v0 = vpop.f32.mrf.mxu0 }
 0x20b   : > { %v7489_v47 = vadd.f32 %v5810_v57, %v3883_v12  ;;  %v5749_v18 = vadd.f32 %v5748_v0, %v5747_v56  ;;  %v5812_v20 = vpop.f32.mrf.mxu1 }
 0x20c   : > { %v5750_v2 = vpop.f32.mrf.mxu0  ;;  %v5813_v8 = vadd.f32 %v5812_v20, %v5811_v63 }
 0x20d   : > { %v3888_v5 = vadd.f32 %v5749_v18, %v7417_v16  ;;  %v5814_v7 = vpop.f32.mrf.mxu1 }
 0x20e   : > { %v5751_v61 = vpop.f32.mrf.mxu0 }
 0x20f   : > { %v7494_v29 = vadd.f32 %v5813_v8, %v3888_v5  ;;  %v5752_v6 = vadd.f32 %v5751_v61, %v5750_v2  ;;  %v5815_v13 = vpop.f32.mrf.mxu1  ;;  %v6816_v5 = vld [vmem:[%s7122_s29 + $0x648] ss:$108 sps:$4 sm:$0xff]  }
 0x210   : > { %v5753_v10 = vpop.f32.mrf.mxu0  ;;  %v5816_v49 = vadd.f32 %v5815_v13, %v5814_v7  ;;  %4476 = vmatmul.mubr.bf16.gmra.mxu0 %v6803_v59 }
 0x211   : > { %v3891_v19 = vadd.f32 %v5752_v6, %v7420_v22  ;;  %v5817_v42 = vpop.f32.mrf.mxu1  ;;  %4483 = vmatprep.mubr.bf16.mxu0 %v6810_v9 }
 0x212   : > { %v5754_v36 = vpop.f32.mrf.mxu0 }
 0x213   : > { %v7497_v24 = vadd.f32 %v5816_v49, %v3891_v19  ;;  %v5755_v16 = vadd.f32 %v5754_v36, %v5753_v10  ;;  %v5818_v38 = vpop.f32.mrf.mxu1 }
 0x214   : > { %v5756_v31 = vpop.f32.mrf.mxu0  ;;  %v5819_v25 = vadd.f32 %v5818_v38, %v5817_v42 }
 0x215   : > { %v3896_v28 = vadd.f32 %v5755_v16, %v7427_v44  ;;  %v5820_v62 = vpop.f32.mrf.mxu1 }
 0x216   : > { %v5757_v35 = vpop.f32.mrf.mxu0 }
 0x217   : > { %v7502_v53 = vadd.f32 %v5819_v25, %v3896_v28  ;;  %v5758_v51 = vadd.f32 %v5757_v35, %v5756_v31  ;;  %v5821_v22 = vpop.f32.mrf.mxu1 }
 0x218   : > { %v5759_v50 = vpop.f32.mrf.mxu0  ;;  %v5822_v37 = vadd.f32 %v5821_v22, %v5820_v62  ;;  %4484 = vmatmul.mubr.bf16.gmra.mxu0 %v6808_v39 }
 0x219   : > { %v3899_v15 = vadd.f32 %v5758_v51, %v7430_v23  ;;  %v5823_v41 = vpop.f32.mrf.mxu1  ;;  %4491 = vmatprep.mubr.bf16.mxu0 %v6813_v33 }
 0x21a   : > { %v5760_v43 = vpop.f32.mrf.mxu0 }
 0x21b   : > { %v7505_v45 = vadd.f32 %v5822_v37, %v3899_v15  ;;  %v5761_v44 = vadd.f32 %v5760_v43, %v5759_v50  ;;  %v5824_v34 = vpop.f32.mrf.mxu1 }
 0x21c   : > { %v5762_v46 = vpop.f32.mrf.mxu0  ;;  %v5825_v48 = vadd.f32 %v5824_v34, %v5823_v41 }
 0x21d   : > { %v3904_v32 = vadd.f32 %v5761_v44, %v7437_v60  ;;  %v5826_v54 = vpop.f32.mrf.mxu1 }
 0x21e   : > { %v5763_v27 = vpop.f32.mrf.mxu0 }
 0x21f   : > { %v7510_v11 = vadd.f32 %v5825_v48, %v3904_v32  ;;  %v5764_v56 = vadd.f32 %v5763_v27, %v5762_v46  ;;  %v5827_v23 = vpop.f32.mrf.mxu1 }
 0x220   : > { %v5765_v57 = vpop.f32.mrf.mxu0  ;;  %v5828_v12 = vadd.f32 %v5827_v23, %v5826_v54  ;;  %4492 = vmatmul.mubr.bf16.gmra.mxu0 %v6811_v58 }
 0x221   : > { %v3907_v63 = vadd.f32 %v5764_v56, %v7440_v4  ;;  %v5829_v0 = vpop.f32.mrf.mxu1  ;;  %4499 = vmatprep.mubr.bf16.mxu0 %v6818_v55 }
 0x222   : > { %v5766_v18 = vpop.f32.mrf.mxu0 }
 0x223   : > { %v7513_v20 = vadd.f32 %v5828_v12, %v3907_v63  ;;  %v5767_v2 = vadd.f32 %v5766_v18, %v5765_v57  ;;  %v5830_v60 = vpop.f32.mrf.mxu1 }
 0x224   : > { %v5768_v8 = vpop.f32.mrf.mxu0  ;;  %v5831_v59 = vadd.f32 %v5830_v60, %v5829_v0 }
 0x225   : > { %v3912_v7 = vadd.f32 %v5767_v2, %v7447_v21  ;;  %v5832_v9 = vpop.f32.mrf.mxu1 }
 0x226   : > { %v5769_v61 = vpop.f32.mrf.mxu0 }
 0x227   : > { %v7517_v6 = vadd.f32 %v5831_v59, %v3912_v7  ;;  %v5770_v13 = vadd.f32 %v5769_v61, %v5768_v8  ;;  %v5833_v10 = vpop.f32.mrf.mxu1 }
 0x228   : > { %v5771_v49 = vpop.f32.mrf.mxu0  ;;  %v5834_v4 = vadd.f32 %v5833_v10, %v5832_v9  ;;  %4500 = vmatmul.mubr.bf16.gmra.mxu0 %v6816_v5 }
 0x229   : > { %v3915_v19 = vadd.f32 %v5770_v13, %v7450_v30  ;;  %v5835_v42 = vpop.f32.mrf.mxu1 }
 0x22a   : > { %v5772_v36 = vpop.f32.mrf.mxu0 }
 0x22b   : > { %v7520_v16 = vadd.f32 %v5834_v4, %v3915_v19  ;;  %v5773_v38 = vadd.f32 %v5772_v36, %v5771_v49  ;;  %v5836_v31 = vpop.f32.mrf.mxu1 }
 0x22c   : > { %v5774_v25 = vpop.f32.mrf.mxu0  ;;  %v5837_v39 = vadd.f32 %v5836_v31, %v5835_v42 }
 0x22d   : > { %v3920_v21 = vadd.f32 %v5773_v38, %v7457_v1  ;;  %v5838_v28 = vpop.f32.mrf.mxu1 }
 0x22e   : > { %v5775_v62 = vpop.f32.mrf.mxu0 }
 0x22f   : > { %v7523_v33 = vadd.f32 %v5837_v39, %v3920_v21  ;;  %v5776_v35 = vadd.f32 %v5775_v62, %v5774_v25  ;;  %v5839_v51 = vpop.f32.mrf.mxu1 }
 0x230   : > { %v5840_v22 = vadd.f32 %v5839_v51, %v5838_v28  ;;  %v5857_v50 = vpop.f32.mrf.mxu0 }
 0x231   : > { %v3923_v30 = vadd.f32 %v5776_v35, %v7460_v3  ;;  %v5921_v37 = vpop.f32.mrf.mxu1 }
 0x232   : > { %v5858_v15 = vpop.f32.mrf.mxu0 }
 0x233   : > { %v7526_v41 = vadd.f32 %v5840_v22, %v3923_v30  ;;  %v5859_v43 = vadd.f32 %v5858_v15, %v5857_v50  ;;  %v5922_v44 = vpop.f32.mrf.mxu1 }
 0x234   : > { %v5860_v34 = vpop.f32.mrf.mxu0  ;;  %v5923_v46 = vadd.f32 %v5922_v44, %v5921_v37 }
 0x235   : > { %v4058_v1 = vadd.f32 %v5859_v43, %v7467_v26  ;;  %v5924_v48 = vpop.f32.mrf.mxu1 }
 0x236   : > { %v5861_v58 = vpop.f32.mrf.mxu0 }
 0x237   : > { %v7529_v32 = vadd.f32 %v5923_v46, %v4058_v1  ;;  %v5862_v54 = vadd.f32 %v5861_v58, %v5860_v34  ;;  %v5925_v55 = vpop.f32.mrf.mxu1 }
 0x238   : > { %v5863_v27 = vpop.f32.mrf.mxu0  ;;  %v5926_v56 = vadd.f32 %v5925_v55, %v5924_v48 }
 0x239   : > { %v4061_v3 = vadd.f32 %v5862_v54, %v7470_v17  ;;  %v5927_v23 = vpop.f32.mrf.mxu1 }
 0x23a   : > { %v5864_v57 = vpop.f32.mrf.mxu0 }
 0x23b   : > { %v7532_v12 = vadd.f32 %v5926_v56, %v4061_v3  ;;  %v5865_v63 = vadd.f32 %v5864_v57, %v5863_v27  ;;  %v5928_v0 = vpop.f32.mrf.mxu1 }
 0x23c   : > { %v5866_v18 = vpop.f32.mrf.mxu0  ;;  %v5929_v2 = vadd.f32 %v5928_v0, %v5927_v23 }
 0x23d   : > { %v4066_v26 = vadd.f32 %v5865_v63, %v7477_v52  ;;  %v5930_v60 = vpop.f32.mrf.mxu1 }
 0x23e   : > { %v5867_v8 = vpop.f32.mrf.mxu0 }
 0x23f   : > { %v7535_v59 = vadd.f32 %v5929_v2, %v4066_v26  ;;  %v5868_v5 = vadd.f32 %v5867_v8, %v5866_v18  ;;  %v5931_v7 = vpop.f32.mrf.mxu1 }
 0x240   : > { %v5869_v9 = vpop.f32.mrf.mxu0  ;;  %v5932_v61 = vadd.f32 %v5931_v7, %v5930_v60 }
 0x241   : > { %v4069_v17 = vadd.f32 %v5868_v5, %v7480_v40  ;;  %v5933_v13 = vpop.f32.mrf.mxu1 }
 0x242   : > { %v5870_v10 = vpop.f32.mrf.mxu0 }
 0x243   : > { %v7538_v49 = vadd.f32 %v5932_v61, %v4069_v17  ;;  %v5871_v4 = vadd.f32 %v5870_v10, %v5869_v9  ;;  %v5934_v19 = vpop.f32.mrf.mxu1 }
 0x244   : > { %v5872_v42 = vpop.f32.mrf.mxu0  ;;  %v5935_v36 = vadd.f32 %v5934_v19, %v5933_v13 }
 0x245   : > { %v4074_v52 = vadd.f32 %v5871_v4, %v7486_v14  ;;  %v5936_v38 = vpop.f32.mrf.mxu1 }
 0x246   : > { %v5873_v31 = vpop.f32.mrf.mxu0 }
 0x247   : > { %v7541_v25 = vadd.f32 %v5935_v36, %v4074_v52  ;;  %v5874_v39 = vadd.f32 %v5873_v31, %v5872_v42  ;;  %v5937_v21 = vpop.f32.mrf.mxu1 }
 0x248   : > { %v5875_v28 = vpop.f32.mrf.mxu0  ;;  %v5938_v62 = vadd.f32 %v5937_v21, %v5936_v38 }
 0x249   : > { %v4077_v40 = vadd.f32 %v5874_v39, %v7489_v47  ;;  %v5939_v35 = vpop.f32.mrf.mxu1 }
 0x24a   : > { %v5876_v51 = vpop.f32.mrf.mxu0 }
 0x24b   : > { %v7544_v22 = vadd.f32 %v5938_v62, %v4077_v40  ;;  %v5877_v50 = vadd.f32 %v5876_v51, %v5875_v28  ;;  %v5940_v30 = vpop.f32.mrf.mxu1 }
 0x24c   : > { %v5878_v37 = vpop.f32.mrf.mxu0  ;;  %v5941_v15 = vadd.f32 %v5940_v30, %v5939_v35 }
 0x24d   : > { %v4082_v14 = vadd.f32 %v5877_v50, %v7494_v29  ;;  %v5942_v43 = vpop.f32.mrf.mxu1 }
 0x24e   : > { %v5879_v44 = vpop.f32.mrf.mxu0 }
 0x24f   : > { %v7547_v34 = vadd.f32 %v5941_v15, %v4082_v14  ;;  %v5880_v46 = vadd.f32 %v5879_v44, %v5878_v37  ;;  %v5943_v1 = vpop.f32.mrf.mxu1 }
 0x250   : > { %v5881_v48 = vpop.f32.mrf.mxu0  ;;  %v5944_v58 = vadd.f32 %v5943_v1, %v5942_v43 }
 0x251   : > { %v4085_v47 = vadd.f32 %v5880_v46, %v7497_v24  ;;  %v5945_v54 = vpop.f32.mrf.mxu1 }
 0x252   : > { %v5882_v55 = vpop.f32.mrf.mxu0 }
 0x253   : > { %v7550_v27 = vadd.f32 %v5944_v58, %v4085_v47  ;;  %v5883_v56 = vadd.f32 %v5882_v55, %v5881_v48  ;;  %v5946_v3 = vpop.f32.mrf.mxu1 }
 0x254   : > { %v5884_v23 = vpop.f32.mrf.mxu0  ;;  %v5947_v57 = vadd.f32 %v5946_v3, %v5945_v54 }
 0x255   : > { %v4090_v29 = vadd.f32 %v5883_v56, %v7502_v53  ;;  %v5948_v63 = vpop.f32.mrf.mxu1 }
 0x256   : > { %v5885_v0 = vpop.f32.mrf.mxu0 }
 0x257   : > { %v7553_v18 = vadd.f32 %v5947_v57, %v4090_v29  ;;  %v5886_v2 = vadd.f32 %v5885_v0, %v5884_v23  ;;  %v5949_v26 = vpop.f32.mrf.mxu1 }
 0x258   : > { %v5887_v60 = vpop.f32.mrf.mxu0  ;;  %v5950_v8 = vadd.f32 %v5949_v26, %v5948_v63 }
 0x259   : > { %v4093_v24 = vadd.f32 %v5886_v2, %v7505_v45  ;;  %v5951_v5 = vpop.f32.mrf.mxu1 }
 0x25a   : > { %v5888_v7 = vpop.f32.mrf.mxu0 }
 0x25b   : > { %v7556_v9 = vadd.f32 %v5950_v8, %v4093_v24  ;;  %v5889_v61 = vadd.f32 %v5888_v7, %v5887_v60  ;;  %v5952_v17 = vpop.f32.mrf.mxu1 }
 0x25c   : > { %v5890_v13 = vpop.f32.mrf.mxu0  ;;  %v5953_v10 = vadd.f32 %v5952_v17, %v5951_v5 }
 0x25d   : > { %v4098_v53 = vadd.f32 %v5889_v61, %v7510_v11  ;;  %v5954_v4 = vpop.f32.mrf.mxu1 }
 0x25e   : > { %v5891_v19 = vpop.f32.mrf.mxu0 }
 0x25f   : > { %v7559_v42 = vadd.f32 %v5953_v10, %v4098_v53  ;;  %v5892_v36 = vadd.f32 %v5891_v19, %v5890_v13  ;;  %v5955_v52 = vpop.f32.mrf.mxu1 }
 0x260   : > { %v5893_v38 = vpop.f32.mrf.mxu0  ;;  %v5956_v31 = vadd.f32 %v5955_v52, %v5954_v4 }
 0x261   : > { %7938 = vst [vmem:[#allocation14_spill] sm:$0xff] %v7559_v42  ;;  %v4101_v45 = vadd.f32 %v5892_v36, %v7513_v20  ;;  %v5957_v39 = vpop.f32.mrf.mxu1 }
 0x262   : > { %v5894_v21 = vpop.f32.mrf.mxu0 }
 0x263   : > { %v7562_v28 = vadd.f32 %v5956_v31, %v4101_v45  ;;  %v5895_v62 = vadd.f32 %v5894_v21, %v5893_v38  ;;  %v5958_v40 = vpop.f32.mrf.mxu1 }
 0x264   : > { %v5896_v35 = vpop.f32.mrf.mxu0  ;;  %v5959_v51 = vadd.f32 %v5958_v40, %v5957_v39 }
 0x265   : > { %7939 = vst [vmem:[#allocation15_spill] sm:$0xff] %v7562_v28  ;;  %v4106_v11 = vadd.f32 %v5895_v62, %v7517_v6  ;;  %v5960_v50 = vpop.f32.mrf.mxu1 }
 0x266   : > { %v5897_v30 = vpop.f32.mrf.mxu0 }
 0x267   : > { %v7565_v37 = vadd.f32 %v5959_v51, %v4106_v11  ;;  %v5898_v15 = vadd.f32 %v5897_v30, %v5896_v35  ;;  %v5961_v14 = vpop.f32.mrf.mxu1 }
 0x268   : > { %v5899_v43 = vpop.f32.mrf.mxu0  ;;  %v5962_v44 = vadd.f32 %v5961_v14, %v5960_v50 }
 0x269   : > { %7940 = vst [vmem:[#allocation16_spill] sm:$0xff] %v7565_v37  ;;  %v4109_v20 = vadd.f32 %v5898_v15, %v7520_v16  ;;  %v5963_v46 = vpop.f32.mrf.mxu1 }
 0x26a   : > { %v5900_v1 = vpop.f32.mrf.mxu0 }
 0x26b   : > { %v7568_v48 = vadd.f32 %v5962_v44, %v4109_v20  ;;  %v5901_v58 = vadd.f32 %v5900_v1, %v5899_v43  ;;  %v5964_v47 = vpop.f32.mrf.mxu1 }
 0x26c   : > { %v5902_v54 = vpop.f32.mrf.mxu0  ;;  %v5965_v55 = vadd.f32 %v5964_v47, %v5963_v46 }
 0x26d   : > { %7941 = vst [vmem:[#allocation17_spill] sm:$0xff] %v7568_v48  ;;  %v4114_v6 = vadd.f32 %v5901_v58, %v7523_v33  ;;  %v5966_v56 = vpop.f32.mrf.mxu1 }
 0x26e   : > { %v5903_v3 = vpop.f32.mrf.mxu0 }
 0x26f   : > { %v7571_v23 = vadd.f32 %v5965_v55, %v4114_v6  ;;  %v5904_v57 = vadd.f32 %v5903_v3, %v5902_v54  ;;  %v5967_v29 = vpop.f32.mrf.mxu1 }
 0x270   : > { %v5968_v63 = vadd.f32 %v5967_v29, %v5966_v56  ;;  %v5985_v0 = vpop.f32.mrf.mxu0 }
 0x271   : > { %7942 = vst [vmem:[#allocation18_spill] sm:$0xff] %v7571_v23  ;;  %v4117_v16 = vadd.f32 %v5904_v57, %v7526_v41  ;;  %v7574_v2 = vpop.f32.mrf.mxu1 }
 0x272   : > { %v5986_v26 = vpop.f32.mrf.mxu0 }
 0x273   : > { %v7576_v60 = vadd.f32 %v5968_v63, %v4117_v16  ;;  %v7578_v8 = vpop.f32.mrf.mxu1 }
 0x274   : > { %v7580_v24 = vpop.f32.mrf.mxu0 }
 0x275   : > { %7943 = vst [vmem:[#allocation19_spill] sm:$0xff] %v7576_v60  ;;  %v7582_v33 = vpop.f32.mrf.mxu1 }
 0x276   : > { %v5989_v5 = vpop.f32.mrf.mxu0 }
 0x277   : > { %v7584_v7 = vpop.f32.mrf.mxu1 }
 0x278   : > { %v7586_v61 = vpop.f32.mrf.mxu0 }
 0x279   : > { %v7588_v17 = vpop.f32.mrf.mxu1 }
 0x27a   : > { %v7590_v13 = vpop.f32.mrf.mxu0 }
 0x27b   : > { %v7592_v41 = vpop.f32.mrf.mxu1 }
 0x27c   : > { %v7594_v10 = vpop.f32.mrf.mxu0 }
 0x27d   : > { %v7596_v53 = vpop.f32.mrf.mxu1 }
 0x27e   : > { %v7598_v4 = vpop.f32.mrf.mxu0 }
 0x27f   : > { %v7600_v19 = vpop.f32.mrf.mxu1 }
 0x280   : > { %v7602_v36 = vpop.f32.mrf.mxu0 }
 0x281   : > { %v7604_v52 = vpop.f32.mrf.mxu1 }
 0x282   : > { %v7606_v38 = vpop.f32.mrf.mxu0 }
 0x283   : > { %v7608_v31 = vpop.f32.mrf.mxu1 }
 0x284   : > { %v7610_v45 = vpop.f32.mrf.mxu0 }
 0x285   : > { %v7612_v39 = vpop.f32.mrf.mxu1 }
 0x286   : > { %v7614_v21 = vpop.f32.mrf.mxu0 }
 0x287   : > { %v7616_v62 = vpop.f32.mrf.mxu1 }
 0x288   : > { %v7618_v40 = vpop.f32.mrf.mxu0 }
 0x289   : > { %v7620_v35 = vpop.f32.mrf.mxu1 }
 0x28a   : > { %v7622_v51 = vpop.f32.mrf.mxu0 }
 0x28b   : > { %v7624_v11 = vpop.f32.mrf.mxu1 }
 0x28c   : > { %v7626_v50 = vpop.f32.mrf.mxu0 }
 0x28d   : > { %v7628_v30 = vpop.f32.mrf.mxu1 }
 0x28e   : > { %v7630_v15 = vpop.f32.mrf.mxu0 }
 0x28f   : > { %v7632_v14 = vpop.f32.mrf.mxu1 }
 0x290   : > { %v7634_v43 = vpop.f32.mrf.mxu0 }
 0x291   : > { %v7636_v44 = vpop.f32.mrf.mxu1 }
 0x292   : > { %v7638_v20 = vpop.f32.mrf.mxu0 }
 0x293   : > { %v7640_v46 = vpop.f32.mrf.mxu1 }
 0x294   : > { %v7642_v1 = vpop.f32.mrf.mxu0 }
 0x295   : > { %v7644_v58 = vpop.f32.mrf.mxu1 }
 0x296   : > { %v7646_v47 = vpop.f32.mrf.mxu0 }
 0x297   : > { %v7648_v54 = vpop.f32.mrf.mxu1 }
 0x298   : > { %7944 = vst [vmem:[#allocation20_spill] sm:$0xff] %v7648_v54  ;;  %v7650_v55 = vpop.f32.mrf.mxu0 }
 0x299   : > { %v7652_v6 = vpop.f32.mrf.mxu1 }
 0x29a   : > { %7945 = vst [vmem:[#allocation21_spill] sm:$0xff] %v7652_v6  ;;  %v7654_v56 = vpop.f32.mrf.mxu0 }
 0x29b   : > { %v7656_v3 = vpop.f32.mrf.mxu1 }
 0x29c   : > { %7946 = vst [vmem:[#allocation22_spill] sm:$0xff] %v7656_v3  ;;  %v7658_v57 = vpop.f32.mrf.mxu0 }
 0x29d   : > { %7947 = vst [vmem:[#allocation23_spill] sm:$0xff] %v7658_v57  ;;  %v7660_v29 = vpop.f32.mrf.mxu1 }
 0x29e   : > { %7948 = vst [vmem:[#allocation24_spill] sm:$0xff] %v7660_v29  ;;  %v7662_v63 = vpop.f32.mrf.mxu0 }
 0x29f   : > { %7949 = vst [vmem:[#allocation25_spill] sm:$0xff] %v7662_v63  ;;  %v7664_v16 = vpop.f32.mrf.mxu1 }
 0x2a0   : > { %7950 = vst [vmem:[#allocation26_spill] sm:$0xff] %v7664_v16  ;;  %v7666_v60 = vpop.f32.mrf.mxu0 }
 0x2a1   : > { %7951 = vst [vmem:[#allocation27_spill] sm:$0xff] %v7666_v60  ;;  %v7668_v23 = vpop.f32.mrf.mxu1 }
 0x2a2   : > { %7952 = vst [vmem:[#allocation28_spill] sm:$0xff] %v7668_v23  ;;  %v7670_v48 = vpop.f32.mrf.mxu0  ;;  %v5987_v23 = vadd.f32 %v5986_v26, %v5985_v0 }
 0x2a3   : > { %7953 = vst [vmem:[#allocation29_spill] sm:$0xff] %v7670_v48  ;;  %v7672_v37 = vpop.f32.mrf.mxu1 }
 0x2a4   : > { %7954 = vst [vmem:[#allocation30_spill] sm:$0xff] %v7672_v37  ;;  %v7674_v28 = vpop.f32.mrf.mxu0  ;;  %v4621_v37 = vlaneseq }
 0x2a5   : > { %7955 = vst [vmem:[#allocation31_spill] sm:$0xff] %v7674_v28  ;;  %v7676_v3 = vpop.f32.mrf.mxu1 }
 0x2a6   : > { %7956 = vst [vmem:[#allocation32_spill] sm:$0xff] %v7676_v3  ;;  %v7678_v57 = vpop.f32.mrf.mxu0  ;;  %v6051_v3 = vadd.f32 %v7578_v8, %v7574_v2  ;;  %v7703_v26 = vshrl.u32 %v4621_v37, 7  ;;  %v6054_v2 = vadd.f32 %v7584_v7, %v7582_v33 }
 0x2a7   : > { %7957 = vst [vmem:[#allocation33_spill] sm:$0xff] %v7678_v57  ;;  %v7680_v29 = vpop.f32.mrf.mxu1 }
 0x2a8   : > { %7958 = vst [vmem:[#allocation34_spill] sm:$0xff] %v7680_v29  ;;  %v7682_v63 = vpop.f32.mrf.mxu0  ;;  %v4252_v29 = vadd.f32 %v5987_v23, %v7529_v32 }
 0x2a9   : > { %7959 = vst [vmem:[#allocation35_spill] sm:$0xff] %v7682_v63  ;;  %v7684_v16 = vpop.f32.mrf.mxu1  ;;  %v4623_v63 = vadd.s32 8, %v7703_v26 }
 0x2aa   : > { %7960 = vst [vmem:[#allocation36_spill] sm:$0xff] %v7684_v16  ;;  %v7686_v60 = vpop.f32.mrf.mxu0  ;;  %v5990_v16 = vadd.f32 %v5989_v5, %v7580_v24  ;;  %v4349_v32 = vadd.f32 %v6051_v3, %v4252_v29  ;;  %v6057_v3 = vadd.f32 %v7592_v41, %v7588_v17  ;;  %v6060_v17 = vadd.f32 %v7600_v19, %v7596_v53 }
 0x2ab   : > { %7961 = vst [vmem:[#allocation37_spill] sm:$0xff] %v7686_v60  ;;  %v7688_v6 = vpop.f32.mrf.mxu1  ;;  %v5999_v41 = vadd.f32 %v7606_v38, %v7602_v36  ;;  %v4626_v36 = vadd.s32 32, %v7703_v26 }
 0x2ac   : > { %7962 = vst [vmem:[#allocation38_spill] sm:$0xff] %v7688_v6  ;;  %v7690_v48 = vpop.f32.mrf.mxu0  ;;  %v7705_v6 = vstv %s5319_s18  ;;  %v4255_v23 = vadd.f32 %v5990_v16, %v7532_v12 }
 0x2ad   : > { %7963 = vst [vmem:[#allocation39_spill] sm:$0xff] %v7690_v48  ;;  %v7692_v42 = vpop.f32.mrf.mxu1  ;;  %v4640_v5 = vadd.s32 %v7705_v6, %v7703_v26  ;;  %v4641_v29 = vadd.s32 %v7705_v6, %v4623_v63 }
 0x2ae   : > { %7964 = vst [vmem:[#allocation40_spill] sm:$0xff] %v7692_v42  ;;  %v7694_v28 = vpop.f32.mrf.mxu0  ;;  %v5993_v42 = vadd.f32 %v7590_v13, %v7586_v61  ;;  %v4352_v33 = vadd.f32 %v6054_v2, %v4255_v23 }
 0x2af   : > { %7965 = vst [vmem:[#allocation41_spill] sm:$0xff] %v7694_v28  ;;  %v7701_v60 = vpop.f32.mrf.mxu1  ;;  %vm4656_vm0 = vcmp.lt.s32.totalorder %v4640_v5, 320  ;;  %vm4657_vm1 = vcmp.lt.s32.totalorder %v4641_v29, 320 }
 0x2b0   : > { %7966 = vst [vmem:[#allocation42_spill] sm:$0xff] %v7701_v60  ;;  %v6113_v0 = vpop.f32.mrf.mxu0  ;;  %v4624_v60 = vadd.s32 16, %v7703_v26  ;;  %v4260_v13 = vadd.f32 %v5993_v42, %v7535_v59 }
 0x2b1   : > { %v6195_v48 = vpop.f32.mrf.mxu1 }
 0x2b2   : > { %v6114_v28 = vpop.f32.mrf.mxu0  ;;  %v4357_v42 = vadd.f32 %v6057_v3, %v4260_v13 }
 0x2b3   : > { %v6115_v8 = vadd.f32 %v6114_v28, %v6113_v0  ;;  %v4542_v24 = vpop.f32.mrf.mxu1  ;;  %v5996_v28 = vadd.f32 %v7598_v4, %v7594_v10 }
 0x2b4   : > { %v6116_v37 = vpop.f32.mrf.mxu0 }
 0x2b5   : > { %v4446_v57 = vadd.f32 %v6115_v8, %v4349_v32  ;;  %v6196_v61 = vpop.f32.mrf.mxu1  ;;  %v4642_v32 = vadd.s32 %v7705_v6, %v4624_v60  ;;  %v4625_v8 = vadd.s32 24, %v7703_v26  ;;  %v4263_v4 = vadd.f32 %v5996_v28, %v7538_v49 }
 0x2b6   : > { %v6117_v12 = vpop.f32.mrf.mxu0  ;;  %v4268_v49 = vadd.f32 %v5999_v41, %v7541_v25  ;;  %v4644_v25 = vadd.s32 %v7705_v6, %v4626_v36 }
 0x2b7   : > { %v6118_v7 = vadd.f32 %v6117_v12, %v6116_v37  ;;  %v4543_v16 = vadd.f32 %v4542_v24, %v4446_v57  ;;  %v4545_v54 = vpop.f32.mrf.mxu1  ;;  %vm4658_vm2 = vcmp.lt.s32.totalorder %v4642_v32, 320  ;;  %v4643_v24 = vadd.s32 %v7705_v6, %v4625_v8 }
 0x2b8   : > { %v6119_v0 = vpop.f32.mrf.mxu0  ;;  %v6063_v37 = vadd.f32 %v7608_v31, %v7604_v52  ;;  %v4360_v3 = vadd.f32 %v6060_v17, %v4263_v4  ;;  %v6002_v12 = vadd.f32 %v7614_v21, %v7610_v45  ;;  %v6066_v17 = vadd.f32 %v7616_v62, %v7612_v39 }
 0x2b9   : > { %4605 = vst [vmem:[%s7725_s17] sm:$0xff] %v4543_v16  ;;  %v4449_v59 = vadd.f32 %v6118_v7, %v4352_v33  ;;  %v4672_v60 = vsel %vm4656_vm0, %v4543_v16, 0.0  ;;  %v7733_v2 = vpop.f32.mrf.mxu1  ;;  %vm4659_vm3 = vcmp.lt.s32.totalorder %v4643_v24, 320  ;;  %vm4660_vm4 = vcmp.lt.s32.totalorder %v4644_v25, 320 }
 0x2ba   : > { %v6120_v10 = vpop.f32.mrf.mxu0  ;;  %v4709_v38 = vmul.f32 %v4672_v60, %v4672_v60  ;;  %v4365_v8 = vadd.f32 %v6063_v37, %v4268_v49  ;;  %v6069_v39 = vadd.f32 %v7624_v11, %v7620_v35  ;;  %v4629_v35 = vadd.s32 56, %v7703_v26 }
 0x2bb   : > { %v6121_v57 = vadd.f32 %v6120_v10, %v6119_v0  ;;  %v4546_v63 = vadd.f32 %v4545_v54, %v4449_v59  ;;  %v4558_v31 = vpop.f32.mrf.mxu1  ;;  %v4627_v0 = vadd.s32 40, %v7703_v26  ;;  %v6005_v59 = vadd.f32 %v7622_v51, %v7618_v40 }
 0x2bc   : > { %v6122_v23 = vpop.f32.mrf.mxu0  ;;  %vm4746_vm0 = vcmask 1040384  }
 0x2bd   : > { %v4454_v53 = vadd.f32 %v6121_v57, %v4357_v42  ;;  %4606 = vst [vmem:[%s7725_s17 + $0x8] sm:$0xff] %v4546_v63  ;;  %v4673_v19 = vsel %vm4657_vm1, %v4546_v63, 0.0  ;;  %v4271_v42 = vadd.f32 %v6002_v12, %v7544_v22  ;;  %v4628_v57 = vadd.s32 48, %v7703_v26 }
 0x2be   : > { %v4688_v5 = vadd.f32 %v4673_v19, %v4672_v60  ;;  %v4710_v54 = vmul.f32 %v4673_v19, %v4673_v19  ;;  %v6123_v13 = vpop.f32.mrf.mxu0  ;;  %v7752_v60 = vpop.f32.mrf.mxu1  ;;  %v4645_v51 = vadd.s32 %v7705_v6, %v4627_v0  ;;  %v4276_v22 = vadd.f32 %v6005_v59, %v7547_v34 }
 0x2bf   : > { %v4551_v29 = vadd.f32 %v6195_v48, %v4454_v53  ;;  %v6124_v33 = vadd.f32 %v6123_v13, %v6122_v23  ;;  %v4368_v37 = vadd.f32 %v6066_v17, %v4271_v42  ;;  %v6008_v53 = vadd.f32 %v7630_v15, %v7626_v50 }
 0x2c0   : > { %v4725_v28 = vadd.f32 %v4710_v54, %v4709_v38  ;;  %v6125_v52 = vpop.f32.mrf.mxu0  ;;  %v4561_v38 = vpop.f32.mrf.mxu1  ;;  %vm4661_vm5 = vcmp.lt.s32.totalorder %v4645_v51, 320  ;;  %v4373_v11 = vadd.f32 %v6069_v39, %v4276_v22  ;;  %v6011_v13 = vadd.f32 %v7638_v20, %v7634_v43 }
 0x2c1   : > { %4607 = vst [vmem:[%s7725_s17 + $0x10] sm:$0xff] %v4551_v29  ;;  %v4674_v7 = vsel %vm4658_vm2, %v4551_v29, 0.0  ;;  %v4457_v16 = vadd.f32 %v6124_v33, %v4360_v3  ;;  %v4279_v12 = vadd.f32 %v6008_v53, %v7550_v27  ;;  %v6072_v29 = vadd.f32 %v7632_v14, %v7628_v30 }
 0x2c2   : > { %v4689_v45 = vadd.f32 %v4688_v5, %v4674_v7  ;;  %v4711_v48 = vmul.f32 %v4674_v7, %v4674_v7  ;;  %v6126_v21 = vpop.f32.mrf.mxu0  ;;  %v4646_v5 = vadd.s32 %v7705_v6, %v4628_v57  ;;  %v7772_v7 = vpop.f32.mrf.mxu1  ;;  %v4630_v43 = vadd.s32 64, %v7703_v26 }
 0x2c3   : > { %v4554_v32 = vadd.f32 %v6196_v61, %v4457_v16  ;;  %v6127_v41 = vadd.f32 %v6126_v21, %v6125_v52  ;;  %v4647_v20 = vadd.s32 %v7705_v6, %v4629_v35  ;;  %v4284_v27 = vadd.f32 %v6011_v13, %v7553_v18 }
 0x2c4   : > { %v4726_v10 = vadd.f32 %v4725_v28, %v4711_v48  ;;  %v6128_v4 = vpop.f32.mrf.mxu0  ;;  %vm4662_vm6 = vcmp.lt.s32.totalorder %v4646_v5, 320  ;;  %v6075_v30 = vadd.f32 %v7640_v46, %v7636_v44  ;;  %v4376_v59 = vadd.f32 %v6072_v29, %v4279_v12  ;;  %v7971_v5 = vld [vmem:[#allocation23_spill] sm:$0xff] }
 0x2c5   : > { %4608 = vst [vmem:[%s7725_s17 + $0x18] sm:$0xff] %v4554_v32  ;;  %v4462_v63 = vadd.f32 %v6127_v41, %v4365_v8  ;;  %v4675_v40 = vsel %vm4659_vm3, %v4554_v32, 0.0  ;;  %v4574_v32 = vpop.f32.mrf.mxu1  ;;  %v4631_v41 = vadd.s32 72, %v7703_v26  ;;  %v4648_v44 = vadd.s32 %v7705_v6, %v4630_v43 }
 0x2c6   : > { %v6129_v62 = vpop.f32.mrf.mxu0  ;;  %v4690_v61 = vadd.f32 %v4689_v45, %v4675_v40  ;;  %v4712_v23 = vmul.f32 %v4675_v40, %v4675_v40  ;;  %v6014_v45 = vadd.f32 %v7646_v47, %v7642_v1  ;;  %vm4663_vm7 = vcmp.lt.s32.totalorder %v4647_v20, 320 }
 0x2c7   : > { %v6130_v19 = vadd.f32 %v6129_v62, %v6128_v4  ;;  %v4559_v36 = vadd.f32 %v4558_v31, %v4462_v63  ;;  %v4381_v46 = vadd.f32 %v6075_v30, %v4284_v27  ;;  %v6017_v1 = vadd.f32 %v7654_v56, %v7650_v55  ;;  %v7967_v63 = vld [vmem:[#allocation20_spill] sm:$0xff]  ;;  %v7968_v56 = vld [vmem:[#allocation14_spill] sm:$0xff]  ;;  %v7975_v27 = vld [vmem:[#allocation15_spill] sm:$0xff] }
 0x2c8   : > { %v4727_v49 = vadd.f32 %v4726_v10, %v4712_v23  ;;  %v6131_v24 = vpop.f32.mrf.mxu0  ;;  %v4287_v57 = vadd.f32 %v6014_v45, %v7556_v9  ;;  %v6078_v40 = vadd.f32 %v7967_v63, %v7644_v58  ;;  %v4649_v23 = vadd.s32 %v7705_v6, %v4631_v41  ;;  %v7969_v58 = vld [vmem:[#allocation21_spill] sm:$0xff] }
 0x2c9   : > { %4609 = vst [vmem:[%s7725_s17 + $0x20] sm:$0xff] %v4559_v36  ;;  %v4676_v34 = vsel %vm4660_vm4, %v4559_v36, 0.0  ;;  %v4465_v54 = vadd.f32 %v6130_v19, %v4368_v37  ;;  %vm4664_vm8 = vcmp.lt.s32.totalorder %v4648_v44, 320  ;;  %v4632_v9 = vadd.s32 80, %v7703_v26  ;;  %v7970_v19 = vld [vmem:[#allocation22_spill] sm:$0xff]  ;;  %v7979_v44 = vld [vmem:[#allocation28_spill] sm:$0xff] }
 0x2ca   : > { %v4691_v50 = vadd.f32 %v4690_v61, %v4676_v34  ;;  %v4713_v15 = vmul.f32 %v4676_v34, %v4676_v34  ;;  %v6132_v3 = vpop.f32.mrf.mxu0  ;;  %v7794_v61 = vpop.f32.mrf.mxu1  ;;  %v4292_v53 = vadd.f32 %v6017_v1, %v7968_v56  ;;  %v7972_v34 = vld [vmem:[#allocation25_spill] sm:$0xff]  ;;  %vm4665_vm9 = vcmp.lt.s32.totalorder %v4649_v23, 320 }
 0x2cb   : > { %v6133_v33 = vadd.f32 %v6132_v3, %v6131_v24  ;;  %v4562_v28 = vadd.f32 %v4561_v38, %v4465_v54  ;;  %v4384_v38 = vadd.f32 %v6078_v40, %v4287_v57  ;;  %v6020_v54 = vadd.f32 %v7972_v34, %v7971_v5  ;;  %v7981_v40 = vld [vmem:[#allocation31_spill] sm:$0xff]  ;;  %v7985_v5 = vld [vmem:[#allocation17_spill] sm:$0xff] }
 0x2cc   : > { %v4728_v52 = vadd.f32 %v4727_v49, %v4713_v15  ;;  %v6134_v31 = vpop.f32.mrf.mxu0  ;;  %v4577_v15 = vpop.f32.mrf.mxu1  ;;  %v4650_v29 = vadd.s32 %v7705_v6, %v4632_v9  ;;  %vm4748_vm1 = vcmask 1041408  }
 0x2cd   : > { %v4470_v16 = vadd.f32 %v6133_v33, %v4373_v11  ;;  %4610 = vst [vmem:[%s7725_s17 + $0x28] sm:$0xff] %v4562_v28  ;;  %v4677_v25 = vsel %vm4661_vm5, %v4562_v28, 0.0  ;;  %v4633_v33 = vadd.s32 88, %v7703_v26  ;;  %v4295_v30 = vadd.f32 %v6020_v54, %v7975_v27  ;;  %v7986_v54 = vld [vmem:[#allocation32_spill] sm:$0xff] }
 0x2ce   : > { %v4692_v14 = vadd.f32 %v4691_v50, %v4677_v25  ;;  %v4714_v0 = vmul.f32 %v4677_v25, %v4677_v25  ;;  %v6135_v8 = vpop.f32.mrf.mxu0  ;;  %vm4666_vm10 = vcmp.lt.s32.totalorder %v4650_v29, 320  ;;  %v7821_v57 = vpop.f32.mrf.mxu1 }
 0x2cf   : > { %v4567_v48 = vadd.f32 %v7733_v2, %v4470_v16  ;;  %v6136_v21 = vadd.f32 %v6135_v8, %v6134_v31  ;;  %v7974_v31 = vld [vmem:[#allocation29_spill] sm:$0xff]  ;;  %v4651_v41 = vadd.s32 %v7705_v6, %v4633_v33 }
 0x2d0   : > { %v4729_v42 = vadd.f32 %v4728_v52, %v4714_v0  ;;  %v6137_v17 = vpop.f32.mrf.mxu0  ;;  %v7973_v52 = vld [vmem:[#allocation27_spill] sm:$0xff]  ;;  %v7977_v0 = vld [vmem:[#allocation26_spill] sm:$0xff] }
 0x2d1   : > { %4611 = vst [vmem:[%s7725_s17 + $0x30] sm:$0xff] %v4567_v48  ;;  %v4678_v18 = vsel %vm4662_vm6, %v4567_v48, 0.0  ;;  %v4473_v10 = vadd.f32 %v6136_v21, %v4376_v59  ;;  %v6023_v16 = vadd.f32 %v7974_v31, %v7973_v52  ;;  %vm4667_vm11 = vcmp.lt.s32.totalorder %v4651_v41, 320  ;;  %v7988_v52 = vld [vmem:[#allocation18_spill] sm:$0xff] }
 0x2d2   : > { %v4693_v47 = vadd.f32 %v4692_v14, %v4678_v18  ;;  %v4715_v2 = vmul.f32 %v4678_v18, %v4678_v18  ;;  %v6138_v4 = vpop.f32.mrf.mxu0  ;;  %v7976_v14 = vld [vmem:[#allocation24_spill] sm:$0xff] }
 0x2d3   : > { %v4570_v51 = vadd.f32 %v7752_v60, %v4473_v10  ;;  %v6139_v22 = vadd.f32 %v6138_v4, %v6137_v17  ;;  %v6081_v60 = vadd.f32 %v7970_v19, %v7969_v58  ;;  %v6084_v8 = vadd.f32 %v7977_v0, %v7976_v14  ;;  %v7978_v18 = vld [vmem:[#allocation16_spill] sm:$0xff]  ;;  %v7983_v19 = vld [vmem:[#allocation35_spill] sm:$0xff] }
 0x2d4   : > { %v4730_v39 = vadd.f32 %v4729_v42, %v4715_v2  ;;  %v6140_v62 = vpop.f32.mrf.mxu0  ;;  %v4634_v42 = vadd.s32 96, %v7703_v26  ;;  %v4300_v10 = vadd.f32 %v6023_v16, %v7978_v18  ;;  %v7989_v16 = vld [vmem:[#allocation36_spill] sm:$0xff]  ;;  %v7991_v0 = vld [vmem:[#allocation39_spill] sm:$0xff] }
 0x2d5   : > { %4612 = vst [vmem:[%s7725_s17 + $0x38] sm:$0xff] %v4570_v51  ;;  %v4478_v37 = vadd.f32 %v6139_v22, %v4381_v46  ;;  %v4679_v55 = vsel %vm4663_vm7, %v4570_v51, 0.0  ;;  %v4389_v28 = vadd.f32 %v6081_v60, %v4292_v53  ;;  %v7980_v46 = vld [vmem:[#allocation30_spill] sm:$0xff]  ;;  %v4392_v63 = vadd.f32 %v6084_v8, %v4295_v30  ;;  %v7982_v51 = vld [vmem:[#allocation33_spill] sm:$0xff] }
 0x2d6   : > { %v6141_v36 = vpop.f32.mrf.mxu0  ;;  %v4694_v49 = vadd.f32 %v4693_v47, %v4679_v55  ;;  %v4716_v24 = vmul.f32 %v4679_v55, %v4679_v55  ;;  %v6087_v1 = vadd.f32 %v7980_v46, %v7979_v44  ;;  %v6026_v22 = vadd.f32 %v7982_v51, %v7981_v40  ;;  %v7984_v60 = vld [vmem:[#allocation37_spill] sm:$0xff]  ;;  %v7995_v40 = vld [vmem:[#allocation42_spill] sm:$0xff] }
 0x2d7   : > { %v6142_v35 = vadd.f32 %v6141_v36, %v6140_v62  ;;  %v4575_v11 = vadd.f32 %v4574_v32, %v4478_v37  ;;  %v4652_v55 = vadd.s32 %v7705_v6, %v4634_v42  ;;  %v4635_v53 = vadd.s32 104, %v7703_v26  ;;  %v7992_v8 = vld [vmem:[#allocation41_spill] sm:$0xff] }
 0x2d8   : > { %v4731_v13 = vadd.f32 %v4730_v39, %v4716_v24  ;;  %v6143_v50 = vpop.f32.mrf.mxu0  ;;  %v4397_v58 = vadd.f32 %v6087_v1, %v4300_v10  ;;  %v6029_v36 = vadd.f32 %v7984_v60, %v7983_v19  ;;  %v4303_v34 = vadd.f32 %v6026_v22, %v7985_v5 }
 0x2d9   : > { %4613 = vst [vmem:[%s7725_s17 + $0x40] sm:$0xff] %v4575_v11  ;;  %v4680_v3 = vsel %vm4664_vm8, %v4575_v11, 0.0  ;;  %v4481_v12 = vadd.f32 %v6142_v35, %v4384_v38  ;;  %v4590_v38 = vpop.f32.mrf.mxu1  ;;  %v7987_v35 = vld [vmem:[#allocation34_spill] sm:$0xff]  ;;  %vm4668_vm12 = vcmp.lt.s32.totalorder %v4652_v55, 320  ;;  %v4653_v33 = vadd.s32 %v7705_v6, %v4635_v53 }
 0x2da   : > { %v4695_v25 = vadd.f32 %v4694_v49, %v4680_v3  ;;  %v4717_v43 = vmul.f32 %v4680_v3, %v4680_v3  ;;  %v6144_v20 = vpop.f32.mrf.mxu0  ;;  %v6090_v11 = vadd.f32 %v7987_v35, %v7986_v54  ;;  %v4308_v31 = vadd.f32 %v6029_v36, %v7988_v52 }
 0x2db   : > { %v6145_v59 = vadd.f32 %v6144_v20, %v6143_v50  ;;  %v4578_v45 = vadd.f32 %v4577_v15, %v4481_v12  ;;  %v6208_v30 = vpop.f32.mrf.mxu1  ;;  %vm4669_vm13 = vcmp.lt.s32.totalorder %v4653_v33, 320 }
 0x2dc   : > { %v4732_v48 = vadd.f32 %v4731_v13, %v4717_v43  ;;  %v6146_v21 = vpop.f32.mrf.mxu0  ;;  %v4400_v14 = vadd.f32 %v6090_v11, %v4303_v34 }
 0x2dd   : > { %v4486_v17 = vadd.f32 %v6145_v59, %v4389_v28  ;;  %4614 = vst [vmem:[%s7725_s17 + $0x48] sm:$0xff] %v4578_v45  ;;  %v4681_v32 = vsel %vm4665_vm9, %v4578_v45, 0.0  ;;  %v4636_v28 = vadd.s32 112, %v7703_v26  ;;  %v6032_v59 = vadd.f32 %v7992_v8, %v7991_v0  ;;  %v4593_v46 = vpop.f32.mrf.mxu1 }
 0x2de   : > { %v4696_v47 = vadd.f32 %v4695_v25, %v4681_v32  ;;  %v4718_v2 = vmul.f32 %v4681_v32, %v4681_v32  ;;  %v6147_v4 = vpop.f32.mrf.mxu0  ;;  %v7990_v25 = vld [vmem:[#allocation38_spill] sm:$0xff] }
 0x2df   : > { %v4583_v39 = vadd.f32 %v7772_v7, %v4486_v17  ;;  %v6148_v62 = vadd.f32 %v6147_v4, %v6146_v21  ;;  %v6093_v43 = vadd.f32 %v7990_v25, %v7989_v16  ;;  %v4654_v41 = vadd.s32 %v7705_v6, %v4636_v28 }
 0x2e0   : > { %v4733_v23 = vadd.f32 %v4732_v48, %v4718_v2  ;;  %v6149_v37 = vpop.f32.mrf.mxu0  ;;  %v7993_v2 = vld [vmem:[#allocation19_spill] sm:$0xff] }
 0x2e1   : > { %4615 = vst [vmem:[%s7725_s17 + $0x50] sm:$0xff] %v4583_v39  ;;  %v4682_v9 = vsel %vm4666_vm10, %v4583_v39, 0.0  ;;  %v4489_v56 = vadd.f32 %v6148_v62, %v4392_v63  ;;  %v4405_v18 = vadd.f32 %v6093_v43, %v4308_v31  ;;  %v4311_v4 = vadd.f32 %v6032_v59, %v7993_v2  ;;  %v7994_v63 = vld [vmem:[#allocation40_spill] sm:$0xff] }
 0x2e2   : > { %v4697_v49 = vadd.f32 %v4696_v47, %v4682_v9  ;;  %v4719_v24 = vmul.f32 %v4682_v9, %v4682_v9  ;;  %v6150_v7 = vpop.f32.mrf.mxu0  ;;  %v4637_v47 = vadd.s32 120, %v7703_v26  ;;  %v6096_v51 = vadd.f32 %v7995_v40, %v7994_v63 }
 0x2e3   : > { %v4586_v13 = vadd.f32 %v7794_v61, %v4489_v56  ;;  %v6151_v50 = vadd.f32 %v6150_v7, %v6149_v37  ;;  %vm4670_vm14 = vcmp.lt.s32.totalorder %v4654_v41, 320 }
 0x2e4   : > { %v4734_v15 = vadd.f32 %v4733_v23, %v4719_v24  ;;  %v6152_v3 = vpop.f32.mrf.mxu0  ;;  %v4655_v26 = vadd.s32 %v7705_v6, %v4637_v47 }
 0x2e5   : > { %4616 = vst [vmem:[%s7725_s17 + $0x58] sm:$0xff] %v4586_v13  ;;  %v4494_v12 = vadd.f32 %v6151_v50, %v4397_v58  ;;  %v4683_v29 = vsel %vm4667_vm11, %v4586_v13, 0.0  ;;  %v4408_v58 = vadd.f32 %v6096_v51, %v4311_v4 }
 0x2e6   : > { %v4698_v20 = vadd.f32 %v4697_v49, %v4683_v29  ;;  %v4720_v61 = vmul.f32 %v4683_v29, %v4683_v29  ;;  %v6153_v27 = vpop.f32.mrf.mxu0  ;;  %vm4671_vm15 = vcmp.lt.s32.totalorder %v4655_v26, 320 }
 0x2e7   : > { %v4591_v45 = vadd.f32 %v4590_v38, %v4494_v12  ;;  %v6154_v48 = vadd.f32 %v6153_v27, %v6152_v3 }
 0x2e8   : > { %v4735_v21 = vadd.f32 %v4734_v15, %v4720_v61  ;;  %v6155_v42 = vpop.f32.mrf.mxu0 }
 0x2e9   : > { %4617 = vst [vmem:[%s7725_s17 + $0x60] sm:$0xff] %v4591_v45  ;;  %v4684_v17 = vsel %vm4668_vm12, %v4591_v45, 0.0  ;;  %v4497_v32 = vadd.f32 %v6154_v48, %v4400_v14 }
 0x2ea   : > { %v4699_v10 = vadd.f32 %v4698_v20, %v4684_v17  ;;  %v4721_v44 = vmul.f32 %v4684_v17, %v4684_v17  ;;  %v6156_v1 = vpop.f32.mrf.mxu0 }
 0x2eb   : > { %v4594_v22 = vadd.f32 %v4593_v46, %v4497_v32  ;;  %v6157_v39 = vadd.f32 %v6156_v1, %v6155_v42 }
 0x2ec   : > { %v4736_v62 = vadd.f32 %v4735_v21, %v4721_v44  ;;  %v6158_v23 = vpop.f32.mrf.mxu0 }
 0x2ed   : > { %4618 = vst [vmem:[%s7725_s17 + $0x68] sm:$0xff] %v4594_v22  ;;  %v4685_v37 = vsel %vm4669_vm13, %v4594_v22, 0.0  ;;  %v4502_v55 = vadd.f32 %v6157_v39, %v4405_v18 }
 0x2ee   : > { %v4700_v9 = vadd.f32 %v4699_v10, %v4685_v37  ;;  %v4722_v56 = vmul.f32 %v4685_v37, %v4685_v37  ;;  %v6159_v53 = vpop.f32.mrf.mxu0 }
 0x2ef   : > { %v4599_v19 = vadd.f32 %v7821_v57, %v4502_v55  ;;  %v6160_v60 = vadd.f32 %v6159_v53, %v6158_v23 }
 0x2f0   : > { %v4737_v36 = vadd.f32 %v4736_v62, %v4722_v56 }
 0x2f1   : > { %4619 = vst [vmem:[%s7725_s17 + $0x70] sm:$0xff] %v4599_v19  ;;  %v4686_v49 = vsel %vm4670_vm14, %v4599_v19, 0.0  ;;  %v4505_v24 = vadd.f32 %v6160_v60, %v4408_v58 }
 0x2f2   : > { %v4701_v7 = vadd.f32 %v4700_v9, %v4686_v49  ;;  %v4723_v38 = vmul.f32 %v4686_v49, %v4686_v49 }
 0x2f3   : > { %v4602_v5 = vadd.f32 %v6208_v30, %v4505_v24 }
 0x2f4   : > { %v4738_v34 = vadd.f32 %v4737_v36, %v4723_v38 }
 0x2f5   : > { %4620 = vst [vmem:[%s7725_s17 + $0x78] sm:$0xff] %v4602_v5  ;;  %v4687_v54 = vsel %vm4671_vm15, %v4602_v5, 0.0 }
 0x2f6   : > { %v4702_v35 = vadd.f32 %v4701_v7, %v4687_v54  ;;  %v4724_v11 = vmul.f32 %v4687_v54, %v4687_v54 }
 0x2f8   : > { %v4703_v13 = vrot.slane %v4702_v35, 4  ;;  %v4739_v50 = vadd.f32 %v4738_v34, %v4724_v11 }
 0x2fa   : > { %v4704_v6 = vadd.f32 %v4703_v13, %v4702_v35  ;;  %v4740_v15 = vrot.slane %v4739_v50, 4 }
 0x2fc   : > { %v4705_v3 = vrot.slane %v4704_v6, 2  ;;  %v4741_v57 = vadd.f32 %v4740_v15, %v4739_v50 }
 0x2fe   : > { %v4706_v12 = vadd.f32 %v4705_v3, %v4704_v6  ;;  %v4742_v29 = vrot.slane %v4741_v57, 2 }
 0x300   : > { %v4707_v33 = vrot.slane %v4706_v12, 1  ;;  %v4743_v28 = vadd.f32 %v4742_v29, %v4741_v57 }
 0x302   : > { %v4744_v52 = vrot.slane %v4743_v28, 1  ;;  %v4708_v31 = vadd.f32 %v4707_v33, %v4706_v12 }
 0x303   : > { %4753 = sbr.rel (%p7996_p3) target bundleno = 778 (0x30a), region = 40 }
 0x304   : > { %v4745_v16 = vadd.f32 %v4744_v52, %v4743_v28 }
 0x306   : > { %v4747_v25 = vsel %vm4746_vm0, %v4708_v31, %v4745_v16 }
 0x307   : > { %v4749_v43 = vsel %vm4748_vm1, %v4747_v25, 0.0 }
 0x308   : > { %v6977_v20 = vmov 0.0  }
 0x309   : > { %4754 = vst [vmem:[#allocation8] sm:$0xff] %v6977_v20 }
 0x30a PF: > { %s5328_s21 = sshll.u32 %s7023_s16, 11  ;;  %s4772_s4 = sshll.u32 %s7725_s17, 4  ;;  %s7866_s4 = int_to_ptr.vmem [resolvable:$true] %s4772_s4 }
 0x30b   : > { %s7863_s30 = scalar_lea.hbm %s7921_s2, %s5328_s21  ;;  %s4759_s7 = scalar_lea.sflag [#allocation4], %s7118_s26 }
 0x30c   : > { %s6873_s8 = scalar_lea.vmem %s7866_s4, 2048  ;;  %p7997_p7 = scmp.ne.s32.totalorder %s7932_s6, 0 }
 0x30d   : > { %p6874_p11 = scmp.ne.s32.totalorder %s7866_s4, %s6873_s8  ;;  %s6978_s9 = smov [#allocation7]  }
 0x30e   : > { %s6877_s10 = sshll.u32 %s6978_s9, 4  ;;  %s6878_s10 = int_to_ptr.vmem [resolvable:$false] %s6877_s10 }
 0x30f   : > { %p6875_p12 = pnand %p6874_p11, %p7997_p7  ;;  %s6879_s11 = scalar_lea.vmem %s6878_s10, 4096 }
 0x310   : > { %v4755_v61 = vld [vmem:[#allocation8] sm:$0xff]  ;;  %p6880_p2 = scmp.lt.s32.totalorder %s7866_s4, %s6878_s10  ;;  %p6881_p13 = scmp.lt.s32.totalorder %s6879_s11, %s6873_s8 }
 0x311   : > { %v4756_v27 = vadd.f32 %v4755_v61, %v4749_v43  ;;  %p6876_p8 = pneg %p6875_p12 }
 0x312   : > { %p6882_p0 = por %p6881_p13, %p6880_p2 }
 0x313   : > { %4757 = vst [vmem:[#allocation8] sm:$0xff] %v4756_v27 }
 0x314   : > { %p6883_p5 = pnand %p6882_p0, %p6876_p8 }
 0x316   : > { %6886 = shalt.err (!%p6883_p5)
}
 0x317   : > { %s6887_s22 = scalar_lea.hbm %s7863_s30, 2048  ;;  %s6891_s29 = scalar_lea.hbm %s7921_s2, 6144 }
 0x318   : > { %p6888_p10 = scmp.ne.s32.totalorder %s7863_s30, %s6887_s22  ;;  %p6892_p6 = scmp.lt.s32.totalorder %s7863_s30, %s7921_s2 }
 0x319   : > { %p6893_p9 = scmp.lt.s32.totalorder %s6891_s29, %s6887_s22 }
 0x31a   : > { %p6889_p1 = pnand %p6888_p10, %p7997_p7 }
 0x31b   : > { %p6894_p3 = por %p6893_p9, %p6892_p6 }
 0x31c   : > { %p6890_p4 = pneg %p6889_p1 }
 0x31e   : > { %p6895_p11 = pnand %p6894_p3, %p6890_p4 }
 0x320   : > { %6898 = shalt.err (!%p6895_p11)
}
 0x321   : > { %s6979_s17 = smov 128   ;;  %s6980_s21 = smov 8  }
 0x322   : > { %6218 = dma.vmem_to_hbm [thread:$0]  (%p7997_p7), %s7866_s4, 2048, %s7863_s30, %s4759_s7, %s6979_s17, %s6979_s17, %s6980_s21  }
 0x323   : > { %s6981_s23 = smov [#allocation8]   ;;  %p7998_p8 = scmp.eq.s32.totalorder %s7023_s16, 2 }
 0x324   : > { %s4786_s25 = sshll.u32 %s6981_s23, 4  ;;  %s4787_s25 = int_to_ptr.vmem [resolvable:$true] %s4786_s25 }
 0x325   : > { %s6899_s8 = scalar_lea.vmem %s4787_s25, 128  ;;  %p6906_p0 = scmp.lt.s32.totalorder %s4787_s25, %s4787_s25 }
 0x326   : > { %p6900_p12 = scmp.ne.s32.totalorder %s4787_s25, %s6899_s8  ;;  %p6907_p5 = scmp.lt.s32.totalorder %s6899_s8, %s6899_s8 }
 0x328   : > { %p6901_p2 = pnand %p6900_p12, %p7998_p8  ;;  %p6908_p10 = por %p6907_p5, %p6906_p0 }
 0x32a   : > { %p6902_p13 = pneg %p6901_p2 }
 0x32c   : > { %p6909_p1 = pnand %p6908_p10, %p6902_p13 }
 0x32e   : > { %6912 = shalt.err (!%p6909_p1)
}
 0x32f   : > { %p7999_p4 = pmov %p7998_p8 }
 0x331   : > { %6220 = dma.vmem_to_hbm [thread:$0]  (%p7999_p4), %s4787_s25, 128, %s7922_s3, [#allocation9]  }
 0x332   : > { %p8000_p7 = pmov %p7999_p4 }
 0x333   : > { %p8001_p6 = pmov %p7999_p4 }
 0x334   : > { %6948 = dma.done.wait (%p8000_p7), [#allocation9], 128  }
 0x335   : > { %6950 = vsyncadd (%p8001_p6), [#allocation9], 4294967168 }
 0x336 PF: > { %p6241_p9 = scmp.ge.s32.totalorder %s6969_s15, 2  ;;  %s4802_s6 = sand.u32 1, %s6957_s12  }
 0x337   : > { %p8002_p3 = scmp.ne.s32.totalorder %s7928_s19, 0  ;;  %s4803_s26 = scalar_lea.sflag [#allocation4], %s4802_s6 }
 0x339   : > { %p6233_p11 = pnand %p6241_p9, %p8002_p3 }
 0x33b   : > { %p6234_p12 = pneg %p6233_p11 }
 0x33d   : > { %6952 = dma.done.wait (%p6234_p12), %s4803_s26, 2048  }
 0x33e   : > { %6954 = vsyncadd (%p6234_p12), %s4803_s26, 4294965248  ;;  %p19_p8 = scmp.ge.s32.totalorder %s7056_s24, 5   ;;  %s8003_s12 = smov %s6961_s13 }
 0x33f   : > { %s8004_s13 = smov %s6965_s14  ;;  %s8005_s14 = smov %s7073_s5 }
 0x340   : > { %s8006_s15 = smov %s7056_s24  ;;  %21 = sbr.rel (!%p19_p8) target bundleno = 7 (0x7), region = 89 }
 0x345   :  { %4808 = vsyncpa [#allocation3], 1 }
 0x346   :  { %4810 = vsyncpa [#allocation3 + $0x1], 1 }
 0x347   :  { %4811 = vsyncpa [#allocation6], 1 }
 0x348   :  { %4812 = vsyncpa [#allocation4], 1 }
 0x349   :  { %4814 = vsyncpa [#allocation4 + $0x1], 1 }
 0x34a   :  { %4815 = vsyncpa [#allocation9], 1 }

</bundles_post_ra>
